<compile_context>
chip_gen: v7x
topology: tpu7x:2x2x1
jax: 0.10.0
libtpu: 0.0.40
codegen_flags: <defaults>
</compile_context>

<pallas_src>
import math

import jax
import jax.numpy as jnp
from jax import lax
from jax.experimental import pallas as pl
from jax.experimental.pallas import tpu as pltpu

LEAKY_SLOPE = 0.01  # torch.nn.LeakyReLU default negative_slope


def _leaky(x):
    return jnp.where(x > 0, x, LEAKY_SLOPE * x)


def convblock_kernel(xp_ref, w1_ref, b1_ref, w2_ref, b2_ref, o_ref, h1_ref):
    # xp_ref : (B, H+2, W+2, Cin)     zero-padded NHWC input tile
    # w1_ref : (3, 3, Cin, Cmid_p)    HWIO, Cmid zero-padded to 128 (lane-dense)
    # b1_ref : (1, Cmid_p)            float32 (zero-padded)
    # w2_ref : (3, 3, Cmid_p, Cout)   HWIO (true Cout, input chans padded)
    # b2_ref : (1, Cout)              float32
    # o_ref  : (B, H//2, W//2, Cout)
    # h1_ref : (B, H+2, W+2, Cmid_p)  lane-dense VMEM scratch (padded interm.)
    B, Hp, Wp, Cin = xp_ref.shape
    H, W = Hp - 2, Wp - 2
    Cmid = w1_ref.shape[3]
    Cout = w2_ref.shape[3]
    M = B * H * W
    cdt = xp_ref.dtype

    def conv3x3(x_pad, w_ref, b_ref):
        # x_pad: (B, H+2, W+2, C) value.  Hoist the W (sublane) shift out of
        # the ky loop: only 3 sublane-unaligned relayouts per conv.  The ky
        # slice is along a major dim (free) and the (M, C) flatten keeps the
        # (sublane, lane) layout because W is a multiple of 8.
        cols = [x_pad[:, :, kx:kx + W, :] for kx in range(3)]  # (B, H+2, W, C)
        acc = None
        for kx in range(3):
            for ky in range(3):
                tap = cols[kx][:, ky:ky + H, :, :].reshape(M, -1)
                p = jnp.dot(tap, w_ref[ky, kx],
                            preferred_element_type=jnp.float32)
                acc = p if acc is None else acc + p
        return _leaky(acc + b_ref[...])          # (M, C_out) float32

    # ---- conv1 (3x3, pad=1) + LeakyReLU (Cmid lane-padded) ----
    a1 = conv3x3(xp_ref[...], w1_ref, b1_ref)                # (M, Cmid) f32

    # conv1 -> conv2 hand-off through a lane-dense VMEM scratch: zero only
    # the four 1-pixel border strips (iteration-independent, so it stays
    # correct with a "parallel" batch grid axis), then overwrite the interior.
    # TODO(synk): replace with a value-level padded view (drop the scratch
    # round-trip) once the unaligned sublane pad/concat lowering is verified.
    zrow = jnp.zeros((B, 1, Wp, Cmid), cdt)
    zcol = jnp.zeros((B, Hp, 1, Cmid), cdt)
    h1_ref[:, 0:1, :, :] = zrow
    h1_ref[:, H + 1:H + 2, :, :] = zrow
    h1_ref[:, :, 0:1, :] = zcol
    h1_ref[:, :, W + 1:W + 2, :] = zcol
    h1_ref[:, 1:H + 1, 1:W + 1, :] = a1.reshape(B, H, W, Cmid).astype(cdt)

    # ---- conv2 (3x3, pad=1) + LeakyReLU; true Cout so the HBM writeback is
    # not inflated 16x by lane padding (biggest win on v5e) ----
    # TODO(synk): fold the 9 taps into one K = 9*Cmid matmul (aligned lane
    # concat) after confirming the concat lowering with pl.lower_as_mlir.
    a2 = conv3x3(h1_ref[...], w2_ref, b2_ref)                 # (M, Cout) f32
    a2 = a2.reshape(B, H, W, Cout)

    # ---- MaxPool2d(kernel=2, stride=2) as two pairwise maxima ----
    h_pair = a2.reshape(B, H // 2, 2, W, Cout).max(axis=2)            # (B,H/2,W,C)
    pooled = h_pair.reshape(B, H // 2, W // 2, 2, Cout).max(axis=3)   # (B,H/2,W/2,C)

    o_ref[...] = pooled.astype(o_ref.dtype)


def _phys_bytes(shape, dtype):
    """Physical VMEM footprint of a dense array incl. (sublane, 128) tiling."""
    d = jnp.dtype(dtype).itemsize
    sub = max(8, 32 // d)            # 8 sublanes for f32, 16 for bf16
    if len(shape) < 2:
        n = shape[0] if shape else 1
        return max(512, n * d)
    lead = math.prod(shape[:-2])
    s = -(-shape[-2] // sub) * sub
    c = -(-shape[-1] // 128) * 128
    return lead * s * c * d


def _vmem_limit_bytes():
    """Generation-aware VMEM limit (~3/4 of physical; 64 MiB parts on v7x)."""
    cap = 64 << 20                    # conservative default (v7x per-TC)
    try:
        cap = int(getattr(pltpu.get_tpu_info(), "vmem_capacity_bytes", cap))
    except Exception:
        pass
    return max(32 << 20, min(3 * cap // 4, 112 << 20))


def _pick_batch_tile(N, H, W, Cin, Cmid_p, Cout, cdt, vmem_limit):
    """Largest divisor of N whose *physical* per-step footprint fits VMEM,
    capped so the grid has >= 2 steps (v7x megacore + pipelining)."""
    Hp, Wp, Hq, Wq = H + 2, W + 2, H // 2, W // 2
    per_b = (2 * _phys_bytes((1, Hp, Wp, Cin), cdt)                  # in x2
             + 2 * _phys_bytes((1, Hq, Wq, Cout), jnp.float32)       # out x2
             + _phys_bytes((1, Hp, Wp, Cmid_p), cdt)                 # h1 scratch
             + 3 * _phys_bytes((1, Hp, W, Cmid_p), cdt)              # kx views
             + 3 * _phys_bytes((1, H, W, Cmid_p), jnp.float32))      # f32 accs
    fixed = (2 * (_phys_bytes((9, Cin, Cmid_p), cdt)
                  + _phys_bytes((9, Cmid_p, Cout), cdt)
                  + _phys_bytes((1, Cmid_p), jnp.float32)
                  + _phys_bytes((1, Cout), jnp.float32))
             + (4 << 20))                                            # slack
    budget = max(per_b, vmem_limit - fixed)
    bt = max(1, min(N, budget // per_b))
    bt = min(bt, max(1, N // 2))      # keep >= 2 grid steps when N >= 2
    while N % bt:
        bt -= 1
    return int(bt)


def convblock_pallas(x_nchw, w1_oihw, b1, w2_oihw, b2,
                     *, compute_dtype=jnp.float32):
    """x_nchw: (N, Cin, H, W) -> (N, Cout, H//2, W//2), float32 (NCHW)."""
    N, Cin, H, W = x_nchw.shape
    Cmid = w1_oihw.shape[0]
    Cout = w2_oihw.shape[0]
    assert H % 2 == 0 and W % 2 == 0
    assert w2_oihw.shape[1] == Cmid

    Hq, Wq = H // 2, W // 2
    Cmid_p = ((Cmid + 127) // 128) * 128        # lane-dense intermediate chans
    itemsize = jnp.dtype(compute_dtype).itemsize

    # glue (outside the kernel): NCHW -> NHWC, spatial zero-pad (padding=1),
    # OIHW -> HWIO, conv1 out-channels / conv2 in-channels zero-padded to
    # Cmid_p so the hand-off and conv2 taps are full-lane.
    x = jnp.transpose(x_nchw, (0, 2, 3, 1)).astype(compute_dtype)
    x_pad = jnp.pad(x, ((0, 0), (1, 1), (1, 1), (0, 0)))
    w1 = jnp.transpose(w1_oihw, (2, 3, 1, 0))                       # (3,3,Cin,Cmid)
    w1 = jnp.pad(w1, ((0, 0), (0, 0), (0, 0),
                      (0, Cmid_p - Cmid))).astype(compute_dtype)
    b1r = jnp.pad(b1.reshape(1, Cmid),
                  ((0, 0), (0, Cmid_p - Cmid))).astype(jnp.float32)
    w2 = jnp.transpose(w2_oihw, (2, 3, 1, 0))                       # (3,3,Cmid,Cout)
    w2 = jnp.pad(w2, ((0, 0), (0, 0), (0, Cmid_p - Cmid),
                      (0, 0))).astype(compute_dtype)
    b2r = b2.reshape(1, Cout).astype(jnp.float32)

    vmem_limit = _vmem_limit_bytes()
    B_TILE = _pick_batch_tile(N, H, W, Cin, Cmid_p, Cout,
                              compute_dtype, vmem_limit)

    flops = 2 * N * H * W * 9 * (Cin * Cmid_p + Cmid_p * Cout)
    bytes_accessed = (N * (H + 2) * (W + 2) * Cin * itemsize
                      + 9 * (Cin * Cmid_p + Cmid_p * Cout) * itemsize
                      + (Cmid_p + Cout) * 4
                      + N * Hq * Wq * Cout * 4)

    out_nhwc = pl.pallas_call(
        convblock_kernel,
        out_shape=jax.ShapeDtypeStruct((N, Hq, Wq, Cout), jnp.float32),
        grid_spec=pltpu.PrefetchScalarGridSpec(
            num_scalar_prefetch=0,
            grid=(N // B_TILE,),
            in_specs=[
                pl.BlockSpec((B_TILE, H + 2, W + 2, Cin),
                             lambda n: (n, 0, 0, 0)),
                pl.BlockSpec((3, 3, Cin, Cmid_p), lambda n: (0, 0, 0, 0)),
                pl.BlockSpec((1, Cmid_p), lambda n: (0, 0)),
                pl.BlockSpec((3, 3, Cmid_p, Cout), lambda n: (0, 0, 0, 0)),
                pl.BlockSpec((1, Cout), lambda n: (0, 0)),
            ],
            out_specs=pl.BlockSpec((B_TILE, Hq, Wq, Cout),
                                   lambda n: (n, 0, 0, 0)),
            scratch_shapes=[
                pltpu.VMEM((B_TILE, H + 2, W + 2, Cmid_p), compute_dtype)],
        ),
        compiler_params=pltpu.CompilerParams(
            dimension_semantics=("parallel",),     # batch elems independent
            vmem_limit_bytes=vmem_limit),
        cost_estimate=pl.CostEstimate(flops=flops, transcendentals=0,
                                      bytes_accessed=bytes_accessed),
    )(x_pad, w1, b1r, w2, b2r)

    # back to NCHW to match torch (no channel slice needed: true Cout output)
    return jnp.transpose(out_nhwc, (0, 3, 1, 2))


def convblock_ref(x_nchw, w1_oihw, b1, w2_oihw, b2):
    """Pure-JAX reference (mirrors the PyTorch module), NCHW in/out."""
    x = jnp.transpose(x_nchw, (0, 2, 3, 1))
    w1 = jnp.transpose(w1_oihw, (2, 3, 1, 0))
    w2 = jnp.transpose(w2_oihw, (2, 3, 1, 0))
    dn = lax.conv_dimension_numbers(x.shape, w1.shape, ("NHWC", "HWIO", "NHWC"))
    y = lax.conv_general_dilated(x, w1, (1, 1), "SAME", dimension_numbers=dn)
    y = _leaky(y + b1.reshape(1, 1, 1, -1))
    dn2 = lax.conv_dimension_numbers(y.shape, w2.shape, ("NHWC", "HWIO", "NHWC"))
    z = lax.conv_general_dilated(y, w2, (1, 1), "SAME", dimension_numbers=dn2)
    z = _leaky(z + b2.reshape(1, 1, 1, -1))
    p = lax.reduce_window(z, -jnp.inf, lax.max, (1, 2, 2, 1), (1, 2, 2, 1),
                          "VALID")
    return jnp.transpose(p, (0, 3, 1, 2))


if __name__ == "__main__":
    N, Cin, Cout, H, W = 2, 4, 8, 16, 16

    key = jax.random.PRNGKey(0)
    k_x, k_w1, k_b1, k_w2, k_b2 = jax.random.split(key, 5)

    x = jax.random.normal(k_x, (N, Cin, H, W), jnp.float32)
    # deterministic synthetic parameters (torch Conv2d shapes: OIHW + bias)
    w1 = jax.random.normal(k_w1, (Cout, Cin, 3, 3), jnp.float32) * 0.1
    b1 = jax.random.normal(k_b1, (Cout,), jnp.float32) * 0.1
    w2 = jax.random.normal(k_w2, (Cout, Cout, 3, 3), jnp.float32) * 0.1
    b2 = jax.random.normal(k_b2, (Cout,), jnp.float32) * 0.1

    fn = jax.jit(convblock_pallas)   # default compute_dtype=float32 (exact)
    out = jax.block_until_ready(fn(x, w1, b1, w2, b2))
    ref = jax.block_until_ready(convblock_ref(x, w1, b1, w2, b2))

    assert out.shape == (N, Cout, H // 2, W // 2), out.shape
    max_err = float(jnp.max(jnp.abs(out - ref)))
    assert jnp.allclose(out, ref, atol=1e-4, rtol=1e-4), max_err
    print("KERNEL_OK")
</pallas_src>

<mosaic_0001>
module attributes {stable_mosaic.version = 11 : i64} {
  func.func @convblock_kernel(%arg0: i32, %arg1: memref<1x18x18x4xf32, #tpu.memory_space<vmem>>, %arg2: memref<3x3x4x128xf32, #tpu.memory_space<vmem>>, %arg3: memref<1x128xf32, #tpu.memory_space<vmem>>, %arg4: memref<3x3x128x8xf32, #tpu.memory_space<vmem>>, %arg5: memref<1x8xf32, #tpu.memory_space<vmem>>, %arg6: memref<1x8x8x8xf32, #tpu.memory_space<vmem>>, %arg7: memref<1x18x18x128xf32, #tpu.memory_space<vmem>>) attributes {dimension_semantics = [#tpu.dimension_semantics<parallel>], iteration_bounds = array<i64: 2>, scalar_prefetch = 0 : i64, scratch_operands = 1 : i64, tpu.core_type = #tpu.core_type<tc>, window_params = [{transform_indices = @transform_0, window_bounds = array<i64: 1, 18, 18, 4>}, {pipeline_mode = #tpu.pipeline_mode<synchronous>, transform_indices = @transform_1, window_bounds = array<i64: 3, 3, 4, 128>}, {pipeline_mode = #tpu.pipeline_mode<synchronous>, transform_indices = @transform_2, window_bounds = array<i64: 1, 128>}, {pipeline_mode = #tpu.pipeline_mode<synchronous>, transform_indices = @transform_3, window_bounds = array<i64: 3, 3, 128, 8>}, {pipeline_mode = #tpu.pipeline_mode<synchronous>, transform_indices = @transform_4, window_bounds = array<i64: 1, 8>}, {transform_indices = @transform_5, window_bounds = array<i64: 1, 8, 8, 8>}]} {
    %c0 = arith.constant 0 : index
    %c0_0 = arith.constant 0 : index
    %c0_1 = arith.constant 0 : index
    %c0_2 = arith.constant 0 : index
    %0 = vector.load %arg1[%c0, %c0_0, %c0_1, %c0_2] : memref<1x18x18x4xf32, #tpu.memory_space<vmem>>, vector<1x18x18x4xf32>
    %1 = vector.extract_strided_slice %0 {offsets = [0, 0, 0, 0], sizes = [1, 18, 16, 4], strides = [1, 1, 1, 1]} : vector<1x18x18x4xf32> to vector<1x18x16x4xf32>
    %2 = vector.extract_strided_slice %0 {offsets = [0, 0, 1, 0], sizes = [1, 18, 16, 4], strides = [1, 1, 1, 1]} : vector<1x18x18x4xf32> to vector<1x18x16x4xf32>
    %3 = vector.extract_strided_slice %0 {offsets = [0, 0, 2, 0], sizes = [1, 18, 16, 4], strides = [1, 1, 1, 1]} : vector<1x18x18x4xf32> to vector<1x18x16x4xf32>
    %4 = vector.extract_strided_slice %1 {offsets = [0, 0, 0, 0], sizes = [1, 16, 16, 4], strides = [1, 1, 1, 1]} : vector<1x18x16x4xf32> to vector<1x16x16x4xf32>
    %5 = vector.shape_cast %4 : vector<1x16x16x4xf32> to vector<256x4xf32>
    %c0_3 = arith.constant 0 : index
    %c0_4 = arith.constant 0 : index
    %c0_5 = arith.constant 0 : index
    %c0_6 = arith.constant 0 : index
    %6 = vector.load %arg2[%c0_3, %c0_4, %c0_5, %c0_6] : memref<3x3x4x128xf32, #tpu.memory_space<vmem>>, vector<1x1x4x128xf32>
    %7 = vector.shape_cast %6 : vector<1x1x4x128xf32> to vector<4x128xf32>
    %cst = arith.constant dense<0.000000e+00> : vector<256x128xf32>
    %8 = tpu.matmul %5, %7, %cst {dimension_numbers = #tpu.dot_dimension_numbers<[1], [0], [0], [1], [0, 0, 1, 1], [], []>} : vector<256x4xf32>, vector<4x128xf32>, vector<256x128xf32> -> vector<256x128xf32>
    %9 = vector.extract_strided_slice %1 {offsets = [0, 1, 0, 0], sizes = [1, 16, 16, 4], strides = [1, 1, 1, 1]} : vector<1x18x16x4xf32> to vector<1x16x16x4xf32>
    %10 = vector.shape_cast %9 : vector<1x16x16x4xf32> to vector<256x4xf32>
    %c1 = arith.constant 1 : index
    %c0_7 = arith.constant 0 : index
    %c0_8 = arith.constant 0 : index
    %c0_9 = arith.constant 0 : index
    %11 = vector.load %arg2[%c1, %c0_7, %c0_8, %c0_9] : memref<3x3x4x128xf32, #tpu.memory_space<vmem>>, vector<1x1x4x128xf32>
    %12 = vector.shape_cast %11 : vector<1x1x4x128xf32> to vector<4x128xf32>
    %cst_10 = arith.constant dense<0.000000e+00> : vector<256x128xf32>
    %13 = tpu.matmul %10, %12, %cst_10 {dimension_numbers = #tpu.dot_dimension_numbers<[1], [0], [0], [1], [0, 0, 1, 1], [], []>} : vector<256x4xf32>, vector<4x128xf32>, vector<256x128xf32> -> vector<256x128xf32>
    %14 = arith.addf %8, %13 : vector<256x128xf32>
    %15 = vector.extract_strided_slice %1 {offsets = [0, 2, 0, 0], sizes = [1, 16, 16, 4], strides = [1, 1, 1, 1]} : vector<1x18x16x4xf32> to vector<1x16x16x4xf32>
    %16 = vector.shape_cast %15 : vector<1x16x16x4xf32> to vector<256x4xf32>
    %c2 = arith.constant 2 : index
    %c0_11 = arith.constant 0 : index
    %c0_12 = arith.constant 0 : index
    %c0_13 = arith.constant 0 : index
    %17 = vector.load %arg2[%c2, %c0_11, %c0_12, %c0_13] : memref<3x3x4x128xf32, #tpu.memory_space<vmem>>, vector<1x1x4x128xf32>
    %18 = vector.shape_cast %17 : vector<1x1x4x128xf32> to vector<4x128xf32>
    %cst_14 = arith.constant dense<0.000000e+00> : vector<256x128xf32>
    %19 = tpu.matmul %16, %18, %cst_14 {dimension_numbers = #tpu.dot_dimension_numbers<[1], [0], [0], [1], [0, 0, 1, 1], [], []>} : vector<256x4xf32>, vector<4x128xf32>, vector<256x128xf32> -> vector<256x128xf32>
    %20 = arith.addf %14, %19 : vector<256x128xf32>
    %21 = vector.extract_strided_slice %2 {offsets = [0, 0, 0, 0], sizes = [1, 16, 16, 4], strides = [1, 1, 1, 1]} : vector<1x18x16x4xf32> to vector<1x16x16x4xf32>
    %22 = vector.shape_cast %21 : vector<1x16x16x4xf32> to vector<256x4xf32>
    %c0_15 = arith.constant 0 : index
    %c1_16 = arith.constant 1 : index
    %c0_17 = arith.constant 0 : index
    %c0_18 = arith.constant 0 : index
    %23 = vector.load %arg2[%c0_15, %c1_16, %c0_17, %c0_18] : memref<3x3x4x128xf32, #tpu.memory_space<vmem>>, vector<1x1x4x128xf32>
    %24 = vector.shape_cast %23 : vector<1x1x4x128xf32> to vector<4x128xf32>
    %cst_19 = arith.constant dense<0.000000e+00> : vector<256x128xf32>
    %25 = tpu.matmul %22, %24, %cst_19 {dimension_numbers = #tpu.dot_dimension_numbers<[1], [0], [0], [1], [0, 0, 1, 1], [], []>} : vector<256x4xf32>, vector<4x128xf32>, vector<256x128xf32> -> vector<256x128xf32>
    %26 = arith.addf %20, %25 : vector<256x128xf32>
    %27 = vector.extract_strided_slice %2 {offsets = [0, 1, 0, 0], sizes = [1, 16, 16, 4], strides = [1, 1, 1, 1]} : vector<1x18x16x4xf32> to vector<1x16x16x4xf32>
    %28 = vector.shape_cast %27 : vector<1x16x16x4xf32> to vector<256x4xf32>
    %c1_20 = arith.constant 1 : index
    %c1_21 = arith.constant 1 : index
    %c0_22 = arith.constant 0 : index
    %c0_23 = arith.constant 0 : index
    %29 = vector.load %arg2[%c1_20, %c1_21, %c0_22, %c0_23] : memref<3x3x4x128xf32, #tpu.memory_space<vmem>>, vector<1x1x4x128xf32>
    %30 = vector.shape_cast %29 : vector<1x1x4x128xf32> to vector<4x128xf32>
    %cst_24 = arith.constant dense<0.000000e+00> : vector<256x128xf32>
    %31 = tpu.matmul %28, %30, %cst_24 {dimension_numbers = #tpu.dot_dimension_numbers<[1], [0], [0], [1], [0, 0, 1, 1], [], []>} : vector<256x4xf32>, vector<4x128xf32>, vector<256x128xf32> -> vector<256x128xf32>
    %32 = arith.addf %26, %31 : vector<256x128xf32>
    %33 = vector.extract_strided_slice %2 {offsets = [0, 2, 0, 0], sizes = [1, 16, 16, 4], strides = [1, 1, 1, 1]} : vector<1x18x16x4xf32> to vector<1x16x16x4xf32>
    %34 = vector.shape_cast %33 : vector<1x16x16x4xf32> to vector<256x4xf32>
    %c2_25 = arith.constant 2 : index
    %c1_26 = arith.constant 1 : index
    %c0_27 = arith.constant 0 : index
    %c0_28 = arith.constant 0 : index
    %35 = vector.load %arg2[%c2_25, %c1_26, %c0_27, %c0_28] : memref<3x3x4x128xf32, #tpu.memory_space<vmem>>, vector<1x1x4x128xf32>
    %36 = vector.shape_cast %35 : vector<1x1x4x128xf32> to vector<4x128xf32>
    %cst_29 = arith.constant dense<0.000000e+00> : vector<256x128xf32>
    %37 = tpu.matmul %34, %36, %cst_29 {dimension_numbers = #tpu.dot_dimension_numbers<[1], [0], [0], [1], [0, 0, 1, 1], [], []>} : vector<256x4xf32>, vector<4x128xf32>, vector<256x128xf32> -> vector<256x128xf32>
    %38 = arith.addf %32, %37 : vector<256x128xf32>
    %39 = vector.extract_strided_slice %3 {offsets = [0, 0, 0, 0], sizes = [1, 16, 16, 4], strides = [1, 1, 1, 1]} : vector<1x18x16x4xf32> to vector<1x16x16x4xf32>
    %40 = vector.shape_cast %39 : vector<1x16x16x4xf32> to vector<256x4xf32>
    %c0_30 = arith.constant 0 : index
    %c2_31 = arith.constant 2 : index
    %c0_32 = arith.constant 0 : index
    %c0_33 = arith.constant 0 : index
    %41 = vector.load %arg2[%c0_30, %c2_31, %c0_32, %c0_33] : memref<3x3x4x128xf32, #tpu.memory_space<vmem>>, vector<1x1x4x128xf32>
    %42 = vector.shape_cast %41 : vector<1x1x4x128xf32> to vector<4x128xf32>
    %cst_34 = arith.constant dense<0.000000e+00> : vector<256x128xf32>
    %43 = tpu.matmul %40, %42, %cst_34 {dimension_numbers = #tpu.dot_dimension_numbers<[1], [0], [0], [1], [0, 0, 1, 1], [], []>} : vector<256x4xf32>, vector<4x128xf32>, vector<256x128xf32> -> vector<256x128xf32>
    %44 = arith.addf %38, %43 : vector<256x128xf32>
    %45 = vector.extract_strided_slice %3 {offsets = [0, 1, 0, 0], sizes = [1, 16, 16, 4], strides = [1, 1, 1, 1]} : vector<1x18x16x4xf32> to vector<1x16x16x4xf32>
    %46 = vector.shape_cast %45 : vector<1x16x16x4xf32> to vector<256x4xf32>
    %c1_35 = arith.constant 1 : index
    %c2_36 = arith.constant 2 : index
    %c0_37 = arith.constant 0 : index
    %c0_38 = arith.constant 0 : index
    %47 = vector.load %arg2[%c1_35, %c2_36, %c0_37, %c0_38] : memref<3x3x4x128xf32, #tpu.memory_space<vmem>>, vector<1x1x4x128xf32>
    %48 = vector.shape_cast %47 : vector<1x1x4x128xf32> to vector<4x128xf32>
    %cst_39 = arith.constant dense<0.000000e+00> : vector<256x128xf32>
    %49 = tpu.matmul %46, %48, %cst_39 {dimension_numbers = #tpu.dot_dimension_numbers<[1], [0], [0], [1], [0, 0, 1, 1], [], []>} : vector<256x4xf32>, vector<4x128xf32>, vector<256x128xf32> -> vector<256x128xf32>
    %50 = arith.addf %44, %49 : vector<256x128xf32>
    %51 = vector.extract_strided_slice %3 {offsets = [0, 2, 0, 0], sizes = [1, 16, 16, 4], strides = [1, 1, 1, 1]} : vector<1x18x16x4xf32> to vector<1x16x16x4xf32>
    %52 = vector.shape_cast %51 : vector<1x16x16x4xf32> to vector<256x4xf32>
    %c2_40 = arith.constant 2 : index
    %c2_41 = arith.constant 2 : index
    %c0_42 = arith.constant 0 : index
    %c0_43 = arith.constant 0 : index
    %53 = vector.load %arg2[%c2_40, %c2_41, %c0_42, %c0_43] : memref<3x3x4x128xf32, #tpu.memory_space<vmem>>, vector<1x1x4x128xf32>
    %54 = vector.shape_cast %53 : vector<1x1x4x128xf32> to vector<4x128xf32>
    %cst_44 = arith.constant dense<0.000000e+00> : vector<256x128xf32>
    %55 = tpu.matmul %52, %54, %cst_44 {dimension_numbers = #tpu.dot_dimension_numbers<[1], [0], [0], [1], [0, 0, 1, 1], [], []>} : vector<256x4xf32>, vector<4x128xf32>, vector<256x128xf32> -> vector<256x128xf32>
    %56 = arith.addf %50, %55 : vector<256x128xf32>
    %c0_45 = arith.constant 0 : index
    %c0_46 = arith.constant 0 : index
    %57 = vector.load %arg3[%c0_45, %c0_46] : memref<1x128xf32, #tpu.memory_space<vmem>>, vector<1x128xf32>
    %58 = vector.broadcast %57 : vector<1x128xf32> to vector<256x128xf32>
    %59 = arith.addf %56, %58 : vector<256x128xf32>
    %cst_47 = arith.constant 0.000000e+00 : f32
    %60 = vector.broadcast %cst_47 : f32 to vector<256x128xf32>
    %61 = arith.cmpf ogt, %59, %60 : vector<256x128xf32>
    %cst_48 = arith.constant 0.00999999977 : f32
    %62 = vector.broadcast %cst_48 : f32 to vector<256x128xf32>
    %63 = arith.mulf %62, %59 : vector<256x128xf32>
    %64 = arith.select %61, %59, %63 : vector<256x128xi1>, vector<256x128xf32>
    %cst_49 = arith.constant 0.000000e+00 : f32
    %65 = vector.broadcast %cst_49 : f32 to vector<1x1x18x128xf32>
    %cst_50 = arith.constant 0.000000e+00 : f32
    %66 = vector.broadcast %cst_50 : f32 to vector<1x18x1x128xf32>
    %c0_51 = arith.constant 0 : index
    %c0_52 = arith.constant 0 : index
    %c0_53 = arith.constant 0 : index
    %c0_54 = arith.constant 0 : index
    %67 = vector.load %arg7[%c0_51, %c0_52, %c0_53, %c0_54] : memref<1x18x18x128xf32, #tpu.memory_space<vmem>>, vector<1x1x18x128xf32>
    tpu.vector_store %arg7[%c0_51, %c0_52, %c0_53, %c0_54], %65 {strides = array<i32>} : memref<1x18x18x128xf32, #tpu.memory_space<vmem>>, vector<1x1x18x128xf32>,
    %c0_55 = arith.constant 0 : index
    %c17 = arith.constant 17 : index
    %c0_56 = arith.constant 0 : index
    %c0_57 = arith.constant 0 : index
    %68 = vector.load %arg7[%c0_55, %c17, %c0_56, %c0_57] : memref<1x18x18x128xf32, #tpu.memory_space<vmem>>, vector<1x1x18x128xf32>
    tpu.vector_store %arg7[%c0_55, %c17, %c0_56, %c0_57], %65 {strides = array<i32>} : memref<1x18x18x128xf32, #tpu.memory_space<vmem>>, vector<1x1x18x128xf32>,
    %c0_58 = arith.constant 0 : index
    %c0_59 = arith.constant 0 : index
    %c0_60 = arith.constant 0 : index
    %c0_61 = arith.constant 0 : index
    %69 = vector.load %arg7[%c0_58, %c0_59, %c0_60, %c0_61] : memref<1x18x18x128xf32, #tpu.memory_space<vmem>>, vector<1x18x1x128xf32>
    tpu.vector_store %arg7[%c0_58, %c0_59, %c0_60, %c0_61], %66 {strides = array<i32>} : memref<1x18x18x128xf32, #tpu.memory_space<vmem>>, vector<1x18x1x128xf32>,
    %c0_62 = arith.constant 0 : index
    %c0_63 = arith.constant 0 : index
    %c17_64 = arith.constant 17 : index
    %c0_65 = arith.constant 0 : index
    %70 = vector.load %arg7[%c0_62, %c0_63, %c17_64, %c0_65] : memref<1x18x18x128xf32, #tpu.memory_space<vmem>>, vector<1x18x1x128xf32>
    tpu.vector_store %arg7[%c0_62, %c0_63, %c17_64, %c0_65], %66 {strides = array<i32>} : memref<1x18x18x128xf32, #tpu.memory_space<vmem>>, vector<1x18x1x128xf32>,
    %71 = vector.shape_cast %64 : vector<256x128xf32> to vector<1x16x16x128xf32>
    %c0_66 = arith.constant 0 : index
    %c1_67 = arith.constant 1 : index
    %c1_68 = arith.constant 1 : index
    %c0_69 = arith.constant 0 : index
    %72 = vector.load %arg7[%c0_66, %c1_67, %c1_68, %c0_69] : memref<1x18x18x128xf32, #tpu.memory_space<vmem>>, vector<1x16x16x128xf32>
    tpu.vector_store %arg7[%c0_66, %c1_67, %c1_68, %c0_69], %71 {strides = array<i32>} : memref<1x18x18x128xf32, #tpu.memory_space<vmem>>, vector<1x16x16x128xf32>,
    %c0_70 = arith.constant 0 : index
    %c0_71 = arith.constant 0 : index
    %c0_72 = arith.constant 0 : index
    %c0_73 = arith.constant 0 : index
    %73 = vector.load %arg7[%c0_70, %c0_71, %c0_72, %c0_73] : memref<1x18x18x128xf32, #tpu.memory_space<vmem>>, vector<1x18x18x128xf32>
    %74 = vector.extract_strided_slice %73 {offsets = [0, 0, 0, 0], sizes = [1, 18, 16, 128], strides = [1, 1, 1, 1]} : vector<1x18x18x128xf32> to vector<1x18x16x128xf32>
    %75 = vector.extract_strided_slice %73 {offsets = [0, 0, 1, 0], sizes = [1, 18, 16, 128], strides = [1, 1, 1, 1]} : vector<1x18x18x128xf32> to vector<1x18x16x128xf32>
    %76 = vector.extract_strided_slice %73 {offsets = [0, 0, 2, 0], sizes = [1, 18, 16, 128], strides = [1, 1, 1, 1]} : vector<1x18x18x128xf32> to vector<1x18x16x128xf32>
    %77 = vector.extract_strided_slice %74 {offsets = [0, 0, 0, 0], sizes = [1, 16, 16, 128], strides = [1, 1, 1, 1]} : vector<1x18x16x128xf32> to vector<1x16x16x128xf32>
    %78 = vector.shape_cast %77 : vector<1x16x16x128xf32> to vector<256x128xf32>
    %c0_74 = arith.constant 0 : index
    %c0_75 = arith.constant 0 : index
    %c0_76 = arith.constant 0 : index
    %c0_77 = arith.constant 0 : index
    %79 = vector.load %arg4[%c0_74, %c0_75, %c0_76, %c0_77] : memref<3x3x128x8xf32, #tpu.memory_space<vmem>>, vector<1x1x128x8xf32>
    %80 = vector.shape_cast %79 : vector<1x1x128x8xf32> to vector<128x8xf32>
    %cst_78 = arith.constant dense<0.000000e+00> : vector<256x8xf32>
    %81 = tpu.matmul %78, %80, %cst_78 {dimension_numbers = #tpu.dot_dimension_numbers<[1], [0], [0], [1], [0, 0, 1, 1], [], []>} : vector<256x128xf32>, vector<128x8xf32>, vector<256x8xf32> -> vector<256x8xf32>
    %82 = vector.extract_strided_slice %74 {offsets = [0, 1, 0, 0], sizes = [1, 16, 16, 128], strides = [1, 1, 1, 1]} : vector<1x18x16x128xf32> to vector<1x16x16x128xf32>
    %83 = vector.shape_cast %82 : vector<1x16x16x128xf32> to vector<256x128xf32>
    %c1_79 = arith.constant 1 : index
    %c0_80 = arith.constant 0 : index
    %c0_81 = arith.constant 0 : index
    %c0_82 = arith.constant 0 : index
    %84 = vector.load %arg4[%c1_79, %c0_80, %c0_81, %c0_82] : memref<3x3x128x8xf32, #tpu.memory_space<vmem>>, vector<1x1x128x8xf32>
    %85 = vector.shape_cast %84 : vector<1x1x128x8xf32> to vector<128x8xf32>
    %cst_83 = arith.constant dense<0.000000e+00> : vector<256x8xf32>
    %86 = tpu.matmul %83, %85, %cst_83 {dimension_numbers = #tpu.dot_dimension_numbers<[1], [0], [0], [1], [0, 0, 1, 1], [], []>} : vector<256x128xf32>, vector<128x8xf32>, vector<256x8xf32> -> vector<256x8xf32>
    %87 = arith.addf %81, %86 : vector<256x8xf32>
    %88 = vector.extract_strided_slice %74 {offsets = [0, 2, 0, 0], sizes = [1, 16, 16, 128], strides = [1, 1, 1, 1]} : vector<1x18x16x128xf32> to vector<1x16x16x128xf32>
    %89 = vector.shape_cast %88 : vector<1x16x16x128xf32> to vector<256x128xf32>
    %c2_84 = arith.constant 2 : index
    %c0_85 = arith.constant 0 : index
    %c0_86 = arith.constant 0 : index
    %c0_87 = arith.constant 0 : index
    %90 = vector.load %arg4[%c2_84, %c0_85, %c0_86, %c0_87] : memref<3x3x128x8xf32, #tpu.memory_space<vmem>>, vector<1x1x128x8xf32>
    %91 = vector.shape_cast %90 : vector<1x1x128x8xf32> to vector<128x8xf32>
    %cst_88 = arith.constant dense<0.000000e+00> : vector<256x8xf32>
    %92 = tpu.matmul %89, %91, %cst_88 {dimension_numbers = #tpu.dot_dimension_numbers<[1], [0], [0], [1], [0, 0, 1, 1], [], []>} : vector<256x128xf32>, vector<128x8xf32>, vector<256x8xf32> -> vector<256x8xf32>
    %93 = arith.addf %87, %92 : vector<256x8xf32>
    %94 = vector.extract_strided_slice %75 {offsets = [0, 0, 0, 0], sizes = [1, 16, 16, 128], strides = [1, 1, 1, 1]} : vector<1x18x16x128xf32> to vector<1x16x16x128xf32>
    %95 = vector.shape_cast %94 : vector<1x16x16x128xf32> to vector<256x128xf32>
    %c0_89 = arith.constant 0 : index
    %c1_90 = arith.constant 1 : index
    %c0_91 = arith.constant 0 : index
    %c0_92 = arith.constant 0 : index
    %96 = vector.load %arg4[%c0_89, %c1_90, %c0_91, %c0_92] : memref<3x3x128x8xf32, #tpu.memory_space<vmem>>, vector<1x1x128x8xf32>
    %97 = vector.shape_cast %96 : vector<1x1x128x8xf32> to vector<128x8xf32>
    %cst_93 = arith.constant dense<0.000000e+00> : vector<256x8xf32>
    %98 = tpu.matmul %95, %97, %cst_93 {dimension_numbers = #tpu.dot_dimension_numbers<[1], [0], [0], [1], [0, 0, 1, 1], [], []>} : vector<256x128xf32>, vector<128x8xf32>, vector<256x8xf32> -> vector<256x8xf32>
    %99 = arith.addf %93, %98 : vector<256x8xf32>
    %100 = vector.extract_strided_slice %75 {offsets = [0, 1, 0, 0], sizes = [1, 16, 16, 128], strides = [1, 1, 1, 1]} : vector<1x18x16x128xf32> to vector<1x16x16x128xf32>
    %101 = vector.shape_cast %100 : vector<1x16x16x128xf32> to vector<256x128xf32>
    %c1_94 = arith.constant 1 : index
    %c1_95 = arith.constant 1 : index
    %c0_96 = arith.constant 0 : index
    %c0_97 = arith.constant 0 : index
    %102 = vector.load %arg4[%c1_94, %c1_95, %c0_96, %c0_97] : memref<3x3x128x8xf32, #tpu.memory_space<vmem>>, vector<1x1x128x8xf32>
    %103 = vector.shape_cast %102 : vector<1x1x128x8xf32> to vector<128x8xf32>
    %cst_98 = arith.constant dense<0.000000e+00> : vector<256x8xf32>
    %104 = tpu.matmul %101, %103, %cst_98 {dimension_numbers = #tpu.dot_dimension_numbers<[1], [0], [0], [1], [0, 0, 1, 1], [], []>} : vector<256x128xf32>, vector<128x8xf32>, vector<256x8xf32> -> vector<256x8xf32>
    %105 = arith.addf %99, %104 : vector<256x8xf32>
    %106 = vector.extract_strided_slice %75 {offsets = [0, 2, 0, 0], sizes = [1, 16, 16, 128], strides = [1, 1, 1, 1]} : vector<1x18x16x128xf32> to vector<1x16x16x128xf32>
    %107 = vector.shape_cast %106 : vector<1x16x16x128xf32> to vector<256x128xf32>
    %c2_99 = arith.constant 2 : index
    %c1_100 = arith.constant 1 : index
    %c0_101 = arith.constant 0 : index
    %c0_102 = arith.constant 0 : index
    %108 = vector.load %arg4[%c2_99, %c1_100, %c0_101, %c0_102] : memref<3x3x128x8xf32, #tpu.memory_space<vmem>>, vector<1x1x128x8xf32>
    %109 = vector.shape_cast %108 : vector<1x1x128x8xf32> to vector<128x8xf32>
    %cst_103 = arith.constant dense<0.000000e+00> : vector<256x8xf32>
    %110 = tpu.matmul %107, %109, %cst_103 {dimension_numbers = #tpu.dot_dimension_numbers<[1], [0], [0], [1], [0, 0, 1, 1], [], []>} : vector<256x128xf32>, vector<128x8xf32>, vector<256x8xf32> -> vector<256x8xf32>
    %111 = arith.addf %105, %110 : vector<256x8xf32>
    %112 = vector.extract_strided_slice %76 {offsets = [0, 0, 0, 0], sizes = [1, 16, 16, 128], strides = [1, 1, 1, 1]} : vector<1x18x16x128xf32> to vector<1x16x16x128xf32>
    %113 = vector.shape_cast %112 : vector<1x16x16x128xf32> to vector<256x128xf32>
    %c0_104 = arith.constant 0 : index
    %c2_105 = arith.constant 2 : index
    %c0_106 = arith.constant 0 : index
    %c0_107 = arith.constant 0 : index
    %114 = vector.load %arg4[%c0_104, %c2_105, %c0_106, %c0_107] : memref<3x3x128x8xf32, #tpu.memory_space<vmem>>, vector<1x1x128x8xf32>
    %115 = vector.shape_cast %114 : vector<1x1x128x8xf32> to vector<128x8xf32>
    %cst_108 = arith.constant dense<0.000000e+00> : vector<256x8xf32>
    %116 = tpu.matmul %113, %115, %cst_108 {dimension_numbers = #tpu.dot_dimension_numbers<[1], [0], [0], [1], [0, 0, 1, 1], [], []>} : vector<256x128xf32>, vector<128x8xf32>, vector<256x8xf32> -> vector<256x8xf32>
    %117 = arith.addf %111, %116 : vector<256x8xf32>
    %118 = vector.extract_strided_slice %76 {offsets = [0, 1, 0, 0], sizes = [1, 16, 16, 128], strides = [1, 1, 1, 1]} : vector<1x18x16x128xf32> to vector<1x16x16x128xf32>
    %119 = vector.shape_cast %118 : vector<1x16x16x128xf32> to vector<256x128xf32>
    %c1_109 = arith.constant 1 : index
    %c2_110 = arith.constant 2 : index
    %c0_111 = arith.constant 0 : index
    %c0_112 = arith.constant 0 : index
    %120 = vector.load %arg4[%c1_109, %c2_110, %c0_111, %c0_112] : memref<3x3x128x8xf32, #tpu.memory_space<vmem>>, vector<1x1x128x8xf32>
    %121 = vector.shape_cast %120 : vector<1x1x128x8xf32> to vector<128x8xf32>
    %cst_113 = arith.constant dense<0.000000e+00> : vector<256x8xf32>
    %122 = tpu.matmul %119, %121, %cst_113 {dimension_numbers = #tpu.dot_dimension_numbers<[1], [0], [0], [1], [0, 0, 1, 1], [], []>} : vector<256x128xf32>, vector<128x8xf32>, vector<256x8xf32> -> vector<256x8xf32>
    %123 = arith.addf %117, %122 : vector<256x8xf32>
    %124 = vector.extract_strided_slice %76 {offsets = [0, 2, 0, 0], sizes = [1, 16, 16, 128], strides = [1, 1, 1, 1]} : vector<1x18x16x128xf32> to vector<1x16x16x128xf32>
    %125 = vector.shape_cast %124 : vector<1x16x16x128xf32> to vector<256x128xf32>
    %c2_114 = arith.constant 2 : index
    %c2_115 = arith.constant 2 : index
    %c0_116 = arith.constant 0 : index
    %c0_117 = arith.constant 0 : index
    %126 = vector.load %arg4[%c2_114, %c2_115, %c0_116, %c0_117] : memref<3x3x128x8xf32, #tpu.memory_space<vmem>>, vector<1x1x128x8xf32>
    %127 = vector.shape_cast %126 : vector<1x1x128x8xf32> to vector<128x8xf32>
    %cst_118 = arith.constant dense<0.000000e+00> : vector<256x8xf32>
    %128 = tpu.matmul %125, %127, %cst_118 {dimension_numbers = #tpu.dot_dimension_numbers<[1], [0], [0], [1], [0, 0, 1, 1], [], []>} : vector<256x128xf32>, vector<128x8xf32>, vector<256x8xf32> -> vector<256x8xf32>
    %129 = arith.addf %123, %128 : vector<256x8xf32>
    %c0_119 = arith.constant 0 : index
    %c0_120 = arith.constant 0 : index
    %130 = vector.load %arg5[%c0_119, %c0_120] : memref<1x8xf32, #tpu.memory_space<vmem>>, vector<1x8xf32>
    %131 = vector.broadcast %130 : vector<1x8xf32> to vector<256x8xf32>
    %132 = arith.addf %129, %131 : vector<256x8xf32>
    %cst_121 = arith.constant 0.000000e+00 : f32
    %133 = vector.broadcast %cst_121 : f32 to vector<256x8xf32>
    %134 = arith.cmpf ogt, %132, %133 : vector<256x8xf32>
    %cst_122 = arith.constant 0.00999999977 : f32
    %135 = vector.broadcast %cst_122 : f32 to vector<256x8xf32>
    %136 = arith.mulf %135, %132 : vector<256x8xf32>
    %137 = arith.select %134, %132, %136 : vector<256x8xi1>, vector<256x8xf32>
    %138 = vector.shape_cast %137 : vector<256x8xf32> to vector<1x16x16x8xf32>
    %139 = vector.shape_cast %138 : vector<1x16x16x8xf32> to vector<1x8x2x16x8xf32>
    %cst_123 = arith.constant dense<0xFF800000> : vector<1x8x16x8xf32>
    %140 = vector.multi_reduction <maximumf>, %139, %cst_123 [2] : vector<1x8x2x16x8xf32> to vector<1x8x16x8xf32>
    %141 = vector.shape_cast %140 : vector<1x8x16x8xf32> to vector<1x8x8x2x8xf32>
    %cst_124 = arith.constant dense<0xFF800000> : vector<1x8x8x8xf32>
    %142 = vector.multi_reduction <maximumf>, %141, %cst_124 [3] : vector<1x8x8x2x8xf32> to vector<1x8x8x8xf32>
    %c0_125 = arith.constant 0 : index
    %c0_126 = arith.constant 0 : index
    %c0_127 = arith.constant 0 : index
    %c0_128 = arith.constant 0 : index
    %143 = vector.load %arg6[%c0_125, %c0_126, %c0_127, %c0_128] : memref<1x8x8x8xf32, #tpu.memory_space<vmem>>, vector<1x8x8x8xf32>
    tpu.vector_store %arg6[%c0_125, %c0_126, %c0_127, %c0_128], %142 {strides = array<i32>} : memref<1x8x8x8xf32, #tpu.memory_space<vmem>>, vector<1x8x8x8xf32>,
    return
  }
  func.func @transform_0(%arg0: i32) -> (i32, i32, i32, i32) {
    %c0_i32 = arith.constant 0 : i32
    %c0_i32_0 = arith.constant 0 : i32
    %c0_i32_1 = arith.constant 0 : i32
    %c0_i32_2 = arith.constant 0 : i32
    return %arg0, %c0_i32, %c0_i32_0, %c0_i32_1 : i32, i32, i32, i32
  }
  func.func @transform_1(%arg0: i32) -> (i32, i32, i32, i32) {
    %c0_i32 = arith.constant 0 : i32
    %c0_i32_0 = arith.constant 0 : i32
    %c0_i32_1 = arith.constant 0 : i32
    %c0_i32_2 = arith.constant 0 : i32
    %c0_i32_3 = arith.constant 0 : i32
    return %c0_i32, %c0_i32_0, %c0_i32_1, %c0_i32_2 : i32, i32, i32, i32
  }
  func.func @transform_2(%arg0: i32) -> (i32, i32) {
    %c0_i32 = arith.constant 0 : i32
    %c0_i32_0 = arith.constant 0 : i32
    %c0_i32_1 = arith.constant 0 : i32
    return %c0_i32, %c0_i32_0 : i32, i32
  }
  func.func @transform_3(%arg0: i32) -> (i32, i32, i32, i32) {
    %c0_i32 = arith.constant 0 : i32
    %c0_i32_0 = arith.constant 0 : i32
    %c0_i32_1 = arith.constant 0 : i32
    %c0_i32_2 = arith.constant 0 : i32
    %c0_i32_3 = arith.constant 0 : i32
    return %c0_i32, %c0_i32_0, %c0_i32_1, %c0_i32_2 : i32, i32, i32, i32
  }
  func.func @transform_4(%arg0: i32) -> (i32, i32) {
    %c0_i32 = arith.constant 0 : i32
    %c0_i32_0 = arith.constant 0 : i32
    %c0_i32_1 = arith.constant 0 : i32
    return %c0_i32, %c0_i32_0 : i32, i32
  }
  func.func @transform_5(%arg0: i32) -> (i32, i32, i32, i32) {
    %c0_i32 = arith.constant 0 : i32
    %c0_i32_0 = arith.constant 0 : i32
    %c0_i32_1 = arith.constant 0 : i32
    %c0_i32_2 = arith.constant 0 : i32
    return %arg0, %c0_i32, %c0_i32_0, %c0_i32_1 : i32, i32, i32, i32
  }
}

</mosaic_0001>

<bundles_post_ra>
// kernel: convblock_pallas.1
= control target key start
LH: loop header
LB: loop body
LE: loop exit
PB: predicated region body
PF: predicated region fallthrough
CT: control target
= control target key end

     0   :  { %s10428_s18 = smov 0   ;;  %s13123_s0 = inlined_call_operand.vmem [shape: f32[2,18,18,4], index: 0, kind: input, shape index: {}]   ;;  %s13124_s1 = inlined_call_operand.vmem [shape: f32[3,3,4,128], index: 1, kind: input, shape index: {}]   ;;  %s13125_s2 = inlined_call_operand.vmem [shape: f32[1,128], index: 2, kind: input, shape index: {}]   ;;  %s13126_s3 = inlined_call_operand.vmem [shape: f32[3,3,128,8], index: 3, kind: input, shape index: {}]   ;;  %s13127_s4 = inlined_call_operand.vmem [shape: f32[1,8], index: 4, kind: input, shape index: {}]   ;;  %s13128_s5 = inlined_call_operand.vmem [shape: f32[2,8,8,8], index: 5, kind: output, shape index: {}]  }
   0x1 LB: > { %s7181_s19 = sadd.s32 4294967295, %s10394_s18   ;;  %p7185_p0 = scmp.ge.s32.totalorder %s10394_s18, 1  ;;  %s10394_s18 = sphi %s10428_s18, %s15_s18  }
   0x2   : > { %p187_p1 = scmp.lt.s32.totalorder %s10394_s18, 3 }
   0x4   : > { %p188_p2 = pnand %p7185_p0, %p187_p1 }
   0x6   : > { %191 = sbr.rel (%p188_p2) target bundleno = 1692 (0x69c), region = 40 }
   0xd   : > { %v7189_v0 = vld [vmem:[%s13124_s1 + $0xc] sm:$0xf]  ;;  %vm379_vm0 = vcmask 1043456   ;;  %p215_p3 = scmp.lt.s32.totalorder %s7181_s19, 1  ;;  %v279_v1 = vld [vmem:[%s13124_s1] sm:$0xf] }
   0xe   : > { %8356 = vmatprep.subr.msk.mxu0 %vm379_vm0, %v7189_v0  ;;  %vm282_vm1 = vcmask 31744   ;;  %v10467_v5 = vld [vmem:[%s13124_s1 + $0x18] sm:$0xf]  ;;  %v7290_v37 = vld [vmem:[%s13124_s1 + $0x4] sm:$0xf]  ;;  %vm1126_vm2 = vcmask 1046528  }
   0xf   : > { %8357 = vmatpush3.msk.msra.mxu0 %vm379_vm0, %v7189_v0  ;;  %s13204_s19 = smov (!%p215_p3, %s7181_s19), 1  ;;  %v7324_v38 = vld [vmem:[%s13124_s1 + $0x10] sm:$0xf]  ;;  %v10798_v55 = vld [vmem:[%s13124_s1 + $0x1c] sm:$0xf]  ;;  %vm2077_vm3 = vcmask 1045504  }
  0x10   : > { %8406 = vmatprep.subr.msk.mxu0 %vm379_vm0, %v279_v1  ;;  %s10342_s24 = smul.u32 432, %s13204_s19  ;;  %s7626_s10 = sshll.u32 %s13204_s19, 6 }
  0x11   : > { %s12822_s12 = scalar_lea.vmem %s13128_s5, %s7626_s10 }
  0x12   : > { %s10451_s27 = scalar_lea.vmem %s13123_s0, %s10342_s24 }
  0x13   : > { %v10454_v2 = vld [vmem:[%s10451_s27 + $0x18] sm:$0xff]  ;;  %v10457_v3 = vld [vmem:[%s10451_s27 + $0x20] sm:$0xff]  ;;  %v10460_v4 = vld [vmem:[%s10451_s27 + $0x30] sm:$0xff] }
  0x14   : > { %8358 = vmatprep.mubr.msk.f32.mxu0 %vm282_vm1, %v10454_v2  ;;  %v10475_v6 = vld [vmem:[%s10451_s27 + $0x38] sm:$0xff]  ;;  %v10478_v7 = vld [vmem:[%s10451_s27 + $0x48] sm:$0xff]  ;;  %v10487_v8 = vld [vmem:[%s10451_s27 + $0x50] sm:$0xff]  ;;  %v1132_v45 = vrot.slane %v10454_v2, 1  ;;  %v1133_v46 = vrot.slane %v10457_v3, 1  ;;  %v1137_v52 = vrot.slane %v10460_v4, 1 }
  0x15   : > { %8359 = vmatmul.mubr.msk.f32.vlgmr.msra.gmra.mrb[0].mxu0 %vm282_vm1, %v10457_v3  ;;  %v10490_v9 = vld [vmem:[%s10451_s27 + $0x60] sm:$0xff]  ;;  %v10497_v10 = vld [vmem:[%s10451_s27 + $0x68] sm:$0xff]  ;;  %v10500_v11 = vld [vmem:[%s10451_s27 + $0x78] sm:$0xff]  ;;  %v1138_v53 = vrot.slane %v10475_v6, 1  ;;  %v1142_v59 = vrot.slane %v10478_v7, 1  ;;  %v1143_v60 = vrot.slane %v10487_v8, 1 }
  0x16   : > { %8407 = vmatpush3.msk.msra.mxu0 %vm379_vm0, %v279_v1  ;;  %8361 = vmatprep.mubr.msk.f32.mxu0 %vm282_vm1, %v10460_v4  ;;  %v10507_v12 = vld [vmem:[%s10451_s27 + $0x80] sm:$0xff]  ;;  %v10510_v13 = vld [vmem:[%s10451_s27 + $0x90] sm:$0xff]  ;;  %v10517_v14 = vld [vmem:[%s10451_s27 + $0x98] sm:$0xff]  ;;  %v10788_v51 = vsel %vm1126_vm2, %v1132_v45, %v1133_v46  ;;  %v1147_v1 = vrot.slane %v10490_v9, 1 }
  0x17   : > { %8456 = vmatprep.subr.msk.mxu0 %vm379_vm0, %v10467_v5  ;;  %v10520_v15 = vld [vmem:[%s10451_s27 + $0xa8] sm:$0xff]  ;;  %v10527_v16 = vld [vmem:[%s10451_s27 + $0xb0] sm:$0xff]  ;;  %v10530_v17 = vld [vmem:[%s10451_s27 + $0xc0] sm:$0xff]  ;;  %v10809_v58 = vsel %vm1126_vm2, %v1137_v52, %v1138_v53  ;;  %v10827_v0 = vsel %vm1126_vm2, %v1142_v59, %v1143_v60  ;;  %v1153_v45 = vrot.slane %v10507_v12, 1  ;;  %v1157_v52 = vrot.slane %v10510_v13, 1 }
  0x18   : > { %13153 = vst [vmem:[#allocation3_spill] sm:$0xff] %v10520_v15  ;;  %13154 = vst [vmem:[#allocation4_spill] sm:$0xff] %v10527_v16  ;;  %v10537_v18 = vld [vmem:[%s10451_s27 + $0xc8] sm:$0xff]  ;;  %v10540_v19 = vld [vmem:[%s10451_s27 + $0xd8] sm:$0xff] }
  0x19   : > { %8362 = vmatmul.mubr.msk.f32.gmra.mrb[2].mxu0 %vm282_vm1, %v10475_v6  ;;  %13155 = vst [vmem:[#allocation5_spill] sm:$0xff] %v10530_v17  ;;  %13156 = vst [vmem:[#allocation6_spill] sm:$0xff] %v10537_v18  ;;  %v10547_v20 = vld [vmem:[%s10451_s27 + $0xe0] sm:$0xff]  ;;  %v10550_v21 = vld [vmem:[%s10451_s27 + $0xf0] sm:$0xff] }
  0x1a   : > { %8364 = vmatprep.mubr.msk.f32.mxu0 %vm282_vm1, %v10478_v7  ;;  %13157 = vst [vmem:[#allocation7_spill] sm:$0xff] %v10540_v19  ;;  %13158 = vst [vmem:[#allocation8_spill] sm:$0xff] %v10547_v20  ;;  %v10557_v22 = vld [vmem:[%s10451_s27 + $0xf8] sm:$0xff]  ;;  %v10560_v23 = vld [vmem:[%s10451_s27 + $0x108] sm:$0xff] }
  0x1b   : > { %13159 = vst [vmem:[#allocation9_spill] sm:$0xff] %v10550_v21  ;;  %13160 = vst [vmem:[#allocation10_spill] sm:$0xff] %v10557_v22  ;;  %v10567_v24 = vld [vmem:[%s10451_s27 + $0x110] sm:$0xff]  ;;  %v10570_v25 = vld [vmem:[%s10451_s27 + $0x120] sm:$0xff] }
  0x1c   : > { %13161 = vst [vmem:[#allocation11_spill] sm:$0xff] %v10560_v23  ;;  %13162 = vst [vmem:[#allocation12_spill] sm:$0xff] %v10567_v24  ;;  %v10577_v26 = vld [vmem:[%s10451_s27 + $0x128] sm:$0xff]  ;;  %v10580_v27 = vld [vmem:[%s10451_s27 + $0x138] sm:$0xff] }
  0x1d   : > { %8365 = vmatmul.mubr.msk.f32.gmra.mrb[4].mxu0 %vm282_vm1, %v10487_v8  ;;  %13163 = vst [vmem:[#allocation13_spill] sm:$0xff] %v10570_v25  ;;  %13164 = vst [vmem:[#allocation14_spill] sm:$0xff] %v10577_v26  ;;  %v10587_v28 = vld [vmem:[%s10451_s27 + $0x140] sm:$0xff]  ;;  %v10590_v29 = vld [vmem:[%s10451_s27 + $0x150] sm:$0xff] }
  0x1e   : > { %8367 = vmatprep.mubr.msk.f32.mxu0 %vm282_vm1, %v10490_v9  ;;  %13165 = vst [vmem:[#allocation15_spill] sm:$0xff] %v10580_v27  ;;  %13166 = vst [vmem:[#allocation16_spill] sm:$0xff] %v10587_v28  ;;  %v10597_v30 = vld [vmem:[%s10451_s27 + $0x158] sm:$0xff]  ;;  %v10600_v31 = vld [vmem:[%s10451_s27 + $0x168] sm:$0xff] }
  0x1f   : > { %13167 = vst [vmem:[#allocation17_spill] sm:$0xff] %v10590_v29  ;;  %13168 = vst [vmem:[#allocation18_spill] sm:$0xff] %v10597_v30  ;;  %v10607_v32 = vld [vmem:[%s10451_s27 + $0x170] sm:$0xff]  ;;  %v10610_v33 = vld [vmem:[%s10451_s27 + $0x180] sm:$0xff] }
  0x20   : > { %13169 = vst [vmem:[#allocation19_spill] sm:$0xff] %v10607_v32  ;;  %v10617_v34 = vld [vmem:[%s10451_s27 + $0x188] sm:$0xff]  ;;  %v10620_v35 = vld [vmem:[%s10451_s27] sm:$0xff]  ;;  %v10762_v40 = vld [vmem:[%s10451_s27 + $0x198] sm:$0xff] }
  0x21   : > { %8368 = vmatmul.mubr.msk.f32.gmra.mrb[6].mxu0 %vm282_vm1, %v10497_v10  ;;  %v10627_v36 = vld [vmem:[%s10451_s27 + $0x8] sm:$0xff]  ;;  %v1127_v39 = vrot.slane %v10620_v35, 1  ;;  %v10766_v42 = vld [vmem:[%s10451_s27 + $0x10] sm:$0x3]  ;;  %v10773_v43 = vld [vmem:[%s10451_s27 + $0x1a0] sm:$0xff] }
  0x22   : > { %8370 = vmatprep.mubr.msk.f32.mxu0 %vm282_vm1, %v10500_v11  ;;  %v1128_v41 = vrot.slane %v10627_v36, 1  ;;  %v1130_v44 = vrot.slane %v10766_v42, 1  ;;  %v10780_v48 = vld [vmem:[%s10451_s27 + $0x28] sm:$0x3]  ;;  %v10793_v54 = vld [vmem:[%s10451_s27 + $0x40] sm:$0x3] }
  0x23   : > { %v1135_v50 = vrot.slane %v10780_v48, 1  ;;  %v1140_v57 = vrot.slane %v10793_v54, 1  ;;  %v10814_v61 = vld [vmem:[%s10451_s27 + $0x58] sm:$0x3] }
  0x24   : > { %v1129_v47 = vsel %vm1126_vm2, %v1127_v39, %v1128_v41  ;;  %v1131_v49 = vsel %vm1126_vm2, %v1128_v41, %v1130_v44  ;;  %v1145_v63 = vrot.slane %v10814_v61, 1  ;;  %v1152_v44 = vrot.slane %v10500_v11, 1 }
  0x25   : > { %8371 = vmatmul.mubr.msk.f32.gmra.mrb[8].mxu0 %vm282_vm1, %v10507_v12  ;;  %v10805_v56 = vsel %vm1126_vm2, %v1133_v46, %v1135_v50  ;;  %v10823_v62 = vsel %vm1126_vm2, %v1138_v53, %v1140_v57  ;;  %v10848_v46 = vld [vmem:[%s10451_s27 + $0x88] sm:$0x3]  ;;  %v1158_v53 = vrot.slane %v10517_v14, 1  ;;  %v10864_v57 = vld [vmem:[%s10451_s27 + $0xa0] sm:$0x3] }
  0x26   : > { %8373 = vmatprep.mubr.msk.f32.mxu0 %vm282_vm1, %v10510_v13  ;;  %v10859_v50 = vsel %vm1126_vm2, %v1152_v44, %v1153_v45 }
  0x29   : > { %8374 = vmatmul.mubr.msk.f32.gmra.mrb[10].mxu0 %vm282_vm1, %v10517_v14 }
  0x2a   : > { %8376 = vmatprep.mubr.msk.f32.mxu0 %vm282_vm1, %v10520_v15 }
  0x2d   : > { %8377 = vmatmul.mubr.msk.f32.gmra.mrb[12].mxu0 %vm282_vm1, %v10527_v16 }
  0x2e   : > { %8379 = vmatprep.mubr.msk.f32.mxu0 %vm282_vm1, %v10530_v17 }
  0x31   : > { %8380 = vmatmul.mubr.msk.f32.gmra.mrb[14].mxu0 %vm282_vm1, %v10537_v18 }
  0x32   : > { %8382 = vmatprep.mubr.msk.f32.mxu0 %vm282_vm1, %v10540_v19 }
  0x35   : > { %8383 = vmatmul.mubr.msk.f32.gmra.mrb[16].mxu0 %vm282_vm1, %v10547_v20 }
  0x36   : > { %8385 = vmatprep.mubr.msk.f32.mxu0 %vm282_vm1, %v10550_v21 }
  0x39   : > { %8386 = vmatmul.mubr.msk.f32.gmra.mrb[18].mxu0 %vm282_vm1, %v10557_v22 }
  0x3a   : > { %8388 = vmatprep.mubr.msk.f32.mxu0 %vm282_vm1, %v10560_v23 }
  0x3d   : > { %8389 = vmatmul.mubr.msk.f32.gmra.mrb[20].mxu0 %vm282_vm1, %v10567_v24 }
  0x3e   : > { %8391 = vmatprep.mubr.msk.f32.mxu0 %vm282_vm1, %v10570_v25 }
  0x41   : > { %8392 = vmatmul.mubr.msk.f32.gmra.mrb[22].mxu0 %vm282_vm1, %v10577_v26 }
  0x42   : > { %8394 = vmatprep.mubr.msk.f32.mxu0 %vm282_vm1, %v10580_v27 }
  0x45   : > { %8395 = vmatmul.mubr.msk.f32.gmra.mrb[24].mxu0 %vm282_vm1, %v10587_v28 }
  0x46   : > { %8397 = vmatprep.mubr.msk.f32.mxu0 %vm282_vm1, %v10590_v29 }
  0x49   : > { %8398 = vmatmul.mubr.msk.f32.gmra.mrb[26].mxu0 %vm282_vm1, %v10597_v30 }
  0x4a   : > { %8400 = vmatprep.mubr.msk.f32.mxu0 %vm282_vm1, %v10600_v31 }
  0x4d   : > { %8401 = vmatmul.mubr.msk.f32.gmra.mrb[28].mxu0 %vm282_vm1, %v10607_v32 }
  0x4e   : > { %8403 = vmatprep.mubr.msk.f32.mxu0 %vm282_vm1, %v10610_v33 }
  0x51   : > { %8404 = vmatmul.mubr.msk.f32.gmra.mrb[30].mxu0 %vm282_vm1, %v10617_v34 }
  0x52   : > { %8408 = vmatprep.mubr.msk.f32.mxu0 %vm282_vm1, %v10620_v35 }
  0x55   : > { %8409 = vmatmul.mubr.msk.f32.vlgmr.msra.gmra.mrb[0].mxu0 %vm282_vm1, %v10627_v36 }
  0x56   : > { %8457 = vmatpush3.msk.msra.mxu0 %vm379_vm0, %v10467_v5  ;;  %8411 = vmatprep.mubr.msk.f32.mxu0 %vm282_vm1, %v10454_v2  ;;  %v1148_v5 = vrot.slane %v10497_v10, 1 }
  0x57   : > { %8506 = vmatprep.subr.msk.mxu0 %vm379_vm0, %v7290_v37 }
  0x58   : > { %v10843_v41 = vsel %vm1126_vm2, %v1147_v1, %v1148_v5  ;;  %v1162_v1 = vrot.slane %v10520_v15, 1 }
  0x59   : > { %8412 = vmatmul.mubr.msk.f32.gmra.mrb[2].mxu0 %vm282_vm1, %v10457_v3 }
  0x5a   : > { %8414 = vmatprep.mubr.msk.f32.mxu0 %vm282_vm1, %v10460_v4 }
  0x5d   : > { %8415 = vmatmul.mubr.msk.f32.gmra.mrb[4].mxu0 %vm282_vm1, %v10475_v6 }
  0x5e   : > { %8417 = vmatprep.mubr.msk.f32.mxu0 %vm282_vm1, %v10478_v7 }
  0x61   : > { %8418 = vmatmul.mubr.msk.f32.gmra.mrb[6].mxu0 %vm282_vm1, %v10487_v8 }
  0x62   : > { %8420 = vmatprep.mubr.msk.f32.mxu0 %vm282_vm1, %v10490_v9 }
  0x65   : > { %8421 = vmatmul.mubr.msk.f32.gmra.mrb[8].mxu0 %vm282_vm1, %v10497_v10 }
  0x66   : > { %8423 = vmatprep.mubr.msk.f32.mxu0 %vm282_vm1, %v10500_v11 }
  0x69   : > { %8424 = vmatmul.mubr.msk.f32.gmra.mrb[10].mxu0 %vm282_vm1, %v10507_v12 }
  0x6a   : > { %8426 = vmatprep.mubr.msk.f32.mxu0 %vm282_vm1, %v10510_v13 }
  0x6d   : > { %8427 = vmatmul.mubr.msk.f32.gmra.mrb[12].mxu0 %vm282_vm1, %v10517_v14 }
  0x6e   : > { %8429 = vmatprep.mubr.msk.f32.mxu0 %vm282_vm1, %v10520_v15 }
  0x71   : > { %8430 = vmatmul.mubr.msk.f32.gmra.mrb[14].mxu0 %vm282_vm1, %v10527_v16 }
  0x72   : > { %8432 = vmatprep.mubr.msk.f32.mxu0 %vm282_vm1, %v10530_v17 }
  0x75   : > { %8433 = vmatmul.mubr.msk.f32.gmra.mrb[16].mxu0 %vm282_vm1, %v10537_v18 }
  0x76   : > { %8435 = vmatprep.mubr.msk.f32.mxu0 %vm282_vm1, %v10540_v19 }
  0x79   : > { %8436 = vmatmul.mubr.msk.f32.gmra.mrb[18].mxu0 %vm282_vm1, %v10547_v20 }
  0x7a   : > { %8438 = vmatprep.mubr.msk.f32.mxu0 %vm282_vm1, %v10550_v21 }
  0x7d   : > { %8439 = vmatmul.mubr.msk.f32.gmra.mrb[20].mxu0 %vm282_vm1, %v10557_v22 }
  0x7e   : > { %8441 = vmatprep.mubr.msk.f32.mxu0 %vm282_vm1, %v10560_v23 }
  0x81   : > { %8442 = vmatmul.mubr.msk.f32.gmra.mrb[22].mxu0 %vm282_vm1, %v10567_v24 }
  0x82   : > { %8444 = vmatprep.mubr.msk.f32.mxu0 %vm282_vm1, %v10570_v25 }
  0x85   : > { %8445 = vmatmul.mubr.msk.f32.gmra.mrb[24].mxu0 %vm282_vm1, %v10577_v26 }
  0x86   : > { %8447 = vmatprep.mubr.msk.f32.mxu0 %vm282_vm1, %v10580_v27 }
  0x89   : > { %8448 = vmatmul.mubr.msk.f32.gmra.mrb[26].mxu0 %vm282_vm1, %v10587_v28 }
  0x8a   : > { %8450 = vmatprep.mubr.msk.f32.mxu0 %vm282_vm1, %v10590_v29 }
  0x8d   : > { %8451 = vmatmul.mubr.msk.f32.gmra.mrb[28].mxu0 %vm282_vm1, %v10597_v30 }
  0x8e   : > { %8453 = vmatprep.mubr.msk.f32.mxu0 %vm282_vm1, %v10600_v31 }
  0x91   : > { %8454 = vmatmul.mubr.msk.f32.gmra.mrb[30].mxu0 %vm282_vm1, %v10607_v32 }
  0x92   : > { %8458 = vmatprep.mubr.msk.f32.mxu0 %vm282_vm1, %v10460_v4 }
  0x95   : > { %8459 = vmatmul.mubr.msk.f32.vlgmr.msra.gmra.mrb[0].mxu0 %vm282_vm1, %v10475_v6 }
  0x96   : > { %8507 = vmatpush3.msk.msra.mxu0 %vm379_vm0, %v7290_v37  ;;  %8461 = vmatprep.mubr.msk.f32.mxu0 %vm282_vm1, %v10478_v7  ;;  %v10832_v37 = vld [vmem:[%s10451_s27 + $0x70] sm:$0x3] }
  0x97   : > { %8556 = vmatprep.subr.msk.mxu0 %vm379_vm0, %v7324_v38  ;;  %v1150_v39 = vrot.slane %v10832_v37, 1 }
  0x99   : > { %8462 = vmatmul.mubr.msk.f32.gmra.mrb[2].mxu0 %vm282_vm1, %v10487_v8 }
  0x9a   : > { %8464 = vmatprep.mubr.msk.f32.mxu0 %vm282_vm1, %v10490_v9 }
  0x9d   : > { %8465 = vmatmul.mubr.msk.f32.gmra.mrb[4].mxu0 %vm282_vm1, %v10497_v10 }
  0x9e   : > { %8467 = vmatprep.mubr.msk.f32.mxu0 %vm282_vm1, %v10500_v11 }
  0xa1   : > { %8468 = vmatmul.mubr.msk.f32.gmra.mrb[6].mxu0 %vm282_vm1, %v10507_v12 }
  0xa2   : > { %8470 = vmatprep.mubr.msk.f32.mxu0 %vm282_vm1, %v10510_v13 }
  0xa5   : > { %8471 = vmatmul.mubr.msk.f32.gmra.mrb[8].mxu0 %vm282_vm1, %v10517_v14 }
  0xa6   : > { %8473 = vmatprep.mubr.msk.f32.mxu0 %vm282_vm1, %v10520_v15  ;;  %v10896_v15 = vld [vmem:[%s10451_s27 + $0xd0] sm:$0x3] }
  0xa7   : > { %13171 = vst [vmem:[#allocation21_spill] sm:$0xff] %v10896_v15 }
  0xa9   : > { %8474 = vmatmul.mubr.msk.f32.gmra.mrb[10].mxu0 %vm282_vm1, %v10527_v16 }
  0xaa   : > { %8476 = vmatprep.mubr.msk.f32.mxu0 %vm282_vm1, %v10530_v17 }
  0xad   : > { %8477 = vmatmul.mubr.msk.f32.gmra.mrb[12].mxu0 %vm282_vm1, %v10537_v18 }
  0xae   : > { %8479 = vmatprep.mubr.msk.f32.mxu0 %vm282_vm1, %v10540_v19 }
  0xb1   : > { %8480 = vmatmul.mubr.msk.f32.gmra.mrb[14].mxu0 %vm282_vm1, %v10547_v20 }
  0xb2   : > { %8482 = vmatprep.mubr.msk.f32.mxu0 %vm282_vm1, %v10550_v21 }
  0xb5   : > { %8483 = vmatmul.mubr.msk.f32.gmra.mrb[16].mxu0 %vm282_vm1, %v10557_v22 }
  0xb6   : > { %8485 = vmatprep.mubr.msk.f32.mxu0 %vm282_vm1, %v10560_v23 }
  0xb9   : > { %8486 = vmatmul.mubr.msk.f32.gmra.mrb[18].mxu0 %vm282_vm1, %v10567_v24 }
  0xba   : > { %8488 = vmatprep.mubr.msk.f32.mxu0 %vm282_vm1, %v10570_v25 }
  0xbd   : > { %8489 = vmatmul.mubr.msk.f32.gmra.mrb[20].mxu0 %vm282_vm1, %v10577_v26 }
  0xbe   : > { %8491 = vmatprep.mubr.msk.f32.mxu0 %vm282_vm1, %v10580_v27 }
  0xc1   : > { %8492 = vmatmul.mubr.msk.f32.gmra.mrb[22].mxu0 %vm282_vm1, %v10587_v28 }
  0xc2   : > { %8494 = vmatprep.mubr.msk.f32.mxu0 %vm282_vm1, %v10590_v29 }
  0xc5   : > { %8495 = vmatmul.mubr.msk.f32.gmra.mrb[24].mxu0 %vm282_vm1, %v10597_v30 }
  0xc6   : > { %8497 = vmatprep.mubr.msk.f32.mxu0 %vm282_vm1, %v10600_v31 }
  0xc9   : > { %8498 = vmatmul.mubr.msk.f32.gmra.mrb[26].mxu0 %vm282_vm1, %v10607_v32 }
  0xca   : > { %8500 = vmatprep.mubr.msk.f32.mxu0 %vm282_vm1, %v10610_v33 }
  0xcd   : > { %8501 = vmatmul.mubr.msk.f32.gmra.mrb[28].mxu0 %vm282_vm1, %v10617_v34 }
  0xce   : > { %8503 = vmatprep.mubr.msk.f32.mxu0 %vm282_vm1, %v10762_v40 }
  0xd1   : > { %8504 = vmatmul.mubr.msk.f32.gmra.mrb[30].mxu0 %vm282_vm1, %v10773_v43 }
  0xd2   : > { %8508 = vmatprep.mubr.msk.f32.mxu0 %vm282_vm1, %v1129_v47  ;;  %v10855_v47 = vsel %vm1126_vm2, %v1148_v5, %v1150_v39  ;;  %v1163_v5 = vrot.slane %v10527_v16, 1  ;;  %v10880_v39 = vld [vmem:[%s10451_s27 + $0xb8] sm:$0x3]  ;;  %v1168_v16 = vrot.slane %v10537_v18, 1  ;;  %v1173_v18 = vrot.slane %v10547_v20, 1 }
  0xd3   : > { %13170 = vst [vmem:[#allocation20_spill] sm:$0xff] %v10880_v39  ;;  %v1178_v20 = vrot.slane %v10557_v22, 1  ;;  %v1183_v22 = vrot.slane %v10567_v24, 1  ;;  %v1188_v24 = vrot.slane %v10577_v26, 1  ;;  %v1193_v26 = vrot.slane %v10587_v28, 1 }
  0xd4   : > { %v1198_v28 = vrot.slane %v10597_v30, 1  ;;  %v1203_v30 = vrot.slane %v10607_v32, 1 }
  0xd5   : > { %8509 = vmatmul.mubr.msk.f32.vlgmr.msra.gmra.mrb[0].mxu0 %vm282_vm1, %v1131_v49  ;;  %v1155_v49 = vrot.slane %v10848_v46, 1 }
  0xd6   : > { %8557 = vmatpush3.msk.msra.mxu0 %vm379_vm0, %v7324_v38  ;;  %8511 = vmatprep.mubr.msk.f32.mxu0 %vm282_vm1, %v10788_v51  ;;  %v10839_v38 = vsel %vm1126_vm2, %v1143_v60, %v1145_v63  ;;  %v1160_v60 = vrot.slane %v10864_v57, 1  ;;  %v10875_v63 = vsel %vm1126_vm2, %v1157_v52, %v1158_v53  ;;  %v1167_v52 = vrot.slane %v10530_v17, 1 }
  0xd7   : > { %8606 = vmatprep.subr.msk.mxu0 %vm379_vm0, %v10798_v55  ;;  %v10871_v59 = vsel %vm1126_vm2, %v1153_v45, %v1155_v49  ;;  %v1165_v45 = vrot.slane %v10880_v39, 1  ;;  %v10891_v49 = vsel %vm1126_vm2, %v1162_v1, %v1163_v5  ;;  %v1172_v17 = vrot.slane %v10540_v19, 1  ;;  %v10912_v39 = vld [vmem:[%s10451_s27 + $0xe8] sm:$0x3] }
  0xd8   : > { %v10887_v44 = vsel %vm1126_vm2, %v1158_v53, %v1160_v60  ;;  %v1170_v60 = vrot.slane %v10896_v15, 1  ;;  %v10907_v1 = vsel %vm1126_vm2, %v1167_v52, %v1168_v16  ;;  %13172 = vst [vmem:[#allocation22_spill] sm:$0xff] %v10912_v39  ;;  %v1177_v19 = vrot.slane %v10550_v21, 1  ;;  %v10928_v15 = vld [vmem:[%s10451_s27 + $0x100] sm:$0x3] }
  0xd9   : > { %8512 = vmatmul.mubr.msk.f32.gmra.mrb[2].mxu0 %vm282_vm1, %v10805_v56  ;;  %v10903_v53 = vsel %vm1126_vm2, %v1163_v5, %v1165_v45  ;;  %v1175_v45 = vrot.slane %v10912_v39, 1  ;;  %v10923_v52 = vsel %vm1126_vm2, %v1172_v17, %v1173_v18  ;;  %13173 = vst [vmem:[#allocation23_spill] sm:$0xff] %v10928_v15  ;;  %v1182_v21 = vrot.slane %v10560_v23, 1  ;;  %v10944_v39 = vld [vmem:[%s10451_s27 + $0x118] sm:$0x3] }
  0xda   : > { %8514 = vmatprep.mubr.msk.f32.mxu0 %vm282_vm1, %v10809_v58  ;;  %v10919_v5 = vsel %vm1126_vm2, %v1168_v16, %v1170_v60  ;;  %v1180_v60 = vrot.slane %v10928_v15, 1  ;;  %v10939_v17 = vsel %vm1126_vm2, %v1177_v19, %v1178_v20  ;;  %13174 = vst [vmem:[#allocation24_spill] sm:$0xff] %v10944_v39  ;;  %v1187_v23 = vrot.slane %v10570_v25, 1  ;;  %v10960_v15 = vld [vmem:[%s10451_s27 + $0x130] sm:$0x3] }
  0xdb   : > { %v10935_v16 = vsel %vm1126_vm2, %v1173_v18, %v1175_v45  ;;  %v1185_v45 = vrot.slane %v10944_v39, 1  ;;  %v10955_v19 = vsel %vm1126_vm2, %v1182_v21, %v1183_v22  ;;  %13175 = vst [vmem:[#allocation25_spill] sm:$0xff] %v10960_v15  ;;  %v1192_v25 = vrot.slane %v10580_v27, 1  ;;  %v10976_v39 = vld [vmem:[%s10451_s27 + $0x148] sm:$0x3] }
  0xdc   : > { %v10951_v18 = vsel %vm1126_vm2, %v1178_v20, %v1180_v60  ;;  %v1190_v60 = vrot.slane %v10960_v15, 1  ;;  %v10971_v21 = vsel %vm1126_vm2, %v1187_v23, %v1188_v24  ;;  %13176 = vst [vmem:[#allocation26_spill] sm:$0xff] %v10976_v39  ;;  %v1197_v27 = vrot.slane %v10590_v29, 1  ;;  %v10992_v15 = vld [vmem:[%s10451_s27 + $0x160] sm:$0x3] }
  0xdd   : > { %8515 = vmatmul.mubr.msk.f32.gmra.mrb[4].mxu0 %vm282_vm1, %v10823_v62  ;;  %v10967_v20 = vsel %vm1126_vm2, %v1183_v22, %v1185_v45  ;;  %v1195_v45 = vrot.slane %v10976_v39, 1  ;;  %v10987_v23 = vsel %vm1126_vm2, %v1192_v25, %v1193_v26  ;;  %v1202_v29 = vrot.slane %v10600_v31, 1  ;;  %v11008_v39 = vld [vmem:[%s10451_s27 + $0x178] sm:$0x3] }
  0xde   : > { %8517 = vmatprep.mubr.msk.f32.mxu0 %vm282_vm1, %v10827_v0  ;;  %v10983_v22 = vsel %vm1126_vm2, %v1188_v24, %v1190_v60  ;;  %v1200_v60 = vrot.slane %v10992_v15, 1  ;;  %v11003_v25 = vsel %vm1126_vm2, %v1197_v27, %v1198_v28 }
  0xdf   : > { %v10999_v24 = vsel %vm1126_vm2, %v1193_v26, %v1195_v45  ;;  %v1205_v45 = vrot.slane %v11008_v39, 1  ;;  %v11019_v27 = vsel %vm1126_vm2, %v1202_v29, %v1203_v30  ;;  %v1534_v29 = vrot.slane %v10610_v33, 1 }
  0xe0   : > { %v11015_v26 = vsel %vm1126_vm2, %v1198_v28, %v1200_v60  ;;  %v7392_v28 = vld [vmem:[%s13124_s1 + $0x8] sm:$0xf] }
  0xe1   : > { %8518 = vmatmul.mubr.msk.f32.gmra.mrb[6].mxu0 %vm282_vm1, %v10839_v38  ;;  %v11026_v32 = vsel %vm1126_vm2, %v1203_v30, %v1205_v45  ;;  %v1535_v30 = vrot.slane %v10617_v34, 1  ;;  %v7426_v45 = vld [vmem:[%s13124_s1 + $0x14] sm:$0xf] }
  0xe2   : > { %8520 = vmatprep.mubr.msk.f32.mxu0 %vm282_vm1, %v10843_v41 }
  0xe5   : > { %8521 = vmatmul.mubr.msk.f32.gmra.mrb[8].mxu0 %vm282_vm1, %v10855_v47 }
  0xe6   : > { %8523 = vmatprep.mubr.msk.f32.mxu0 %vm282_vm1, %v10859_v50 }
  0xe9   : > { %8524 = vmatmul.mubr.msk.f32.gmra.mrb[10].mxu0 %vm282_vm1, %v10871_v59 }
  0xea   : > { %8526 = vmatprep.mubr.msk.f32.mxu0 %vm282_vm1, %v10875_v63 }
  0xed   : > { %8527 = vmatmul.mubr.msk.f32.gmra.mrb[12].mxu0 %vm282_vm1, %v10887_v44 }
  0xee   : > { %8529 = vmatprep.mubr.msk.f32.mxu0 %vm282_vm1, %v10891_v49 }
  0xf1   : > { %8530 = vmatmul.mubr.msk.f32.gmra.mrb[14].mxu0 %vm282_vm1, %v10903_v53 }
  0xf2   : > { %8532 = vmatprep.mubr.msk.f32.mxu0 %vm282_vm1, %v10907_v1 }
  0xf5   : > { %8533 = vmatmul.mubr.msk.f32.gmra.mrb[16].mxu0 %vm282_vm1, %v10919_v5 }
  0xf6   : > { %8535 = vmatprep.mubr.msk.f32.mxu0 %vm282_vm1, %v10923_v52 }
  0xf9   : > { %8536 = vmatmul.mubr.msk.f32.gmra.mrb[18].mxu0 %vm282_vm1, %v10935_v16 }
  0xfa   : > { %8538 = vmatprep.mubr.msk.f32.mxu0 %vm282_vm1, %v10939_v17 }
  0xfd   : > { %8539 = vmatmul.mubr.msk.f32.gmra.mrb[20].mxu0 %vm282_vm1, %v10951_v18 }
  0xfe   : > { %8541 = vmatprep.mubr.msk.f32.mxu0 %vm282_vm1, %v10955_v19 }
 0x101   : > { %8542 = vmatmul.mubr.msk.f32.gmra.mrb[22].mxu0 %vm282_vm1, %v10967_v20 }
 0x102   : > { %8544 = vmatprep.mubr.msk.f32.mxu0 %vm282_vm1, %v10971_v21 }
 0x105   : > { %8545 = vmatmul.mubr.msk.f32.gmra.mrb[24].mxu0 %vm282_vm1, %v10983_v22 }
 0x106   : > { %8547 = vmatprep.mubr.msk.f32.mxu0 %vm282_vm1, %v10987_v23 }
 0x109   : > { %8548 = vmatmul.mubr.msk.f32.gmra.mrb[26].mxu0 %vm282_vm1, %v10999_v24 }
 0x10a   : > { %8550 = vmatprep.mubr.msk.f32.mxu0 %vm282_vm1, %v11003_v25 }
 0x10d   : > { %8551 = vmatmul.mubr.msk.f32.gmra.mrb[28].mxu0 %vm282_vm1, %v11015_v26 }
 0x10e   : > { %8553 = vmatprep.mubr.msk.f32.mxu0 %vm282_vm1, %v11019_v27 }
 0x111   : > { %8554 = vmatmul.mubr.msk.f32.gmra.mrb[30].mxu0 %vm282_vm1, %v11026_v32 }
 0x112   : > { %8558 = vmatprep.mubr.msk.f32.mxu0 %vm282_vm1, %v10788_v51  ;;  %v11093_v51 = vld [vmem:[%s10451_s27 + $0x190] sm:$0x3] }
 0x115   : > { %8559 = vmatmul.mubr.msk.f32.vlgmr.msra.gmra.mrb[0].mxu0 %vm282_vm1, %v10805_v56  ;;  %v1536_v56 = vsel %vm1126_vm2, %v1534_v29, %v1535_v30 }
 0x116   : > { %8607 = vmatpush3.msk.msra.mxu0 %vm379_vm0, %v10798_v55  ;;  %8561 = vmatprep.mubr.msk.f32.mxu0 %vm282_vm1, %v10809_v58  ;;  %v1537_v55 = vrot.slane %v11093_v51, 1 }
 0x117   : > { %8656 = vmatprep.subr.msk.mxu0 %vm379_vm0, %v7392_v28 }
 0x118   : > { %v1538_v60 = vsel %vm1126_vm2, %v1535_v30, %v1537_v55  ;;  %v13181_v30 = vld [vmem:[#allocation6_spill] sm:$0xff] }
 0x119   : > { %8562 = vmatmul.mubr.msk.f32.gmra.mrb[2].mxu0 %vm282_vm1, %v10823_v62  ;;  %v2119_v55 = vrot.slane %v13181_v30, 2 }
 0x11a   : > { %8564 = vmatprep.mubr.msk.f32.mxu0 %vm282_vm1, %v10827_v0 }
 0x11d   : > { %8565 = vmatmul.mubr.msk.f32.gmra.mrb[4].mxu0 %vm282_vm1, %v10839_v38 }
 0x11e   : > { %8567 = vmatprep.mubr.msk.f32.mxu0 %vm282_vm1, %v10843_v41 }
 0x121   : > { %8568 = vmatmul.mubr.msk.f32.gmra.mrb[6].mxu0 %vm282_vm1, %v10855_v47 }
 0x122   : > { %8570 = vmatprep.mubr.msk.f32.mxu0 %vm282_vm1, %v10859_v50 }
 0x125   : > { %8571 = vmatmul.mubr.msk.f32.gmra.mrb[8].mxu0 %vm282_vm1, %v10871_v59 }
 0x126   : > { %8573 = vmatprep.mubr.msk.f32.mxu0 %vm282_vm1, %v10875_v63 }
 0x129   : > { %8574 = vmatmul.mubr.msk.f32.gmra.mrb[10].mxu0 %vm282_vm1, %v10887_v44 }
 0x12a   : > { %8576 = vmatprep.mubr.msk.f32.mxu0 %vm282_vm1, %v10891_v49 }
 0x12d   : > { %8577 = vmatmul.mubr.msk.f32.gmra.mrb[12].mxu0 %vm282_vm1, %v10903_v53 }
 0x12e   : > { %8579 = vmatprep.mubr.msk.f32.mxu0 %vm282_vm1, %v10907_v1 }
 0x131   : > { %8580 = vmatmul.mubr.msk.f32.gmra.mrb[14].mxu0 %vm282_vm1, %v10919_v5 }
 0x132   : > { %8582 = vmatprep.mubr.msk.f32.mxu0 %vm282_vm1, %v10923_v52 }
 0x135   : > { %8583 = vmatmul.mubr.msk.f32.gmra.mrb[16].mxu0 %vm282_vm1, %v10935_v16 }
 0x136   : > { %8585 = vmatprep.mubr.msk.f32.mxu0 %vm282_vm1, %v10939_v17 }
 0x139   : > { %8586 = vmatmul.mubr.msk.f32.gmra.mrb[18].mxu0 %vm282_vm1, %v10951_v18 }
 0x13a   : > { %8588 = vmatprep.mubr.msk.f32.mxu0 %vm282_vm1, %v10955_v19 }
 0x13d   : > { %8589 = vmatmul.mubr.msk.f32.gmra.mrb[20].mxu0 %vm282_vm1, %v10967_v20 }
 0x13e   : > { %8591 = vmatprep.mubr.msk.f32.mxu0 %vm282_vm1, %v10971_v21 }
 0x141   : > { %8592 = vmatmul.mubr.msk.f32.gmra.mrb[22].mxu0 %vm282_vm1, %v10983_v22 }
 0x142   : > { %8594 = vmatprep.mubr.msk.f32.mxu0 %vm282_vm1, %v10987_v23 }
 0x145   : > { %8595 = vmatmul.mubr.msk.f32.gmra.mrb[24].mxu0 %vm282_vm1, %v10999_v24 }
 0x146   : > { %8597 = vmatprep.mubr.msk.f32.mxu0 %vm282_vm1, %v11003_v25 }
 0x149   : > { %8598 = vmatmul.mubr.msk.f32.gmra.mrb[26].mxu0 %vm282_vm1, %v11015_v26 }
 0x14a   : > { %8600 = vmatprep.mubr.msk.f32.mxu0 %vm282_vm1, %v11019_v27 }
 0x14d   : > { %8601 = vmatmul.mubr.msk.f32.gmra.mrb[28].mxu0 %vm282_vm1, %v11026_v32 }
 0x14e   : > { %8603 = vmatprep.mubr.msk.f32.mxu0 %vm282_vm1, %v1536_v56 }
 0x151   : > { %8604 = vmatmul.mubr.msk.f32.gmra.mrb[30].mxu0 %vm282_vm1, %v1538_v60 }
 0x152   : > { %8608 = vmatprep.mubr.msk.f32.mxu0 %vm282_vm1, %v10809_v58  ;;  %v1806_v58 = vrot.slane %v10762_v40, 1 }
 0x155   : > { %8609 = vmatmul.mubr.msk.f32.vlgmr.msra.gmra.mrb[0].mxu0 %vm282_vm1, %v10823_v62  ;;  %v1807_v62 = vrot.slane %v10773_v43, 1 }
 0x156   : > { %8657 = vmatpush3.msk.msra.mxu0 %vm379_vm0, %v7392_v28  ;;  %8611 = vmatprep.mubr.msk.f32.mxu0 %vm282_vm1, %v10827_v0  ;;  %v11168_v0 = vld [vmem:[%s10451_s27 + $0x1a8] sm:$0x3]  ;;  %v13180_v28 = vld [vmem:[#allocation5_spill] sm:$0xff] }
 0x157   : > { %8706 = vmatprep.subr.msk.mxu0 %vm379_vm0, %v7426_v45  ;;  %v2118_v29 = vrot.slane %v13180_v28, 2 }
 0x159   : > { %8612 = vmatmul.mubr.msk.f32.gmra.mrb[2].mxu0 %vm282_vm1, %v10839_v38  ;;  %v1809_v38 = vrot.slane %v11168_v0, 1 }
 0x15a   : > { %8614 = vmatprep.mubr.msk.f32.mxu0 %vm282_vm1, %v10843_v41  ;;  %v2078_v41 = vrot.slane %v10620_v35, 2 }
 0x15d   : > { %8615 = vmatmul.mubr.msk.f32.gmra.mrb[4].mxu0 %vm282_vm1, %v10855_v47  ;;  %v1808_v47 = vsel %vm1126_vm2, %v1806_v58, %v1807_v62  ;;  %v11287_v58 = vsel %vm2077_vm3, %v2118_v29, %v2119_v55  ;;  %v13196_v29 = vld [vmem:[#allocation16_spill] sm:$0xff] }
 0x15e   : > { %8617 = vmatprep.mubr.msk.f32.mxu0 %vm282_vm1, %v10859_v50  ;;  %v2079_v50 = vrot.slane %v10627_v36, 2  ;;  %v2086_v36 = vrot.slane %v10780_v48, 2  ;;  %v2091_v48 = vrot.slane %v10793_v54, 2  ;;  %v2096_v54 = vrot.slane %v10814_v61, 2 }
 0x15f   : > { %v2144_v30 = vrot.slane %v13196_v29, 2 }
 0x161   : > { %8618 = vmatmul.mubr.msk.f32.gmra.mrb[6].mxu0 %vm282_vm1, %v10871_v59  ;;  %v1810_v59 = vsel %vm1126_vm2, %v1807_v62, %v1809_v38  ;;  %v13183_v62 = vld [vmem:[#allocation7_spill] sm:$0xff] }
 0x162   : > { %8620 = vmatprep.mubr.msk.f32.mxu0 %vm282_vm1, %v10875_v63  ;;  %v2081_v63 = vrot.slane %v10766_v42, 2  ;;  %v2089_v42 = vrot.slane %v10475_v6, 2  ;;  %v2093_v6 = vrot.slane %v10478_v7, 2  ;;  %v2098_v7 = vrot.slane %v10490_v9, 2 }
 0x163   : > { %v2104_v9 = vrot.slane %v10507_v12, 2  ;;  %v2123_v38 = vrot.slane %v13183_v62, 2 }
 0x164   : > { %v2082_v35 = vsel %vm2077_vm3, %v2079_v50, %v2081_v63 }
 0x165   : > { %8621 = vmatmul.mubr.msk.f32.gmra.mrb[8].mxu0 %vm282_vm1, %v10887_v44  ;;  %v2084_v44 = vrot.slane %v10457_v3, 2 }
 0x166   : > { %8623 = vmatprep.mubr.msk.f32.mxu0 %vm282_vm1, %v10891_v49  ;;  %v2080_v49 = vsel %vm2077_vm3, %v2078_v41, %v2079_v50  ;;  %v13184_v41 = vld [vmem:[#allocation8_spill] sm:$0xff] }
 0x167   : > { %v11203_v3 = vsel %vm2077_vm3, %v2084_v44, %v2086_v36 }
 0x169   : > { %8624 = vmatmul.mubr.msk.f32.gmra.mrb[10].mxu0 %vm282_vm1, %v10903_v53 }
 0x16a   : > { %8626 = vmatprep.mubr.msk.f32.mxu0 %vm282_vm1, %v10907_v1  ;;  %v2088_v1 = vrot.slane %v10460_v4, 2 }
 0x16c   : > { %v11207_v4 = vsel %vm2077_vm3, %v2088_v1, %v2089_v42 }
 0x16d   : > { %8627 = vmatmul.mubr.msk.f32.gmra.mrb[12].mxu0 %vm282_vm1, %v10919_v5  ;;  %v2094_v5 = vrot.slane %v10487_v8, 2  ;;  %v2099_v8 = vrot.slane %v10497_v10, 2 }
 0x16e   : > { %8629 = vmatprep.mubr.msk.f32.mxu0 %vm282_vm1, %v10923_v52  ;;  %v11218_v52 = vsel %vm2077_vm3, %v2089_v42, %v2091_v48  ;;  %v13188_v42 = vld [vmem:[#allocation23_spill] sm:$0xff] }
 0x16f   : > { %v11235_v61 = vsel %vm2077_vm3, %v2098_v7, %v2099_v8  ;;  %v2131_v48 = vrot.slane %v13188_v42, 2  ;;  %v13190_v7 = vld [vmem:[#allocation12_spill] sm:$0xff] }
 0x171   : > { %8630 = vmatmul.mubr.msk.f32.gmra.mrb[14].mxu0 %vm282_vm1, %v10935_v16  ;;  %v11222_v16 = vsel %vm2077_vm3, %v2093_v6, %v2094_v5 }
 0x172   : > { %8632 = vmatprep.mubr.msk.f32.mxu0 %vm282_vm1, %v10939_v17  ;;  %v11231_v17 = vsel %vm2077_vm3, %v2094_v5, %v2096_v54  ;;  %v13189_v5 = vld [vmem:[#allocation11_spill] sm:$0xff] }
 0x173   : > { %v2133_v54 = vrot.slane %v13189_v5, 2  ;;  %v2156_v5 = vrot.slane %v11008_v39, 2  ;;  %v7496_v39 = vld [vmem:[%s13126_s3 + $0x188] sm:$0xff] }
 0x175   : > { %8633 = vmatmul.mubr.msk.f32.gmra.mrb[16].mxu0 %vm282_vm1, %v10951_v18  ;;  %v2101_v18 = vrot.slane %v10832_v37, 2 }
 0x176   : > { %8635 = vmatprep.mubr.msk.f32.mxu0 %vm282_vm1, %v10955_v19  ;;  %v2103_v19 = vrot.slane %v10500_v11, 2  ;;  %v2109_v11 = vrot.slane %v10517_v14, 2 }
 0x177   : > { %v11244_v10 = vsel %vm2077_vm3, %v2099_v8, %v2101_v18  ;;  %v2134_v8 = vrot.slane %v13190_v7, 2 }
 0x178   : > { %v11248_v37 = vsel %vm2077_vm3, %v2103_v19, %v2104_v9  ;;  %v13191_v19 = vld [vmem:[#allocation24_spill] sm:$0xff] }
 0x179   : > { %8636 = vmatmul.mubr.msk.f32.gmra.mrb[18].mxu0 %vm282_vm1, %v10967_v20  ;;  %v2106_v20 = vrot.slane %v10848_v46, 2 }
 0x17a   : > { %8638 = vmatprep.mubr.msk.f32.mxu0 %vm282_vm1, %v10971_v21  ;;  %v2108_v21 = vrot.slane %v10510_v13, 2 }
 0x17b   : > { %v11257_v12 = vsel %vm2077_vm3, %v2104_v9, %v2106_v20  ;;  %v2136_v9 = vrot.slane %v13191_v19, 2  ;;  %v11326_v20 = vsel %vm2077_vm3, %v2133_v54, %v2134_v8  ;;  %v7495_v54 = vld [vmem:[%s13126_s3 + $0x180] sm:$0xff]  ;;  %v7498_v19 = vld [vmem:[%s13126_s3 + $0x198] sm:$0xff] }
 0x17c   : > { %v11261_v46 = vsel %vm2077_vm3, %v2108_v21, %v2109_v11  ;;  %v13192_v21 = vld [vmem:[#allocation13_spill] sm:$0xff]  ;;  %v9526_v7 = vpack.c.bf16 %v7496_v39, %v7495_v54 }
 0x17d   : > { %8639 = vmatmul.mubr.msk.f32.gmra.mrb[20].mxu0 %vm282_vm1, %v10983_v22  ;;  %v2111_v22 = vrot.slane %v10864_v57, 2 }
 0x17e   : > { %8641 = vmatprep.mubr.msk.f32.mxu0 %vm282_vm1, %v10987_v23  ;;  %v13177_v23 = vld [vmem:[#allocation3_spill] sm:$0xff]  ;;  %9814 = vmatprep.subr.bf16.mxu1 %v9526_v7 }
 0x17f   : > { %v11270_v14 = vsel %vm2077_vm3, %v2109_v11, %v2111_v22  ;;  %v2138_v11 = vrot.slane %v13192_v21, 2  ;;  %v13193_v22 = vld [vmem:[#allocation14_spill] sm:$0xff]  ;;  %v7499_v21 = vld [vmem:[%s13126_s3 + $0x1a0] sm:$0xff]  ;;  %9822 = vmatpush3.bf16.msra.mxu1 %v9526_v7 }
 0x181   : > { %8642 = vmatmul.mubr.msk.f32.gmra.mrb[22].mxu0 %vm282_vm1, %v10999_v24  ;;  %v2113_v24 = vrot.slane %v13177_v23, 2  ;;  %v2139_v23 = vrot.slane %v13193_v22, 2  ;;  %v7502_v22 = vld [vmem:[%s13126_s3 + $0x1b8] sm:$0xff] }
 0x182   : > { %8644 = vmatprep.mubr.msk.f32.mxu0 %vm282_vm1, %v11003_v25  ;;  %v13178_v25 = vld [vmem:[#allocation4_spill] sm:$0xff] }
 0x183   : > { %v2114_v13 = vrot.slane %v13178_v25, 2  ;;  %v13194_v25 = vld [vmem:[#allocation25_spill] sm:$0xff] }
 0x185   : > { %8645 = vmatmul.mubr.msk.f32.gmra.mrb[24].mxu0 %vm282_vm1, %v11015_v26  ;;  %v13179_v26 = vld [vmem:[#allocation20_spill] sm:$0xff]  ;;  %v11274_v57 = vsel %vm2077_vm3, %v2113_v24, %v2114_v13  ;;  %v11335_v24 = vsel %vm2077_vm3, %v2134_v8, %v2136_v9  ;;  %v7497_v8 = vld [vmem:[%s13126_s3 + $0x190] sm:$0xff] }
 0x186   : > { %8647 = vmatprep.mubr.msk.f32.mxu0 %vm282_vm1, %v11019_v27  ;;  %v2116_v27 = vrot.slane %v13179_v26, 2  ;;  %v11339_v26 = vsel %vm2077_vm3, %v2138_v11, %v2139_v23  ;;  %v9530_v9 = vpack.c.bf16 %v7498_v19, %v7497_v8 }
 0x188   : > { %9815 = vmatprep.subr.bf16.mxu1 %v9530_v9 }
 0x189   : > { %8648 = vmatmul.mubr.msk.f32.gmra.mrb[26].mxu0 %vm282_vm1, %v11026_v32  ;;  %v2083_v32 = vrot.slane %v10454_v2, 2  ;;  %v11196_v2 = vld [vmem:[%s13124_s1 + $0x20] sm:$0xf]  ;;  %9823 = vmatpush3.bf16.msra.mxu1 %v9530_v9 }
 0x18a   : > { %8650 = vmatprep.mubr.msk.f32.mxu0 %vm282_vm1, %v1536_v56  ;;  %v11283_v56 = vsel %vm2077_vm3, %v2114_v13, %v2116_v27  ;;  %v2141_v13 = vrot.slane %v13194_v25, 2  ;;  %v13195_v27 = vld [vmem:[#allocation15_spill] sm:$0xff]  ;;  %v2485_v25 = vrot.slane %v10617_v34, 2  ;;  %v2756_v34 = vrot.slane %v10773_v43, 2  ;;  %v7504_v43 = vld [vmem:[%s13126_s3 + $0x1c8] sm:$0xff] }
 0x18b   : > { %v11189_v53 = vsel %vm2077_vm3, %v2083_v32, %v2084_v44  ;;  %v13186_v44 = vld [vmem:[#allocation9_spill] sm:$0xff]  ;;  %v2143_v28 = vrot.slane %v13195_v27, 2 }
 0x18d   : > { %8651 = vmatmul.mubr.msk.f32.gmra.mrb[28].mxu0 %vm282_vm1, %v1538_v60  ;;  %v13182_v60 = vld [vmem:[#allocation21_spill] sm:$0xff]  ;;  %v11352_v62 = vsel %vm2077_vm3, %v2143_v28, %v2144_v30 }
 0x18e   : > { %8653 = vmatprep.mubr.msk.f32.mxu0 %vm282_vm1, %v1808_v47  ;;  %v2124_v47 = vrot.slane %v13184_v41, 2 }
 0x190   : > { %v11300_v32 = vsel %vm2077_vm3, %v2123_v38, %v2124_v47  ;;  %v13198_v38 = vld [vmem:[#allocation17_spill] sm:$0xff] }
 0x191   : > { %8654 = vmatmul.mubr.msk.f32.gmra.mrb[30].mxu0 %vm282_vm1, %v1810_v59  ;;  %v13185_v59 = vld [vmem:[#allocation22_spill] sm:$0xff]  ;;  %v2148_v41 = vrot.slane %v13198_v38, 2 }
 0x192   : > { %8658 = vmatprep.mubr.msk.f32.mxu0 %vm282_vm1, %v2080_v49  ;;  %v2126_v63 = vrot.slane %v13185_v59, 2  ;;  %v2128_v49 = vrot.slane %v13186_v44, 2  ;;  %v2151_v44 = vrot.slane %v10992_v15, 2 }
 0x194   : > { %v11309_v1 = vsel %vm2077_vm3, %v2124_v47, %v2126_v63  ;;  %v13199_v47 = vld [vmem:[#allocation18_spill] sm:$0xff] }
 0x195   : > { %8659 = vmatmul.mubr.msk.f32.vlgmr.msra.gmra.mrb[0].mxu0 %vm282_vm1, %v2082_v35  ;;  %v13187_v35 = vld [vmem:[#allocation10_spill] sm:$0xff]  ;;  %v2149_v59 = vrot.slane %v13199_v47, 2 }
 0x196   : > { %8707 = vmatpush3.msk.msra.mxu0 %vm379_vm0, %v7426_v45  ;;  %8661 = vmatprep.mubr.msk.f32.mxu0 %vm282_vm1, %v11189_v53  ;;  %v2121_v45 = vrot.slane %v13182_v60, 2  ;;  %v2129_v36 = vrot.slane %v13187_v35, 2  ;;  %v13197_v60 = vld [vmem:[#allocation26_spill] sm:$0xff]  ;;  %v2153_v35 = vrot.slane %v10600_v31, 2 }
 0x197   : > { %8756 = vmatprep.subr.msk.mxu0 %vm379_vm0, %v11196_v2 }
 0x198   : > { %v11296_v50 = vsel %vm2077_vm3, %v2119_v55, %v2121_v45  ;;  %v11313_v6 = vsel %vm2077_vm3, %v2128_v49, %v2129_v36  ;;  %v11322_v18 = vsel %vm2077_vm3, %v2129_v36, %v2131_v48  ;;  %v11348_v55 = vsel %vm2077_vm3, %v2139_v23, %v2141_v13  ;;  %v13200_v36 = vld [vmem:[#allocation19_spill] sm:$0xff] }
 0x199   : > { %8662 = vmatmul.mubr.msk.f32.gmra.mrb[2].mxu0 %vm282_vm1, %v11203_v3  ;;  %v2146_v45 = vrot.slane %v13197_v60, 2  ;;  %v11365_v49 = vsel %vm2077_vm3, %v2148_v41, %v2149_v59  ;;  %v2154_v42 = vrot.slane %v13200_v36, 2  ;;  %v11374_v48 = vsel %vm2077_vm3, %v2149_v59, %v2151_v44 }
 0x19a   : > { %8664 = vmatprep.mubr.msk.f32.mxu0 %vm282_vm1, %v11207_v4  ;;  %v2484_v23 = vrot.slane %v10610_v33, 2  ;;  %v2487_v13 = vrot.slane %v11093_v51, 2  ;;  %v2755_v33 = vrot.slane %v10762_v40, 2  ;;  %v2758_v51 = vrot.slane %v11168_v0, 2  ;;  %v7503_v40 = vld [vmem:[%s13126_s3 + $0x1c0] sm:$0xff]  ;;  %v7505_v0 = vld [vmem:[%s13126_s3 + $0x1d0] sm:$0xff] }
 0x19b   : > { %v11361_v63 = vsel %vm2077_vm3, %v2144_v30, %v2146_v45  ;;  %v11378_v15 = vsel %vm2077_vm3, %v2153_v35, %v2154_v42  ;;  %v11385_v31 = vsel %vm2077_vm3, %v2154_v42, %v2156_v5 }
 0x19c   : > { %v2486_v27 = vsel %vm2077_vm3, %v2484_v23, %v2485_v25  ;;  %v2488_v28 = vsel %vm2077_vm3, %v2485_v25, %v2487_v13 }
 0x19d   : > { %8665 = vmatmul.mubr.msk.f32.gmra.mrb[4].mxu0 %vm282_vm1, %v11218_v52 }
 0x19e   : > { %8667 = vmatprep.mubr.msk.f32.mxu0 %vm282_vm1, %v11222_v16 }
 0x1a1   : > { %8668 = vmatmul.mubr.msk.f32.gmra.mrb[6].mxu0 %vm282_vm1, %v11231_v17 }
 0x1a2   : > { %8670 = vmatprep.mubr.msk.f32.mxu0 %vm282_vm1, %v11235_v61 }
 0x1a5   : > { %8671 = vmatmul.mubr.msk.f32.gmra.mrb[8].mxu0 %vm282_vm1, %v11244_v10 }
 0x1a6   : > { %8673 = vmatprep.mubr.msk.f32.mxu0 %vm282_vm1, %v11248_v37 }
 0x1a9   : > { %8674 = vmatmul.mubr.msk.f32.gmra.mrb[10].mxu0 %vm282_vm1, %v11257_v12 }
 0x1aa   : > { %8676 = vmatprep.mubr.msk.f32.mxu0 %vm282_vm1, %v11261_v46 }
 0x1ad   : > { %8677 = vmatmul.mubr.msk.f32.gmra.mrb[12].mxu0 %vm282_vm1, %v11270_v14 }
 0x1ae   : > { %8679 = vmatprep.mubr.msk.f32.mxu0 %vm282_vm1, %v11274_v57 }
 0x1b1   : > { %8680 = vmatmul.mubr.msk.f32.gmra.mrb[14].mxu0 %vm282_vm1, %v11283_v56 }
 0x1b2   : > { %8682 = vmatprep.mubr.msk.f32.mxu0 %vm282_vm1, %v11287_v58 }
 0x1b5   : > { %8683 = vmatmul.mubr.msk.f32.gmra.mrb[16].mxu0 %vm282_vm1, %v11296_v50 }
 0x1b6   : > { %8685 = vmatprep.mubr.msk.f32.mxu0 %vm282_vm1, %v11300_v32 }
 0x1b9   : > { %8686 = vmatmul.mubr.msk.f32.gmra.mrb[18].mxu0 %vm282_vm1, %v11309_v1 }
 0x1ba   : > { %8688 = vmatprep.mubr.msk.f32.mxu0 %vm282_vm1, %v11313_v6 }
 0x1bd   : > { %8689 = vmatmul.mubr.msk.f32.gmra.mrb[20].mxu0 %vm282_vm1, %v11322_v18 }
 0x1be   : > { %8691 = vmatprep.mubr.msk.f32.mxu0 %vm282_vm1, %v11326_v20 }
 0x1c1   : > { %8692 = vmatmul.mubr.msk.f32.gmra.mrb[22].mxu0 %vm282_vm1, %v11335_v24 }
 0x1c2   : > { %8694 = vmatprep.mubr.msk.f32.mxu0 %vm282_vm1, %v11339_v26 }
 0x1c5   : > { %8695 = vmatmul.mubr.msk.f32.gmra.mrb[24].mxu0 %vm282_vm1, %v11348_v55 }
 0x1c6   : > { %8697 = vmatprep.mubr.msk.f32.mxu0 %vm282_vm1, %v11352_v62 }
 0x1c9   : > { %8698 = vmatmul.mubr.msk.f32.gmra.mrb[26].mxu0 %vm282_vm1, %v11361_v63 }
 0x1ca   : > { %8700 = vmatprep.mubr.msk.f32.mxu0 %vm282_vm1, %v11365_v49 }
 0x1cd   : > { %8701 = vmatmul.mubr.msk.f32.gmra.mrb[28].mxu0 %vm282_vm1, %v11374_v48 }
 0x1ce   : > { %8703 = vmatprep.mubr.msk.f32.mxu0 %vm282_vm1, %v11378_v15 }
 0x1d1   : > { %8704 = vmatmul.mubr.msk.f32.gmra.mrb[30].mxu0 %vm282_vm1, %v11385_v31 }
 0x1d2   : > { %8708 = vmatprep.mubr.msk.f32.mxu0 %vm282_vm1, %v11189_v53  ;;  %v7500_v53 = vld [vmem:[%s13126_s3 + $0x1a8] sm:$0xff] }
 0x1d3   : > { %v9534_v11 = vpack.c.bf16 %v7500_v53, %v7499_v21 }
 0x1d5   : > { %8709 = vmatmul.mubr.msk.f32.vlgmr.msra.gmra.mrb[0].mxu0 %vm282_vm1, %v11203_v3  ;;  %v7501_v3 = vld [vmem:[%s13126_s3 + $0x1b0] sm:$0xff]  ;;  %9816 = vmatprep.subr.bf16.mxu1 %v9534_v11 }
 0x1d6   : > { %8757 = vmatpush3.msk.msra.mxu0 %vm379_vm0, %v11196_v2  ;;  %8711 = vmatprep.mubr.msk.f32.mxu0 %vm282_vm1, %v11207_v4  ;;  %v9538_v2 = vpack.c.bf16 %v7502_v22, %v7501_v3 }
 0x1d7   : > { %9527 = vmatprep.subr.bf16.mxu0 %v9526_v7  ;;  %9824 = vmatpush3.bf16.msra.mxu1 %v9534_v11 }
 0x1d8   : > { %9817 = vmatprep.subr.bf16.mxu1 %v9538_v2 }
 0x1d9   : > { %8712 = vmatmul.mubr.msk.f32.gmra.mrb[2].mxu0 %vm282_vm1, %v11218_v52 }
 0x1da   : > { %8714 = vmatprep.mubr.msk.f32.mxu0 %vm282_vm1, %v11222_v16 }
 0x1db   : > { %9825 = vmatpush3.bf16.msra.mxu1 %v9538_v2 }
 0x1dd   : > { %8715 = vmatmul.mubr.msk.f32.gmra.mrb[4].mxu0 %vm282_vm1, %v11231_v17 }
 0x1de   : > { %8717 = vmatprep.mubr.msk.f32.mxu0 %vm282_vm1, %v11235_v61 }
 0x1e1   : > { %8718 = vmatmul.mubr.msk.f32.gmra.mrb[6].mxu0 %vm282_vm1, %v11244_v10 }
 0x1e2   : > { %8720 = vmatprep.mubr.msk.f32.mxu0 %vm282_vm1, %v11248_v37 }
 0x1e5   : > { %8721 = vmatmul.mubr.msk.f32.gmra.mrb[8].mxu0 %vm282_vm1, %v11257_v12 }
 0x1e6   : > { %8723 = vmatprep.mubr.msk.f32.mxu0 %vm282_vm1, %v11261_v46 }
 0x1e9   : > { %8724 = vmatmul.mubr.msk.f32.gmra.mrb[10].mxu0 %vm282_vm1, %v11270_v14 }
 0x1ea   : > { %8726 = vmatprep.mubr.msk.f32.mxu0 %vm282_vm1, %v11274_v57 }
 0x1ed   : > { %8727 = vmatmul.mubr.msk.f32.gmra.mrb[12].mxu0 %vm282_vm1, %v11283_v56 }
 0x1ee   : > { %8729 = vmatprep.mubr.msk.f32.mxu0 %vm282_vm1, %v11287_v58 }
 0x1f1   : > { %8730 = vmatmul.mubr.msk.f32.gmra.mrb[14].mxu0 %vm282_vm1, %v11296_v50 }
 0x1f2   : > { %8732 = vmatprep.mubr.msk.f32.mxu0 %vm282_vm1, %v11300_v32 }
 0x1f5   : > { %8733 = vmatmul.mubr.msk.f32.gmra.mrb[16].mxu0 %vm282_vm1, %v11309_v1 }
 0x1f6   : > { %8735 = vmatprep.mubr.msk.f32.mxu0 %vm282_vm1, %v11313_v6 }
 0x1f9   : > { %8736 = vmatmul.mubr.msk.f32.gmra.mrb[18].mxu0 %vm282_vm1, %v11322_v18 }
 0x1fa   : > { %8738 = vmatprep.mubr.msk.f32.mxu0 %vm282_vm1, %v11326_v20 }
 0x1fd   : > { %8739 = vmatmul.mubr.msk.f32.gmra.mrb[20].mxu0 %vm282_vm1, %v11335_v24 }
 0x1fe   : > { %8741 = vmatprep.mubr.msk.f32.mxu0 %vm282_vm1, %v11339_v26 }
 0x201   : > { %8742 = vmatmul.mubr.msk.f32.gmra.mrb[22].mxu0 %vm282_vm1, %v11348_v55 }
 0x202   : > { %8744 = vmatprep.mubr.msk.f32.mxu0 %vm282_vm1, %v11352_v62 }
 0x205   : > { %8745 = vmatmul.mubr.msk.f32.gmra.mrb[24].mxu0 %vm282_vm1, %v11361_v63 }
 0x206   : > { %8747 = vmatprep.mubr.msk.f32.mxu0 %vm282_vm1, %v11365_v49 }
 0x209   : > { %8748 = vmatmul.mubr.msk.f32.gmra.mrb[26].mxu0 %vm282_vm1, %v11374_v48 }
 0x20a   : > { %8750 = vmatprep.mubr.msk.f32.mxu0 %vm282_vm1, %v11378_v15 }
 0x20d   : > { %8751 = vmatmul.mubr.msk.f32.gmra.mrb[28].mxu0 %vm282_vm1, %v11385_v31 }
 0x20e   : > { %8753 = vmatprep.mubr.msk.f32.mxu0 %vm282_vm1, %v2486_v27 }
 0x211   : > { %8754 = vmatmul.mubr.msk.f32.gmra.mrb[30].mxu0 %vm282_vm1, %v2488_v28 }
 0x212   : > { %8758 = vmatprep.mubr.msk.f32.mxu0 %vm282_vm1, %v11207_v4  ;;  %v2757_v4 = vsel %vm2077_vm3, %v2755_v33, %v2756_v34 }
 0x215   : > { %8759 = vmatmul.mubr.msk.f32.vlgmr.msra.gmra.mrb[0].mxu0 %vm282_vm1, %v11218_v52  ;;  %v2759_v52 = vsel %vm2077_vm3, %v2756_v34, %v2758_v51 }
 0x216   : > { %8761 = vmatprep.mubr.msk.f32.mxu0 %vm282_vm1, %v11222_v16  ;;  %9529 = vmatpush3.bf16.msra.mxu0 %v9526_v7  ;;  %v9542_v16 = vpack.c.bf16 %v7504_v43, %v7503_v40 }
 0x217   : > { %9531 = vmatprep.subr.bf16.mxu0 %v9530_v9 }
 0x218   : > { %9818 = vmatprep.subr.bf16.mxu1 %v9542_v16 }
 0x219   : > { %8762 = vmatmul.mubr.msk.f32.gmra.mrb[2].mxu0 %vm282_vm1, %v11231_v17  ;;  %v7506_v17 = vld [vmem:[%s13126_s3 + $0x1d8] sm:$0xff]  ;;  %9826 = vmatpush3.bf16.msra.mxu1 %v9542_v16 }
 0x21a   : > { %8764 = vmatprep.mubr.msk.f32.mxu0 %vm282_vm1, %v11235_v61  ;;  %9533 = vmatpush3.bf16.msra.mxu0 %v9530_v9  ;;  %v9546_v61 = vpack.c.bf16 %v7506_v17, %v7505_v0  ;;  %v3293_v17 = vld [vmem:[%s13126_s3 + $0x10] sm:$0xff] }
 0x21b   : > { %9535 = vmatprep.subr.bf16.mxu0 %v9534_v11 }
 0x21c   : > { %9819 = vmatprep.subr.bf16.mxu1 %v9546_v61 }
 0x21d   : > { %8765 = vmatmul.mubr.msk.f32.gmra.mrb[4].mxu0 %vm282_vm1, %v11244_v10  ;;  %v7507_v10 = vld [vmem:[%s13126_s3 + $0x1e0] sm:$0xff]  ;;  %9827 = vmatpush3.bf16.msra.mxu1 %v9546_v61 }
 0x21e   : > { %8767 = vmatprep.mubr.msk.f32.mxu0 %vm282_vm1, %v11248_v37  ;;  %9537 = vmatpush3.bf16.msra.mxu0 %v9534_v11  ;;  %v7508_v37 = vld [vmem:[%s13126_s3 + $0x1e8] sm:$0xff] }
 0x21f   : > { %9539 = vmatprep.subr.bf16.mxu0 %v9538_v2 }
 0x221   : > { %8768 = vmatmul.mubr.msk.f32.gmra.mrb[6].mxu0 %vm282_vm1, %v11257_v12  ;;  %v9550_v12 = vpack.c.bf16 %v7508_v37, %v7507_v10 }
 0x222   : > { %8770 = vmatprep.mubr.msk.f32.mxu0 %vm282_vm1, %v11261_v46  ;;  %9541 = vmatpush3.bf16.msra.mxu0 %v9538_v2  ;;  %v10396_v46 = vmov 0.0  }
 0x223   : > { %9543 = vmatprep.subr.bf16.mxu0 %v9542_v16  ;;  %3169 = vst [vmem:[#allocation2 + $0x18] sm:$0x1] %v10396_v46  ;;  %3161 = vst [vmem:[#allocation2] sm:$0xff] %v10396_v46  ;;  %9820 = vmatprep.subr.bf16.mxu1 %v9550_v12 }
 0x224   : > { %3162 = vst [vmem:[#allocation2 + $0x8] sm:$0xff] %v10396_v46  ;;  %3163 = vst [vmem:[#allocation2 + $0x10] sm:$0x3] %v10396_v46  ;;  %9828 = vmatpush3.bf16.msra.mxu1 %v9550_v12 }
 0x225   : > { %8771 = vmatmul.mubr.msk.f32.gmra.mrb[8].mxu0 %vm282_vm1, %v11270_v14  ;;  %3165 = vst [vmem:[#allocation2 + $0x198] sm:$0xff] %v10396_v46  ;;  %3167 = vst [vmem:[#allocation2 + $0x1a8] sm:$0x3] %v10396_v46  ;;  %v7509_v14 = vld [vmem:[%s13126_s3 + $0x1f0] sm:$0xff] }
 0x226   : > { %8773 = vmatprep.mubr.msk.f32.mxu0 %vm282_vm1, %v11274_v57  ;;  %9545 = vmatpush3.bf16.msra.mxu0 %v9542_v16  ;;  %3170 = vst [vmem:[#allocation2 + $0x30] sm:$0x1] %v10396_v46  ;;  %3171 = vst [vmem:[#allocation2 + $0x48] sm:$0x1] %v10396_v46  ;;  %v7510_v57 = vld [vmem:[%s13126_s3 + $0x1f8] sm:$0xff] }
 0x227   : > { %9547 = vmatprep.subr.bf16.mxu0 %v9546_v61  ;;  %3172 = vst [vmem:[#allocation2 + $0x60] sm:$0x1] %v10396_v46  ;;  %3173 = vst [vmem:[#allocation2 + $0x78] sm:$0x1] %v10396_v46 }
 0x228   : > { %3174 = vst [vmem:[#allocation2 + $0x90] sm:$0x1] %v10396_v46  ;;  %3175 = vst [vmem:[#allocation2 + $0xa8] sm:$0x1] %v10396_v46 }
 0x229   : > { %8774 = vmatmul.mubr.msk.f32.gmra.mrb[10].mxu0 %vm282_vm1, %v11283_v56  ;;  %3176 = vst [vmem:[#allocation2 + $0xc0] sm:$0x1] %v10396_v46  ;;  %3177 = vst [vmem:[#allocation2 + $0xd8] sm:$0x1] %v10396_v46  ;;  %v9554_v56 = vpack.c.bf16 %v7510_v57, %v7509_v14 }
 0x22a   : > { %8776 = vmatprep.mubr.msk.f32.mxu0 %vm282_vm1, %v11287_v58  ;;  %9549 = vmatpush3.bf16.msra.mxu0 %v9546_v61  ;;  %3178 = vst [vmem:[#allocation2 + $0xf0] sm:$0x1] %v10396_v46  ;;  %3179 = vst [vmem:[#allocation2 + $0x108] sm:$0x1] %v10396_v46  ;;  %v3291_v58 = vld [vmem:[%s13126_s3] sm:$0xff]  ;;  %v3294_v61 = vld [vmem:[%s13126_s3 + $0x18] sm:$0xff] }
 0x22b   : > { %3180 = vst [vmem:[#allocation2 + $0x120] sm:$0x1] %v10396_v46  ;;  %3181 = vst [vmem:[#allocation2 + $0x138] sm:$0x1] %v10396_v46  ;;  %9551 = vmatprep.subr.bf16.mxu0 %v9550_v12  ;;  %9821 = vmatprep.subr.bf16.mxu1 %v9554_v56 }
 0x22c   : > { %3182 = vst [vmem:[#allocation2 + $0x150] sm:$0x1] %v10396_v46  ;;  %3183 = vst [vmem:[#allocation2 + $0x168] sm:$0x1] %v10396_v46  ;;  %9829 = vmatpush3.bf16.msra.mxu1 %v9554_v56 }
 0x22d   : > { %8777 = vmatmul.mubr.msk.f32.gmra.mrb[12].mxu0 %vm282_vm1, %v11296_v50  ;;  %3184 = vst [vmem:[#allocation2 + $0x180] sm:$0x1] %v10396_v46  ;;  %3187 = vst [vmem:[#allocation2 + $0x29] sm:$0x1] %v10396_v46  ;;  %v3292_v50 = vld [vmem:[%s13126_s3 + $0x8] sm:$0xff] }
 0x22e   : > { %8779 = vmatprep.mubr.msk.f32.mxu0 %vm282_vm1, %v11300_v32  ;;  %3188 = vst [vmem:[#allocation2 + $0x41] sm:$0x1] %v10396_v46  ;;  %3189 = vst [vmem:[#allocation2 + $0x59] sm:$0x1] %v10396_v46  ;;  %9553 = vmatpush3.bf16.msra.mxu0 %v9550_v12  ;;  %v11618_v32 = vpack.c.bf16 %v3292_v50, %v3291_v58 }
 0x22f   : > { %3190 = vst [vmem:[#allocation2 + $0x71] sm:$0x1] %v10396_v46  ;;  %3191 = vst [vmem:[#allocation2 + $0x89] sm:$0x1] %v10396_v46  ;;  %9555 = vmatprep.subr.bf16.mxu0 %v9554_v56 }
 0x230   : > { %3192 = vst [vmem:[#allocation2 + $0xa1] sm:$0x1] %v10396_v46  ;;  %3193 = vst [vmem:[#allocation2 + $0xb9] sm:$0x1] %v10396_v46  ;;  %9559 = vmatprep.subr.bf16.mxu1 %v11618_v32 }
 0x231   : > { %8780 = vmatmul.mubr.msk.f32.gmra.mrb[14].mxu0 %vm282_vm1, %v11309_v1  ;;  %3194 = vst [vmem:[#allocation2 + $0xd1] sm:$0x1] %v10396_v46  ;;  %3195 = vst [vmem:[#allocation2 + $0xe9] sm:$0x1] %v10396_v46  ;;  %v11624_v1 = vld [vmem:[%s13125_s2] ss:$0 sm:$0xff] }
 0x232   : > { %8782 = vmatprep.mubr.msk.f32.mxu0 %vm282_vm1, %v11313_v6  ;;  %3196 = vst [vmem:[#allocation2 + $0x101] sm:$0x1] %v10396_v46  ;;  %3197 = vst [vmem:[#allocation2 + $0x119] sm:$0x1] %v10396_v46  ;;  %9557 = vmatpush3.bf16.msra.mxu0 %v9554_v56 }
 0x233   : > { %3198 = vst [vmem:[#allocation2 + $0x131] sm:$0x1] %v10396_v46  ;;  %3199 = vst [vmem:[#allocation2 + $0x149] sm:$0x1] %v10396_v46 }
 0x234   : > { %3200 = vst [vmem:[#allocation2 + $0x161] sm:$0x1] %v10396_v46  ;;  %3201 = vst [vmem:[#allocation2 + $0x179] sm:$0x1] %v10396_v46 }
 0x235   : > { %8783 = vmatmul.mubr.msk.f32.gmra.mrb[16].mxu0 %vm282_vm1, %v11322_v18  ;;  %3202 = vst [vmem:[#allocation2 + $0x191] sm:$0x1] %v10396_v46  ;;  %3168 = vst [vmem:[#allocation2] sm:$0x1] %v10396_v46 }
 0x236   : > { %8785 = vmatprep.mubr.msk.f32.mxu0 %vm282_vm1, %v11326_v20  ;;  %3185 = vst [vmem:[#allocation2 + $0x198] sm:$0x1] %v10396_v46  ;;  %3186 = vst [vmem:[#allocation2 + $0x11] sm:$0x1] %v10396_v46 }
 0x237   : > { %3203 = vst [vmem:[#allocation2 + $0x1a9] sm:$0x1] %v10396_v46 }
 0x239   : > { %8786 = vmatmul.mubr.msk.f32.gmra.mrb[18].mxu0 %vm282_vm1, %v11335_v24 }
 0x23a   : > { %8788 = vmatprep.mubr.msk.f32.mxu0 %vm282_vm1, %v11339_v26 }
 0x23d   : > { %8789 = vmatmul.mubr.msk.f32.gmra.mrb[20].mxu0 %vm282_vm1, %v11348_v55 }
 0x23e   : > { %8791 = vmatprep.mubr.msk.f32.mxu0 %vm282_vm1, %v11352_v62 }
 0x241   : > { %8792 = vmatmul.mubr.msk.f32.gmra.mrb[22].mxu0 %vm282_vm1, %v11361_v63 }
 0x242   : > { %8794 = vmatprep.mubr.msk.f32.mxu0 %vm282_vm1, %v11365_v49 }
 0x245   : > { %8795 = vmatmul.mubr.msk.f32.gmra.mrb[24].mxu0 %vm282_vm1, %v11374_v48 }
 0x246   : > { %8797 = vmatprep.mubr.msk.f32.mxu0 %vm282_vm1, %v11378_v15 }
 0x249   : > { %8798 = vmatmul.mubr.msk.f32.gmra.mrb[26].mxu0 %vm282_vm1, %v11385_v31 }
 0x24a   : > { %8800 = vmatprep.mubr.msk.f32.mxu0 %vm282_vm1, %v2486_v27 }
 0x24d   : > { %8801 = vmatmul.mubr.msk.f32.gmra.mrb[28].mxu0 %vm282_vm1, %v2488_v28 }
 0x24e   : > { %8803 = vmatprep.mubr.msk.f32.mxu0 %vm282_vm1, %v2757_v4 }
 0x251   : > { %8804 = vmatmul.mubr.msk.f32.gmra.mrb[30].mxu0 %vm282_vm1, %v2759_v52 }
 0x2e8   : > { %v8760_v6 = vpop.f32.mrb[0].mxu0 }
 0x2e9   : > { %v3034_v18 = vadd.f32 %v8760_v6, %v11624_v1  ;;  %v2835_v20 = vpop.f32.mrb[1].mxu0 }
 0x2ea   : > { %v3033_v24 = vadd.f32 %v11624_v1, %v2835_v20 }
 0x2eb   : > { %vm3066_vm4 = vcmp.gt.f32.partialorder %v3034_v18, 0.0  ;;  %v3098_v26 = vmul.f32 0.01, %v3034_v18 }
 0x2ec   : > { %vm3065_vm5 = vcmp.gt.f32.partialorder %v3033_v24, 0.0  ;;  %v3097_v29 = vmul.f32 0.01, %v3033_v24  ;;  %v8763_v30 = vpop.f32.mrb[2].mxu0 }
 0x2ed   : > { %v3130_v55 = vsel %vm3066_vm4, %v3034_v18, %v3098_v26  ;;  %v3036_v60 = vadd.f32 %v8763_v30, %v11624_v1  ;;  %v2845_v45 = vpop.f32.mrb[3].mxu0  ;;  %v9562_v18 = vpack.c.bf16 %v3294_v61, %v3293_v17  ;;  %v3296_v26 = vld [vmem:[%s13126_s3 + $0x28] sm:$0xff] }
 0x2ee   : > { %3206 = vst [vmem:[#allocation2 + $0x21] sm:$0xff] %v3130_v55  ;;  %v3129_v62 = vsel %vm3065_vm5, %v3033_v24, %v3097_v29  ;;  %v3035_v38 = vadd.f32 %v11624_v1, %v2845_v45  ;;  %v3295_v24 = vld [vmem:[%s13126_s3 + $0x20] sm:$0xff] }
 0x2ef   : > { %3205 = vst [vmem:[#allocation2 + $0x19] sm:$0xff] %v3129_v62  ;;  %vm3068_vm6 = vcmp.gt.f32.partialorder %v3036_v60, 0.0  ;;  %v3100_v41 = vmul.f32 0.01, %v3036_v60 }
 0x2f0   : > { %vm3067_vm7 = vcmp.gt.f32.partialorder %v3035_v38, 0.0  ;;  %v3099_v47 = vmul.f32 0.01, %v3035_v38  ;;  %v8766_v59 = vpop.f32.mrb[4].mxu0 }
 0x2f1   : > { %v3132_v63 = vsel %vm3068_vm6, %v3036_v60, %v3100_v41  ;;  %v3038_v44 = vadd.f32 %v8766_v59, %v11624_v1  ;;  %v2855_v49 = vpop.f32.mrb[5].mxu0  ;;  %v9566_v59 = vpack.c.bf16 %v3296_v26, %v3295_v24 }
 0x2f2   : > { %3208 = vst [vmem:[#allocation2 + $0x39] sm:$0xff] %v3132_v63  ;;  %v3131_v35 = vsel %vm3067_vm7, %v3035_v38, %v3099_v47  ;;  %v3037_v36 = vadd.f32 %v11624_v1, %v2855_v49 }
 0x2f3   : > { %3207 = vst [vmem:[#allocation2 + $0x31] sm:$0xff] %v3131_v35  ;;  %vm3070_vm8 = vcmp.gt.f32.partialorder %v3038_v44, 0.0  ;;  %v3102_v42 = vmul.f32 0.01, %v3038_v44 }
 0x2f4   : > { %vm3069_vm9 = vcmp.gt.f32.partialorder %v3037_v36, 0.0  ;;  %v3101_v48 = vmul.f32 0.01, %v3037_v36  ;;  %v8769_v5 = vpop.f32.mrb[6].mxu0 }
 0x2f5   : > { %v3134_v15 = vsel %vm3070_vm8, %v3038_v44, %v3102_v42  ;;  %v3040_v31 = vadd.f32 %v8769_v5, %v11624_v1  ;;  %v2865_v54 = vpop.f32.mrb[7].mxu0  ;;  %v3298_v44 = vld [vmem:[%s13126_s3 + $0x38] sm:$0xff] }
 0x2f6   : > { %3210 = vst [vmem:[#allocation2 + $0x51] sm:$0xff] %v3134_v15  ;;  %v3133_v39 = vsel %vm3069_vm9, %v3037_v36, %v3101_v48  ;;  %v3039_v7 = vadd.f32 %v11624_v1, %v2865_v54  ;;  %v11634_v8 = vld [vmem:[#allocation2 + $0x18] sm:$0xff]  ;;  %v11636_v19 = vld [vmem:[#allocation2 + $0x20] sm:$0xff] }
 0x2f7   : > { %3209 = vst [vmem:[#allocation2 + $0x49] sm:$0xff] %v3133_v39  ;;  %vm3072_vm10 = vcmp.gt.f32.partialorder %v3040_v31, 0.0  ;;  %v3104_v9 = vmul.f32 0.01, %v3040_v31  ;;  %8838 = vmatprep.mubr.f32.mxu0 %v11634_v8 }
 0x2f8   : > { %vm3071_vm11 = vcmp.gt.f32.partialorder %v3039_v7, 0.0  ;;  %v3103_v21 = vmul.f32 0.01, %v3039_v7  ;;  %v8772_v53 = vpop.f32.mrb[8].mxu0  ;;  %8839 = vmatmul.mubr.f32.vlgmr.msra.gmra.mrb[32].mxu0 %v11636_v19 }
 0x2f9   : > { %v3136_v11 = vsel %vm3072_vm10, %v3040_v31, %v3104_v9  ;;  %v3042_v3 = vadd.f32 %v8772_v53, %v11624_v1  ;;  %v2875_v22 = vpop.f32.mrb[9].mxu0  ;;  %v3299_v9 = vld [vmem:[%s13126_s3 + $0x40] sm:$0xff] }
 0x2fa   : > { %3212 = vst [vmem:[#allocation2 + $0x69] sm:$0xff] %v3136_v11  ;;  %v3135_v2 = vsel %vm3071_vm11, %v3039_v7, %v3103_v21  ;;  %v3041_v23 = vadd.f32 %v11624_v1, %v2875_v22  ;;  %v11642_v25 = vld [vmem:[#allocation2 + $0x30] sm:$0xff]  ;;  %v11644_v13 = vld [vmem:[#allocation2 + $0x38] sm:$0xff]  ;;  %v3300_v21 = vld [vmem:[%s13126_s3 + $0x48] sm:$0xff] }
 0x2fb   : > { %3211 = vst [vmem:[#allocation2 + $0x61] sm:$0xff] %v3135_v2  ;;  %vm3074_vm12 = vcmp.gt.f32.partialorder %v3042_v3, 0.0  ;;  %v3106_v27 = vmul.f32 0.01, %v3042_v3  ;;  %8841 = vmatprep.mubr.f32.mxu0 %v11642_v25 }
 0x2fc   : > { %vm3073_vm13 = vcmp.gt.f32.partialorder %v3041_v23, 0.0  ;;  %v3105_v28 = vmul.f32 0.01, %v3041_v23  ;;  %v8775_v33 = vpop.f32.mrb[10].mxu0  ;;  %8842 = vmatmul.mubr.f32.gmra.mrb[34].mxu0 %v11644_v13 }
 0x2fd   : > { %v3138_v34 = vsel %vm3074_vm12, %v3042_v3, %v3106_v27  ;;  %v3044_v51 = vadd.f32 %v8775_v33, %v11624_v1  ;;  %v2885_v4 = vpop.f32.mrb[11].mxu0 }
 0x2fe   : > { %3214 = vst [vmem:[#allocation2 + $0x81] sm:$0xff] %v3138_v34  ;;  %v3137_v52 = vsel %vm3073_vm13, %v3041_v23, %v3105_v28  ;;  %v3043_v40 = vadd.f32 %v11624_v1, %v2885_v4  ;;  %v11650_v43 = vld [vmem:[#allocation2 + $0x48] sm:$0xff]  ;;  %v11652_v16 = vld [vmem:[#allocation2 + $0x50] sm:$0xff]  ;;  %v9574_v34 = vpack.c.bf16 %v3300_v21, %v3299_v9 }
 0x2ff   : > { %3213 = vst [vmem:[#allocation2 + $0x79] sm:$0xff] %v3137_v52  ;;  %vm3076_vm14 = vcmp.gt.f32.partialorder %v3044_v51, 0.0  ;;  %v3108_v0 = vmul.f32 0.01, %v3044_v51  ;;  %8844 = vmatprep.mubr.f32.mxu0 %v11650_v43  ;;  %v3301_v4 = vld [vmem:[%s13126_s3 + $0x50] sm:$0xff]  ;;  %v3302_v52 = vld [vmem:[%s13126_s3 + $0x58] sm:$0xff] }
 0x300   : > { %vm3075_vm15 = vcmp.gt.f32.partialorder %v3043_v40, 0.0  ;;  %v3107_v10 = vmul.f32 0.01, %v3043_v40  ;;  %v8778_v37 = vpop.f32.mrb[12].mxu0  ;;  %8845 = vmatmul.mubr.f32.gmra.mrb[36].mxu0 %v11652_v16 }
 0x301   : > { %v3140_v12 = vsel %vm3076_vm14, %v3044_v51, %v3108_v0  ;;  %v3046_v14 = vadd.f32 %v8778_v37, %v11624_v1  ;;  %v2895_v57 = vpop.f32.mrb[13].mxu0 }
 0x302   : > { %3216 = vst [vmem:[#allocation2 + $0x99] sm:$0xff] %v3140_v12  ;;  %v3139_v56 = vsel %vm3075_vm15, %v3043_v40, %v3107_v10  ;;  %v3045_v58 = vadd.f32 %v11624_v1, %v2895_v57  ;;  %v11664_v50 = vld [vmem:[#allocation2 + $0x60] sm:$0xff]  ;;  %v11666_v6 = vld [vmem:[#allocation2 + $0x68] sm:$0xff] }
 0x303   : > { %3215 = vst [vmem:[#allocation2 + $0x91] sm:$0xff] %v3139_v56  ;;  %vm3078_vm0 = vcmp.gt.f32.partialorder %v3046_v14, 0.0  ;;  %v3110_v20 = vmul.f32 0.01, %v3046_v14  ;;  %8847 = vmatprep.mubr.f32.mxu1 %v11664_v50  ;;  %v9578_v56 = vpack.c.bf16 %v3302_v52, %v3301_v4 }
 0x304   : > { %vm3077_vm1 = vcmp.gt.f32.partialorder %v3045_v58, 0.0  ;;  %v3109_v29 = vmul.f32 0.01, %v3045_v58  ;;  %v8781_v30 = vpop.f32.mrb[14].mxu0  ;;  %8848 = vmatmul.mubr.f32.vlgmr.msra.gmra.mrb[0].mxu1 %v11666_v6 }
 0x305   : > { %v3142_v55 = vsel %vm3078_vm0, %v3046_v14, %v3110_v20  ;;  %v3048_v60 = vadd.f32 %v8781_v30, %v11624_v1  ;;  %9561 = vmatpush3.bf16.msra.mxu1 %v11618_v32  ;;  %v2905_v45 = vpop.f32.mrb[15].mxu0  ;;  %v3297_v32 = vld [vmem:[%s13126_s3 + $0x30] sm:$0xff]  ;;  %v3304_v20 = vld [vmem:[%s13126_s3 + $0x68] sm:$0xff] }
 0x306   : > { %3218 = vst [vmem:[#allocation2 + $0xb1] sm:$0xff] %v3142_v55  ;;  %v3141_v62 = vsel %vm3077_vm1, %v3045_v58, %v3109_v29  ;;  %v3047_v38 = vadd.f32 %v11624_v1, %v2905_v45  ;;  %v11679_v41 = vld [vmem:[#allocation2 + $0x78] sm:$0xff]  ;;  %v11681_v47 = vld [vmem:[#allocation2 + $0x80] sm:$0xff]  ;;  %9563 = vmatprep.subr.bf16.mxu1 %v9562_v18  ;;  %v9570_v39 = vpack.c.bf16 %v3298_v44, %v3297_v32  ;;  %v3305_v32 = vld [vmem:[%s13126_s3 + $0x70] sm:$0xff] }
 0x307   : > { %3217 = vst [vmem:[#allocation2 + $0xa9] sm:$0xff] %v3141_v62  ;;  %vm3080_vm4 = vcmp.gt.f32.partialorder %v3048_v60, 0.0  ;;  %v3112_v63 = vmul.f32 0.01, %v3048_v60  ;;  %8850 = vmatprep.mubr.f32.mxu1 %v11679_v41  ;;  %v3306_v44 = vld [vmem:[%s13126_s3 + $0x78] sm:$0xff] }
 0x308   : > { %vm3079_vm5 = vcmp.gt.f32.partialorder %v3047_v38, 0.0  ;;  %v3111_v49 = vmul.f32 0.01, %v3047_v38  ;;  %v8784_v35 = vpop.f32.mrb[16].mxu0  ;;  %8851 = vmatmul.mubr.f32.gmra.mrb[2].mxu1 %v11681_v47  ;;  %v9586_v9 = vpack.c.bf16 %v3306_v44, %v3305_v32 }
 0x309   : > { %v3144_v36 = vsel %vm3080_vm4, %v3048_v60, %v3112_v63  ;;  %v3050_v42 = vadd.f32 %v8784_v35, %v11624_v1  ;;  %v2915_v48 = vpop.f32.mrb[17].mxu0  ;;  %9565 = vmatpush3.bf16.msra.mxu1 %v9562_v18  ;;  %v3303_v18 = vld [vmem:[%s13126_s3 + $0x60] sm:$0xff] }
 0x30a   : > { %3220 = vst [vmem:[#allocation2 + $0xc9] sm:$0xff] %v3144_v36  ;;  %v3143_v5 = vsel %vm3079_vm5, %v3047_v38, %v3111_v49  ;;  %v3049_v15 = vadd.f32 %v11624_v1, %v2915_v48  ;;  %v11693_v31 = vld [vmem:[#allocation2 + $0x90] sm:$0xff]  ;;  %v11695_v54 = vld [vmem:[#allocation2 + $0x98] sm:$0xff]  ;;  %9567 = vmatprep.subr.bf16.mxu1 %v9566_v59 }
 0x30b   : > { %3219 = vst [vmem:[#allocation2 + $0xc1] sm:$0xff] %v3143_v5  ;;  %vm3082_vm6 = vcmp.gt.f32.partialorder %v3050_v42, 0.0  ;;  %v3114_v7 = vmul.f32 0.01, %v3050_v42  ;;  %8853 = vmatprep.mubr.f32.mxu1 %v11693_v31 }
 0x30c   : > { %vm3081_vm7 = vcmp.gt.f32.partialorder %v3049_v15, 0.0  ;;  %v3113_v53 = vmul.f32 0.01, %v3049_v15  ;;  %v8787_v11 = vpop.f32.mrb[18].mxu0  ;;  %8854 = vmatmul.mubr.f32.gmra.mrb[4].mxu1 %v11695_v54 }
 0x30d   : > { %v3146_v3 = vsel %vm3082_vm6, %v3050_v42, %v3114_v7  ;;  %v3052_v22 = vadd.f32 %v8787_v11, %v11624_v1  ;;  %v2925_v2 = vpop.f32.mrb[19].mxu0  ;;  %9569 = vmatpush3.bf16.msra.mxu1 %v9566_v59  ;;  %v9582_v59 = vpack.c.bf16 %v3304_v20, %v3303_v18  ;;  %v7512_v11 = vld [vmem:[%s13126_s3 + $0x308] sm:$0xff] }
 0x30e   : > { %3222 = vst [vmem:[#allocation2 + $0xe1] sm:$0xff] %v3146_v3  ;;  %v3145_v23 = vsel %vm3081_vm7, %v3049_v15, %v3113_v53  ;;  %v3051_v27 = vadd.f32 %v11624_v1, %v2925_v2  ;;  %v11707_v28 = vld [vmem:[#allocation2 + $0xa8] sm:$0xff]  ;;  %v11709_v33 = vld [vmem:[#allocation2 + $0xb0] sm:$0xff]  ;;  %9571 = vmatprep.subr.bf16.mxu1 %v9570_v39  ;;  %v7511_v53 = vld [vmem:[%s13126_s3 + $0x300] sm:$0xff] }
 0x30f   : > { %3221 = vst [vmem:[#allocation2 + $0xd9] sm:$0xff] %v3145_v23  ;;  %vm3084_vm8 = vcmp.gt.f32.partialorder %v3052_v22, 0.0  ;;  %v3116_v51 = vmul.f32 0.01, %v3052_v22  ;;  %8856 = vmatprep.mubr.f32.mxu1 %v11707_v28 }
 0x310   : > { %vm3083_vm9 = vcmp.gt.f32.partialorder %v3051_v27, 0.0  ;;  %v3115_v40 = vmul.f32 0.01, %v3051_v27  ;;  %v8790_v0 = vpop.f32.mrb[20].mxu0  ;;  %8857 = vmatmul.mubr.f32.gmra.mrb[6].mxu1 %v11709_v33 }
 0x311   : > { %v3148_v17 = vsel %vm3084_vm8, %v3052_v22, %v3116_v51  ;;  %v3054_v61 = vadd.f32 %v8790_v0, %v11624_v1  ;;  %v2935_v10 = vpop.f32.mrb[21].mxu0  ;;  %9573 = vmatpush3.bf16.msra.mxu1 %v9570_v39  ;;  %vm6133_vm8 = vcmask 64512  }
 0x312   : > { %3224 = vst [vmem:[#allocation2 + $0xf9] sm:$0xff] %v3148_v17  ;;  %v3147_v37 = vsel %vm3083_vm9, %v3051_v27, %v3115_v40  ;;  %v3053_v12 = vadd.f32 %v11624_v1, %v2935_v10  ;;  %v11721_v14 = vld [vmem:[#allocation2 + $0xc0] sm:$0xff]  ;;  %v11723_v57 = vld [vmem:[#allocation2 + $0xc8] sm:$0xff]  ;;  %9575 = vmatprep.subr.bf16.mxu1 %v9574_v34  ;;  %v11767_v40 = vpack.c.bf16 %v7512_v11, %v7511_v53  ;;  %v7513_v53 = vld [vmem:[%s13126_s3 + $0x310] sm:$0xff] }
 0x313   : > { %3223 = vst [vmem:[#allocation2 + $0xf1] sm:$0xff] %v3147_v37  ;;  %vm3086_vm10 = vcmp.gt.f32.partialorder %v3054_v61, 0.0  ;;  %v3118_v58 = vmul.f32 0.01, %v3054_v61  ;;  %8859 = vmatprep.mubr.f32.mxu1 %v11721_v14  ;;  %v7514_v11 = vld [vmem:[%s13126_s3 + $0x318] sm:$0xff] }
 0x314   : > { %vm3085_vm11 = vcmp.gt.f32.partialorder %v3053_v12, 0.0  ;;  %v3117_v24 = vmul.f32 0.01, %v3053_v12  ;;  %v8793_v26 = vpop.f32.mrb[22].mxu0  ;;  %8860 = vmatmul.mubr.f32.gmra.mrb[8].mxu1 %v11723_v57 }
 0x315   : > { %v3150_v29 = vsel %vm3086_vm10, %v3054_v61, %v3118_v58  ;;  %v3056_v30 = vadd.f32 %v8793_v26, %v11624_v1  ;;  %v2945_v55 = vpop.f32.mrb[23].mxu0  ;;  %9577 = vmatpush3.bf16.msra.mxu1 %v9574_v34 }
 0x316   : > { %3226 = vst [vmem:[#allocation2 + $0x111] sm:$0xff] %v3150_v29  ;;  %v3149_v60 = vsel %vm3085_vm11, %v3053_v12, %v3117_v24  ;;  %v3055_v45 = vadd.f32 %v11624_v1, %v2945_v55  ;;  %v11735_v62 = vld [vmem:[#allocation2 + $0xd8] sm:$0xff]  ;;  %v11737_v38 = vld [vmem:[#allocation2 + $0xe0] sm:$0xff]  ;;  %9579 = vmatprep.subr.bf16.mxu1 %v9578_v56 }
 0x317   : > { %3225 = vst [vmem:[#allocation2 + $0x109] sm:$0xff] %v3149_v60  ;;  %vm3088_vm12 = vcmp.gt.f32.partialorder %v3056_v30, 0.0  ;;  %v3120_v63 = vmul.f32 0.01, %v3056_v30  ;;  %8862 = vmatprep.mubr.f32.mxu1 %v11735_v62 }
 0x318   : > { %vm3087_vm13 = vcmp.gt.f32.partialorder %v3055_v45, 0.0  ;;  %v3119_v49 = vmul.f32 0.01, %v3055_v45  ;;  %v8796_v35 = vpop.f32.mrb[24].mxu0  ;;  %8863 = vmatmul.mubr.f32.gmra.mrb[10].mxu1 %v11737_v38 }
 0x319   : > { %v3152_v36 = vsel %vm3088_vm12, %v3056_v30, %v3120_v63  ;;  %v3058_v42 = vadd.f32 %v8796_v35, %v11624_v1  ;;  %v2955_v48 = vpop.f32.mrb[25].mxu0  ;;  %9581 = vmatpush3.bf16.msra.mxu1 %v9578_v56  ;;  %vm6534_vm12 = vcmask 58368  }
 0x31a   : > { %3228 = vst [vmem:[#allocation2 + $0x129] sm:$0xff] %v3152_v36  ;;  %v3151_v5 = vsel %vm3087_vm13, %v3055_v45, %v3119_v49  ;;  %v3057_v15 = vadd.f32 %v11624_v1, %v2955_v48  ;;  %v11749_v39 = vld [vmem:[#allocation2 + $0xf0] sm:$0xff]  ;;  %v11751_v7 = vld [vmem:[#allocation2 + $0xf8] sm:$0xff]  ;;  %9583 = vmatprep.subr.bf16.mxu1 %v9582_v59 }
 0x31b   : > { %3227 = vst [vmem:[#allocation2 + $0x121] sm:$0xff] %v3151_v5  ;;  %vm3090_vm14 = vcmp.gt.f32.partialorder %v3058_v42, 0.0  ;;  %v3122_v21 = vmul.f32 0.01, %v3058_v42  ;;  %8865 = vmatprep.mubr.f32.mxu1 %v11749_v39 }
 0x31c   : > { %vm3089_vm15 = vcmp.gt.f32.partialorder %v3057_v15, 0.0  ;;  %v3121_v3 = vmul.f32 0.01, %v3057_v15  ;;  %v8799_v22 = vpop.f32.mrb[26].mxu0  ;;  %8866 = vmatmul.mubr.f32.gmra.mrb[12].mxu1 %v11751_v7 }
 0x31d   : > { %v3154_v2 = vsel %vm3090_vm14, %v3058_v42, %v3122_v21  ;;  %v3060_v23 = vadd.f32 %v8799_v22, %v11624_v1  ;;  %v2965_v27 = vpop.f32.mrb[27].mxu0  ;;  %9585 = vmatpush3.bf16.msra.mxu1 %v9582_v59  ;;  %v11804_v21 = vld [vmem:[#allocation2] sm:$0xff] }
 0x31e   : > { %3230 = vst [vmem:[#allocation2 + $0x141] sm:$0xff] %v3154_v2  ;;  %v3153_v34 = vsel %vm3089_vm15, %v3057_v15, %v3121_v3  ;;  %v3059_v51 = vadd.f32 %v11624_v1, %v2965_v27  ;;  %v11763_v4 = vld [vmem:[#allocation2 + $0x108] sm:$0xff]  ;;  %v11765_v52 = vld [vmem:[#allocation2 + $0x110] sm:$0xff]  ;;  %9587 = vmatprep.subr.bf16.mxu1 %v9586_v9  ;;  %v9594_v3 = vpack.c.bf16 %v7514_v11, %v7513_v53  ;;  %v7515_v22 = vld [vmem:[%s13126_s3 + $0x320] sm:$0xff]  ;;  %vm7047_vm15 = vcmask 1041409  }
 0x31f   : > { %3229 = vst [vmem:[#allocation2 + $0x139] sm:$0xff] %v3153_v34  ;;  %vm3092_vm0 = vcmp.gt.f32.partialorder %v3060_v23, 0.0  ;;  %v3124_v0 = vmul.f32 0.01, %v3060_v23  ;;  %8868 = vmatprep.mubr.f32.mxu1 %v11763_v4  ;;  %v7516_v2 = vld [vmem:[%s13126_s3 + $0x328] sm:$0xff]  ;;  %v7517_v27 = vld [vmem:[%s13126_s3 + $0x330] sm:$0xff] }
 0x320   : > { %vm3091_vm1 = vcmp.gt.f32.partialorder %v3059_v51, 0.0  ;;  %v3123_v17 = vmul.f32 0.01, %v3059_v51  ;;  %v8802_v61 = vpop.f32.mrb[28].mxu0  ;;  %8869 = vmatmul.mubr.f32.gmra.mrb[14].mxu1 %v11765_v52  ;;  %v7518_v34 = vld [vmem:[%s13126_s3 + $0x338] sm:$0xff]  ;;  %v7533_v53 = vld [vmem:[%s13126_s3 + $0xb0] sm:$0xff] }
 0x321   : > { %v3156_v10 = vsel %vm3092_vm0, %v3060_v23, %v3124_v0  ;;  %v3062_v37 = vadd.f32 %v8802_v61, %v11624_v1  ;;  %v2975_v12 = vpop.f32.mrb[29].mxu0  ;;  %9589 = vmatpush3.bf16.msra.mxu1 %v9586_v9  ;;  %v9598_v23 = vpack.c.bf16 %v7516_v2, %v7515_v22  ;;  %v7520_v0 = vld [vmem:[%s13126_s3 + $0x348] sm:$0xff]  ;;  %v7521_v61 = vld [vmem:[%s13126_s3 + $0x350] sm:$0xff]  ;;  %v7534_v11 = vld [vmem:[%s13126_s3 + $0xb8] sm:$0xff]  ;;  %vm7049_vm0 = vcmask 1042434  }
 0x322   : > { %3232 = vst [vmem:[#allocation2 + $0x159] sm:$0xff] %v3156_v10  ;;  %v3155_v56 = vsel %vm3091_vm1, %v3059_v51, %v3123_v17  ;;  %v3061_v58 = vadd.f32 %v11624_v1, %v2975_v12  ;;  %v11773_v18 = vld [vmem:[#allocation2 + $0x120] sm:$0xff]  ;;  %v11775_v20 = vld [vmem:[#allocation2 + $0x128] sm:$0xff]  ;;  %9591 = vmatprep.subr.bf16.mxu1 %v11767_v40  ;;  %v9602_v51 = vpack.c.bf16 %v7518_v34, %v7517_v27  ;;  %v7522_v10 = vld [vmem:[%s13126_s3 + $0x358] sm:$0xff]  ;;  %vm7051_vm1 = vcmask 1043459  }
 0x323   : > { %3231 = vst [vmem:[#allocation2 + $0x151] sm:$0xff] %v3155_v56  ;;  %vm3094_vm4 = vcmp.gt.f32.partialorder %v3062_v37, 0.0  ;;  %v3126_v24 = vmul.f32 0.01, %v3062_v37  ;;  %8871 = vmatprep.mubr.f32.mxu1 %v11773_v18  ;;  %v7523_v12 = vld [vmem:[%s13126_s3 + $0x360] sm:$0xff]  ;;  %v7524_v56 = vld [vmem:[%s13126_s3 + $0x368] sm:$0xff] }
 0x324   : > { %vm3093_vm5 = vcmp.gt.f32.partialorder %v3061_v58, 0.0  ;;  %v3125_v26 = vmul.f32 0.01, %v3061_v58  ;;  %v8805_v29 = vpop.f32.mrb[30].mxu0  ;;  %8872 = vmatmul.mubr.f32.gmra.mrb[16].mxu1 %v11775_v20  ;;  %v7535_v22 = vld [vmem:[%s13126_s3 + $0xc0] sm:$0xff]  ;;  %v7536_v2 = vld [vmem:[%s13126_s3 + $0xc8] sm:$0xff] }
 0x325   : > { %v3158_v30 = vsel %vm3094_vm4, %v3062_v37, %v3126_v24  ;;  %v3064_v55 = vadd.f32 %v8805_v29, %v11624_v1  ;;  %v2985_v60 = vpop.f32.mrb[31].mxu0  ;;  %v9610_v37 = vpack.c.bf16 %v7522_v10, %v7521_v61  ;;  %v7525_v24 = vld [vmem:[%s13126_s3 + $0x370] sm:$0xff]  ;;  %v7538_v34 = vld [vmem:[%s13126_s3 + $0xd8] sm:$0xff]  ;;  %vm7053_vm4 = vcmask 1044484  }
 0x326   : > { %3234 = vst [vmem:[#allocation2 + $0x171] sm:$0xff] %v3158_v30  ;;  %v3157_v45 = vsel %vm3093_vm5, %v3061_v58, %v3125_v26  ;;  %v3063_v59 = vadd.f32 %v11624_v1, %v2985_v60  ;;  %v11782_v63 = vld [vmem:[#allocation2 + $0x138] sm:$0xff]  ;;  %v11784_v32 = vld [vmem:[#allocation2 + $0x140] sm:$0xff]  ;;  %v9614_v58 = vpack.c.bf16 %v7524_v56, %v7523_v12  ;;  %v7537_v27 = vld [vmem:[%s13126_s3 + $0xd0] sm:$0xff]  ;;  %vm7055_vm5 = vcmask 1045509  }
 0x327   : > { %3233 = vst [vmem:[#allocation2 + $0x169] sm:$0xff] %v3157_v45  ;;  %vm3096_vm6 = vcmp.gt.f32.partialorder %v3064_v55, 0.0  ;;  %v3128_v44 = vmul.f32 0.01, %v3064_v55  ;;  %8874 = vmatprep.mubr.f32.mxu1 %v11782_v63  ;;  %v7526_v26 = vld [vmem:[%s13126_s3 + $0x378] sm:$0xff]  ;;  %v7527_v30 = vld [vmem:[%s13126_s3 + $0x80] sm:$0xff] }
 0x328   : > { %vm3095_vm7 = vcmp.gt.f32.partialorder %v3063_v59, 0.0  ;;  %v3127_v49 = vmul.f32 0.01, %v3063_v59  ;;  %8875 = vmatmul.mubr.f32.gmra.mrb[18].mxu1 %v11784_v32  ;;  %v9618_v29 = vpack.c.bf16 %v7526_v26, %v7525_v24  ;;  %v7529_v45 = vld [vmem:[%s13126_s3 + $0x90] sm:$0xff]  ;;  %v7542_v10 = vld [vmem:[%s13126_s3 + $0xf8] sm:$0xff]  ;;  %v7543_v12 = vld [vmem:[%s13126_s3 + $0x200] sm:$0xff] }
 0x329   : > { %v3160_v35 = vsel %vm3096_vm6, %v3064_v55, %v3128_v44  ;;  %v7528_v55 = vld [vmem:[%s13126_s3 + $0x88] sm:$0xff]  ;;  %v7541_v61 = vld [vmem:[%s13126_s3 + $0xf0] sm:$0xff]  ;;  %v4096_v24 = vrot.slane %v11804_v21, 1  ;;  %v11967_v26 = vld [vmem:[#allocation2 + $0x198] sm:$0xff]  ;;  %vm7057_vm6 = vcmask 1046534  }
 0x32a   : > { %3236 = vst [vmem:[#allocation2 + $0x189] sm:$0xff] %v3160_v35  ;;  %v3159_v36 = vsel %vm3095_vm7, %v3063_v59, %v3127_v49  ;;  %v11788_v42 = vld [vmem:[#allocation2 + $0x150] sm:$0xff]  ;;  %v11790_v48 = vld [vmem:[#allocation2 + $0x158] sm:$0xff]  ;;  %v9622_v60 = vpack.c.bf16 %v7528_v55, %v7527_v30  ;;  %v7531_v49 = vld [vmem:[%s13126_s3 + $0xa0] sm:$0xff]  ;;  %vm7059_vm7 = vcmask 1047559  }
 0x32b   : > { %3235 = vst [vmem:[#allocation2 + $0x181] sm:$0xff] %v3159_v36  ;;  %8877 = vmatprep.mubr.f32.mxu1 %v11788_v42  ;;  %v7530_v59 = vld [vmem:[%s13126_s3 + $0x98] sm:$0xff]  ;;  %v7532_v35 = vld [vmem:[%s13126_s3 + $0xa8] sm:$0xff]  ;;  %v11972_v30 = vld [vmem:[#allocation2 + $0x10] sm:$0x3] }
 0x32c   : > { %8878 = vmatmul.mubr.f32.gmra.mrb[20].mxu1 %v11790_v48  ;;  %v9626_v44 = vpack.c.bf16 %v7530_v59, %v7529_v45  ;;  %v9630_v36 = vpack.c.bf16 %v7532_v35, %v7531_v49  ;;  %v7544_v56 = vld [vmem:[%s13126_s3 + $0x208] sm:$0xff]  ;;  %v4099_v55 = vrot.slane %v11972_v30, 1  ;;  %v7545_v45 = vld [vmem:[%s13126_s3 + $0x210] sm:$0xff]  ;;  %v7546_v59 = vld [vmem:[%s13126_s3 + $0x218] sm:$0xff]  ;;  %v4102_v49 = vrot.slane %v11636_v19, 1 }
 0x32d   : > { %v11988_v35 = vld [vmem:[#allocation2 + $0x28] sm:$0x3] }
 0x32e   : > { %v11794_v1 = vld [vmem:[#allocation2 + $0x168] sm:$0xff]  ;;  %v11796_v5 = vld [vmem:[#allocation2 + $0x170] sm:$0xff] }
 0x32f   : > { %8880 = vmatprep.mubr.f32.mxu1 %v11794_v1 }
 0x330   : > { %8881 = vmatmul.mubr.f32.gmra.mrb[22].mxu1 %v11796_v5 }
 0x332   : > { %v11800_v15 = vld [vmem:[#allocation2 + $0x180] sm:$0xff]  ;;  %v11802_v9 = vld [vmem:[#allocation2 + $0x188] sm:$0xff] }
 0x333   : > { %8883 = vmatprep.mubr.f32.mxu1 %v11800_v15 }
 0x334   : > { %8884 = vmatmul.mubr.f32.gmra.mrb[24].mxu1 %v11802_v9 }
 0x335   : > { %8918 = vmatprep.mubr.f32.mxu1 %v11804_v21 }
 0x338   : > { %8919 = vmatmul.mubr.f32.vlgmr.msra.gmra.mrb[26].mxu1 %v10396_v46 }
 0x339   : > { %9593 = vmatpush3.bf16.msra.mxu1 %v11767_v40  ;;  %8921 = vmatprep.mubr.f32.mxu1 %v11634_v8  ;;  %v7519_v40 = vld [vmem:[%s13126_s3 + $0x340] sm:$0xff] }
 0x33a   : > { %9595 = vmatprep.subr.bf16.mxu1 %v9594_v3  ;;  %v9606_v17 = vpack.c.bf16 %v7520_v0, %v7519_v40  ;;  %v7539_v40 = vld [vmem:[%s13126_s3 + $0xe0] sm:$0xff]  ;;  %v7540_v0 = vld [vmem:[%s13126_s3 + $0xe8] sm:$0xff] }
 0x33c   : > { %8922 = vmatmul.mubr.f32.gmra.mrb[28].mxu1 %v11636_v19  ;;  %v4106_v19 = vrot.slane %v11642_v25, 1 }
 0x33d   : > { %8924 = vmatprep.mubr.f32.mxu1 %v11642_v25  ;;  %9597 = vmatpush3.bf16.msra.mxu1 %v9594_v3  ;;  %v9634_v3 = vpack.c.bf16 %v7534_v11, %v7533_v53  ;;  %v9658_v53 = vpack.c.bf16 %v7546_v59, %v7545_v45  ;;  %v4104_v11 = vrot.slane %v11988_v35, 1  ;;  %v7553_v59 = vld [vmem:[%s13126_s3 + $0x250] sm:$0xff] }
 0x33e   : > { %9599 = vmatprep.subr.bf16.mxu1 %v9598_v23 }
 0x340   : > { %8925 = vmatmul.mubr.f32.gmra.mrb[30].mxu1 %v11644_v13 }
 0x341   : > { %8927 = vmatprep.mubr.f32.mxu1 %v11650_v43  ;;  %9601 = vmatpush3.bf16.msra.mxu1 %v9598_v23  ;;  %v9638_v23 = vpack.c.bf16 %v7536_v2, %v7535_v22  ;;  %v4107_v22 = vrot.slane %v11644_v13, 1  ;;  %v12004_v2 = vld [vmem:[#allocation2 + $0x40] sm:$0x3] }
 0x342   : > { %9603 = vmatprep.subr.bf16.mxu1 %v9602_v51 }
 0x344   : > { %8928 = vmatmul.mubr.f32.gmra.mrb[0].mxu1 %v11652_v16 }
 0x345   : > { %8930 = vmatprep.mubr.f32.mxu1 %v11664_v50  ;;  %9605 = vmatpush3.bf16.msra.mxu1 %v9602_v51  ;;  %v9642_v51 = vpack.c.bf16 %v7538_v34, %v7537_v27  ;;  %v12008_v27 = vsel %vm1126_vm2, %v4102_v49, %v4104_v11  ;;  %v4109_v34 = vrot.slane %v12004_v2, 1 }
 0x346   : > { %9607 = vmatprep.subr.bf16.mxu1 %v9606_v17 }
 0x348   : > { %8931 = vmatmul.mubr.f32.gmra.mrb[2].mxu1 %v11666_v6 }
 0x349   : > { %8933 = vmatprep.mubr.f32.mxu1 %v11679_v41  ;;  %9609 = vmatpush3.bf16.msra.mxu1 %v9606_v17  ;;  %v9646_v17 = vpack.c.bf16 %v7540_v0, %v7539_v40  ;;  %v4111_v40 = vrot.slane %v11650_v43, 1  ;;  %v4112_v0 = vrot.slane %v11652_v16, 1 }
 0x34a   : > { %9611 = vmatprep.subr.bf16.mxu1 %v9610_v37 }
 0x34c   : > { %8934 = vmatmul.mubr.f32.gmra.mrb[4].mxu1 %v11681_v47 }
 0x34d   : > { %8936 = vmatprep.mubr.f32.mxu1 %v11693_v31  ;;  %9613 = vmatpush3.bf16.msra.mxu1 %v9610_v37  ;;  %v9650_v37 = vpack.c.bf16 %v7542_v10, %v7541_v61  ;;  %v12027_v10 = vsel %vm1126_vm2, %v4107_v22, %v4109_v34 }
 0x34e   : > { %9615 = vmatprep.subr.bf16.mxu1 %v9614_v58 }
 0x350   : > { %8937 = vmatmul.mubr.f32.gmra.mrb[6].mxu1 %v11695_v54 }
 0x351   : > { %8939 = vmatprep.mubr.f32.mxu1 %v11707_v28  ;;  %9617 = vmatpush3.bf16.msra.mxu1 %v9614_v58  ;;  %v9654_v58 = vpack.c.bf16 %v7544_v56, %v7543_v12  ;;  %v7551_v12 = vld [vmem:[%s13126_s3 + $0x240] sm:$0xff]  ;;  %v4116_v56 = vrot.slane %v11664_v50, 1 }
 0x352   : > { %9619 = vmatprep.subr.bf16.mxu1 %v9618_v29 }
 0x354   : > { %8940 = vmatmul.mubr.f32.gmra.mrb[8].mxu1 %v11709_v33 }
 0x355   : > { %8942 = vmatprep.mubr.f32.mxu1 %v11721_v14  ;;  %9621 = vmatpush3.bf16.msra.mxu1 %v9618_v29  ;;  %v11970_v29 = vrot.slane %v10396_v46, 1 }
 0x356   : > { %9623 = vmatprep.subr.bf16.mxu1 %v9622_v60 }
 0x358   : > { %8943 = vmatmul.mubr.f32.gmra.mrb[10].mxu1 %v11723_v57 }
 0x359   : > { %8945 = vmatprep.mubr.f32.mxu1 %v11735_v62 }
 0x35c   : > { %8946 = vmatmul.mubr.f32.gmra.mrb[12].mxu1 %v11737_v38 }
 0x35d   : > { %8948 = vmatprep.mubr.f32.mxu1 %v11749_v39 }
 0x360   : > { %8949 = vmatmul.mubr.f32.gmra.mrb[14].mxu1 %v11751_v7 }
 0x361   : > { %8951 = vmatprep.mubr.f32.mxu1 %v11763_v4 }
 0x364   : > { %8952 = vmatmul.mubr.f32.gmra.mrb[16].mxu1 %v11765_v52 }
 0x365   : > { %8954 = vmatprep.mubr.f32.mxu1 %v11773_v18 }
 0x368   : > { %8955 = vmatmul.mubr.f32.gmra.mrb[18].mxu1 %v11775_v20 }
 0x369   : > { %8957 = vmatprep.mubr.f32.mxu1 %v11782_v63 }
 0x36c   : > { %8958 = vmatmul.mubr.f32.gmra.mrb[20].mxu1 %v11784_v32 }
 0x36d   : > { %8960 = vmatprep.mubr.f32.mxu1 %v11788_v42 }
 0x370   : > { %8961 = vmatmul.mubr.f32.gmra.mrb[22].mxu1 %v11790_v48 }
 0x371   : > { %8963 = vmatprep.mubr.f32.mxu1 %v11794_v1 }
 0x374   : > { %8964 = vmatmul.mubr.f32.gmra.mrb[24].mxu1 %v11796_v5 }
 0x375   : > { %8998 = vmatprep.mubr.f32.mxu1 %v11642_v25  ;;  %v7550_v25 = vld [vmem:[%s13126_s3 + $0x238] sm:$0xff] }
 0x378   : > { %8999 = vmatmul.mubr.f32.vlgmr.msra.gmra.mrb[26].mxu1 %v11644_v13  ;;  %v12019_v13 = vsel %vm1126_vm2, %v4106_v19, %v4107_v22  ;;  %v4126_v19 = vrot.slane %v11693_v31, 1  ;;  %v4127_v22 = vrot.slane %v11695_v54, 1 }
 0x379   : > { %9625 = vmatpush3.bf16.msra.mxu1 %v9622_v60  ;;  %9001 = vmatprep.mubr.f32.mxu1 %v11650_v43  ;;  %v4098_v60 = vsel %vm1126_vm2, %v4096_v24, %v11970_v29  ;;  %v7552_v43 = vld [vmem:[%s13126_s3 + $0x248] sm:$0xff]  ;;  %v12042_v24 = vld [vmem:[#allocation2 + $0x70] sm:$0x3] }
 0x37a   : > { %9627 = vmatprep.subr.bf16.mxu1 %v9626_v44  ;;  %v4119_v45 = vrot.slane %v12042_v24, 1 }
 0x37c   : > { %9002 = vmatmul.mubr.f32.gmra.mrb[28].mxu1 %v11652_v16  ;;  %v12038_v16 = vsel %vm1126_vm2, %v4111_v40, %v4112_v0 }
 0x37d   : > { %9004 = vmatprep.mubr.f32.mxu1 %v11664_v50  ;;  %9629 = vmatpush3.bf16.msra.mxu1 %v9626_v44  ;;  %v4101_v44 = vrot.slane %v11634_v8, 1  ;;  %v7554_v50 = vld [vmem:[%s13126_s3 + $0x258] sm:$0xff] }
 0x37e   : > { %9631 = vmatprep.subr.bf16.mxu1 %v9630_v36 }
 0x37f   : > { %v12000_v8 = vsel %vm1126_vm2, %v4101_v44, %v4102_v49  ;;  %v4121_v44 = vrot.slane %v11679_v41, 1  ;;  %v4122_v49 = vrot.slane %v11681_v47, 1 }
 0x380   : > { %9005 = vmatmul.mubr.f32.gmra.mrb[30].mxu1 %v11666_v6 }
 0x381   : > { %9007 = vmatprep.mubr.f32.mxu1 %v11679_v41  ;;  %9633 = vmatpush3.bf16.msra.mxu1 %v9630_v36  ;;  %v4100_v36 = vsel %vm1126_vm2, %v11970_v29, %v4099_v55  ;;  %v9670_v55 = vpack.c.bf16 %v7552_v43, %v7551_v12  ;;  %v7556_v41 = vld [vmem:[%s13126_s3 + $0x268] sm:$0xff]  ;;  %v4132_v12 = vrot.slane %v11709_v33, 1  ;;  %v12103_v43 = vld [vmem:[#allocation2 + $0xb8] sm:$0x3] }
 0x382   : > { %9635 = vmatprep.subr.bf16.mxu1 %v9634_v3 }
 0x384   : > { %9008 = vmatmul.mubr.f32.gmra.mrb[0].mxu1 %v11681_v47  ;;  %v12076_v47 = vsel %vm1126_vm2, %v4121_v44, %v4122_v49  ;;  %v4136_v44 = vrot.slane %v11721_v14, 1 }
 0x385   : > { %9010 = vmatprep.mubr.f32.mxu1 %v11693_v31  ;;  %9637 = vmatpush3.bf16.msra.mxu1 %v9634_v3  ;;  %v7547_v3 = vld [vmem:[%s13126_s3 + $0x220] sm:$0xff]  ;;  %v7557_v31 = vld [vmem:[%s13126_s3 + $0x270] sm:$0xff] }
 0x386   : > { %9639 = vmatprep.subr.bf16.mxu1 %v9638_v23 }
 0x388   : > { %9011 = vmatmul.mubr.f32.gmra.mrb[2].mxu1 %v11695_v54  ;;  %v7558_v54 = vld [vmem:[%s13126_s3 + $0x278] sm:$0xff] }
 0x389   : > { %9013 = vmatprep.mubr.f32.mxu1 %v11707_v28  ;;  %9641 = vmatpush3.bf16.msra.mxu1 %v9638_v23 }
 0x38a   : > { %9643 = vmatprep.subr.bf16.mxu1 %v9642_v51 }
 0x38c   : > { %9014 = vmatmul.mubr.f32.gmra.mrb[4].mxu1 %v11709_v33  ;;  %v7560_v33 = vld [vmem:[%s13126_s3 + $0x388] sm:$0xff] }
 0x38d   : > { %9016 = vmatprep.mubr.f32.mxu1 %v11721_v14  ;;  %9645 = vmatpush3.bf16.msra.mxu1 %v9642_v51  ;;  %v7549_v51 = vld [vmem:[%s13126_s3 + $0x230] sm:$0xff] }
 0x38e   : > { %9647 = vmatprep.subr.bf16.mxu1 %v9646_v17  ;;  %v9666_v61 = vpack.c.bf16 %v7550_v25, %v7549_v51 }
 0x390   : > { %9017 = vmatmul.mubr.f32.gmra.mrb[6].mxu1 %v11723_v57 }
 0x391   : > { %9019 = vmatprep.mubr.f32.mxu1 %v11735_v62  ;;  %9649 = vmatpush3.bf16.msra.mxu1 %v9646_v17  ;;  %v12023_v17 = vld [vmem:[#allocation2 + $0x58] sm:$0x3] }
 0x392   : > { %9651 = vmatprep.subr.bf16.mxu1 %v9650_v37 }
 0x394   : > { %9020 = vmatmul.mubr.f32.gmra.mrb[8].mxu1 %v11737_v38 }
 0x395   : > { %9022 = vmatprep.mubr.f32.mxu1 %v11749_v39  ;;  %9653 = vmatpush3.bf16.msra.mxu1 %v9650_v37  ;;  %v4114_v37 = vrot.slane %v12023_v17, 1 }
 0x396   : > { %9655 = vmatprep.subr.bf16.mxu1 %v9654_v58 }
 0x398   : > { %9023 = vmatmul.mubr.f32.gmra.mrb[10].mxu1 %v11751_v7 }
 0x399   : > { %9025 = vmatprep.mubr.f32.mxu1 %v11763_v4 }
 0x39c   : > { %9026 = vmatmul.mubr.f32.gmra.mrb[12].mxu1 %v11765_v52 }
 0x39d   : > { %9028 = vmatprep.mubr.f32.mxu1 %v11773_v18 }
 0x3a0   : > { %9029 = vmatmul.mubr.f32.gmra.mrb[14].mxu1 %v11775_v20 }
 0x3a1   : > { %9031 = vmatprep.mubr.f32.mxu1 %v11782_v63 }
 0x3a4   : > { %9032 = vmatmul.mubr.f32.gmra.mrb[16].mxu1 %v11784_v32 }
 0x3a5   : > { %9034 = vmatprep.mubr.f32.mxu1 %v11788_v42 }
 0x3a8   : > { %9035 = vmatmul.mubr.f32.gmra.mrb[18].mxu1 %v11790_v48 }
 0x3a9   : > { %9037 = vmatprep.mubr.f32.mxu1 %v11794_v1 }
 0x3ac   : > { %9038 = vmatmul.mubr.f32.gmra.mrb[20].mxu1 %v11796_v5 }
 0x3ad   : > { %9040 = vmatprep.mubr.f32.mxu1 %v11800_v15 }
 0x3b0   : > { %9041 = vmatmul.mubr.f32.gmra.mrb[22].mxu1 %v11802_v9 }
 0x3b1   : > { %9043 = vmatprep.mubr.f32.mxu1 %v11967_v26 }
 0x3b4   : > { %9044 = vmatmul.mubr.f32.gmra.mrb[24].mxu1 %v10396_v46  ;;  %v7548_v46 = vld [vmem:[%s13126_s3 + $0x228] sm:$0xff] }
 0x3b5   : > { %9078 = vmatprep.mubr.f32.mxu1 %v4098_v60  ;;  %v9662_v23 = vpack.c.bf16 %v7548_v46, %v7547_v3  ;;  %v12046_v60 = vsel %vm1126_vm2, %v4112_v0, %v4114_v37  ;;  %v7555_v46 = vld [vmem:[%s13126_s3 + $0x260] sm:$0xff]  ;;  %v4131_v37 = vrot.slane %v11707_v28, 1 }
 0x3b6   : > { %v9678_v34 = vpack.c.bf16 %v7556_v41, %v7555_v46  ;;  %v7559_v28 = vld [vmem:[%s13126_s3 + $0x380] sm:$0xff] }
 0x3b8   : > { %9079 = vmatmul.mubr.f32.vlgmr.msra.gmra.mrb[26].mxu1 %v4100_v36  ;;  %v12061_v36 = vld [vmem:[#allocation2 + $0x88] sm:$0x3] }
 0x3b9   : > { %9657 = vmatpush3.bf16.msra.mxu1 %v9654_v58  ;;  %9081 = vmatprep.mubr.f32.mxu1 %v12000_v8  ;;  %v4117_v58 = vrot.slane %v11666_v6, 1  ;;  %v4124_v3 = vrot.slane %v12061_v36, 1 }
 0x3ba   : > { %9659 = vmatprep.subr.bf16.mxu1 %v9658_v53 }
 0x3bb   : > { %v12057_v6 = vsel %vm1126_vm2, %v4116_v56, %v4117_v58  ;;  %v12065_v11 = vsel %vm1126_vm2, %v4117_v58, %v4119_v45  ;;  %v12086_v25 = vsel %vm1126_vm2, %v4122_v49, %v4124_v3  ;;  %v9682_v56 = vpack.c.bf16 %v7558_v54, %v7557_v31 }
 0x3bc   : > { %9082 = vmatmul.mubr.f32.gmra.mrb[28].mxu1 %v12008_v27  ;;  %v4134_v45 = vrot.slane %v12103_v43, 1  ;;  %v4137_v49 = vrot.slane %v11723_v57, 1  ;;  %v12129_v3 = vpack.c.bf16 %v7560_v33, %v7559_v28  ;;  %v4141_v57 = vrot.slane %v11735_v62, 1 }
 0x3bd   : > { %9084 = vmatprep.mubr.f32.mxu1 %v12019_v13  ;;  %9661 = vmatpush3.bf16.msra.mxu1 %v9658_v53  ;;  %v9674_v53 = vpack.c.bf16 %v7554_v50, %v7553_v59  ;;  %v12122_v50 = vsel %vm1126_vm2, %v4131_v37, %v4132_v12  ;;  %v4146_v62 = vrot.slane %v11749_v39, 1  ;;  %v4151_v33 = vrot.slane %v11763_v4, 1 }
 0x3be   : > { %9663 = vmatprep.subr.bf16.mxu1 %v9662_v23  ;;  %v12134_v41 = vsel %vm1126_vm2, %v4132_v12, %v4134_v45  ;;  %v12141_v14 = vsel %vm1126_vm2, %v4136_v44, %v4137_v49  ;;  %v12159_v12 = vld [vmem:[#allocation2 + $0x100] sm:$0x3]  ;;  %v4152_v39 = vrot.slane %v11765_v52, 1  ;;  %v12172_v44 = vld [vmem:[#allocation2 + $0x118] sm:$0x3]  ;;  %v4157_v4 = vrot.slane %v11775_v20, 1 }
 0x3bf   : > { %v4149_v45 = vrot.slane %v12159_v12, 1 }
 0x3c0   : > { %9085 = vmatmul.mubr.f32.gmra.mrb[30].mxu1 %v12027_v10 }
 0x3c1   : > { %9087 = vmatprep.mubr.f32.mxu1 %v12038_v16  ;;  %9665 = vmatpush3.bf16.msra.mxu1 %v9662_v23  ;;  %v12080_v23 = vld [vmem:[#allocation2 + $0xa0] sm:$0x3] }
 0x3c2   : > { %9667 = vmatprep.subr.bf16.mxu1 %v9666_v61  ;;  %v4129_v40 = vrot.slane %v12080_v23, 1 }
 0x3c4   : > { %9088 = vmatmul.mubr.f32.gmra.mrb[0].mxu1 %v12046_v60 }
 0x3c5   : > { %9090 = vmatprep.mubr.f32.mxu1 %v12057_v6  ;;  %9669 = vmatpush3.bf16.msra.mxu1 %v9666_v61  ;;  %v12099_v61 = vsel %vm1126_vm2, %v4126_v19, %v4127_v22 }
 0x3c6   : > { %9671 = vmatprep.subr.bf16.mxu1 %v9670_v55 }
 0x3c8   : > { %9091 = vmatmul.mubr.f32.gmra.mrb[2].mxu1 %v12065_v11 }
 0x3c9   : > { %9093 = vmatprep.mubr.f32.mxu1 %v12076_v47  ;;  %9673 = vmatpush3.bf16.msra.mxu1 %v9670_v55  ;;  %v12109_v55 = vsel %vm1126_vm2, %v4127_v22, %v4129_v40  ;;  %v12145_v40 = vld [vmem:[#allocation2 + $0xe8] sm:$0x3] }
 0x3ca   : > { %9675 = vmatprep.subr.bf16.mxu1 %v9674_v53  ;;  %v4144_v54 = vrot.slane %v12145_v40, 1 }
 0x3cb   : > { %v12083_v51 = vpop.f32.mrb[32].mxu0 }
 0x3cc   : > { %v12095_v0 = vpop.f32.mrb[33].mxu0  ;;  %9094 = vmatmul.mubr.f32.gmra.mrb[4].mxu1 %v12086_v25 }
 0x3cd   : > { %9096 = vmatprep.mubr.f32.mxu1 %v12099_v61  ;;  %9677 = vmatpush3.bf16.msra.mxu1 %v9674_v53  ;;  %v12126_v53 = vld [vmem:[#allocation2 + $0xd0] sm:$0x3] }
 0x3ce   : > { %9679 = vmatprep.subr.bf16.mxu1 %v9678_v34  ;;  %v4139_v19 = vrot.slane %v12126_v53, 1 }
 0x3cf   : > { %v12106_v58 = vpop.f32.mrb[34].mxu0 }
 0x3d0   : > { %v12118_v59 = vpop.f32.mrb[35].mxu0  ;;  %9097 = vmatmul.mubr.f32.gmra.mrb[6].mxu1 %v12109_v55  ;;  %v12150_v31 = vsel %vm1126_vm2, %v4137_v49, %v4139_v19  ;;  %v4154_v49 = vrot.slane %v12172_v44, 1  ;;  %v12181_v19 = vsel %vm1126_vm2, %v4151_v33, %v4152_v39 }
 0x3d1   : > { %9099 = vmatprep.mubr.f32.mxu1 %v12122_v50  ;;  %9681 = vmatpush3.bf16.msra.mxu1 %v9678_v34  ;;  %v4142_v34 = vrot.slane %v11737_v38, 1  ;;  %v4147_v38 = vrot.slane %v11751_v7, 1 }
 0x3d2   : > { %9683 = vmatprep.subr.bf16.mxu1 %v9682_v56  ;;  %v12189_v52 = vsel %vm1126_vm2, %v4152_v39, %v4154_v49  ;;  %v4166_v49 = vrot.slane %v11788_v42, 1  ;;  %v4172_v42 = vrot.slane %v11796_v5, 1  ;;  %v7561_v5 = vld [vmem:[%s13126_s3 + $0x390] sm:$0xff] }
 0x3d3   : > { %v12131_v46 = vpop.f32.mrb[36].mxu0  ;;  %v12155_v37 = vsel %vm1126_vm2, %v4141_v57, %v4142_v34  ;;  %v12168_v28 = vsel %vm1126_vm2, %v4146_v62, %v4147_v38  ;;  %v12176_v7 = vsel %vm1126_vm2, %v4147_v38, %v4149_v45  ;;  %v4156_v57 = vrot.slane %v11773_v18, 1  ;;  %v12198_v45 = vld [vmem:[#allocation2 + $0x148] sm:$0x3] }
 0x3d4   : > { %v12137_v22 = vpop.f32.mrb[37].mxu0  ;;  %9100 = vmatmul.mubr.f32.gmra.mrb[8].mxu1 %v12134_v41  ;;  %v4161_v38 = vrot.slane %v11782_v63, 1  ;;  %v4162_v18 = vrot.slane %v11784_v32, 1  ;;  %v4164_v33 = vrot.slane %v12198_v45, 1  ;;  %v4167_v63 = vrot.slane %v11790_v48, 1 }
 0x3d5   : > { %13201 = vst [vmem:[#allocation3_spill] sm:$0xff] %v12137_v22  ;;  %9102 = vmatprep.mubr.f32.mxu1 %v12141_v14  ;;  %9685 = vmatpush3.bf16.msra.mxu1 %v9682_v56  ;;  %v12163_v56 = vsel %vm1126_vm2, %v4142_v34, %v4144_v54  ;;  %v12185_v34 = vld [vmem:[#allocation2 + $0x130] sm:$0x3]  ;;  %v12194_v62 = vsel %vm1126_vm2, %v4156_v57, %v4157_v4  ;;  %v12211_v57 = vld [vmem:[#allocation2 + $0x160] sm:$0x3] }
 0x3d6   : > { %9687 = vmatprep.subr.bf16.mxu1 %v12129_v3  ;;  %v4159_v54 = vrot.slane %v12185_v34, 1  ;;  %v12207_v39 = vsel %vm1126_vm2, %v4161_v38, %v4162_v18  ;;  %v12215_v32 = vsel %vm1126_vm2, %v4162_v18, %v4164_v33  ;;  %v4171_v38 = vrot.slane %v11794_v1, 1  ;;  %v12224_v22 = vld [vmem:[#allocation2 + $0x178] sm:$0x3] }
 0x3d7   : > { %v4174_v18 = vrot.slane %v12224_v22, 1 }
 0x3d8   : > { %9103 = vmatmul.mubr.f32.gmra.mrb[10].mxu1 %v12150_v31  ;;  %v12202_v20 = vsel %vm1126_vm2, %v4157_v4, %v4159_v54  ;;  %v4169_v4 = vrot.slane %v12211_v57, 1  ;;  %v12220_v54 = vsel %vm1126_vm2, %v4166_v49, %v4167_v63  ;;  %v12233_v33 = vsel %vm1126_vm2, %v4171_v38, %v4172_v42  ;;  %v7562_v49 = vld [vmem:[%s13126_s3 + $0x398] sm:$0xff]  ;;  %v7564_v38 = vld [vmem:[%s13126_s3 + $0x3a8] sm:$0xff] }
 0x3d9   : > { %9105 = vmatprep.mubr.f32.mxu1 %v12155_v37  ;;  %v12237_v1 = vsel %vm1126_vm2, %v4172_v42, %v4174_v18  ;;  %v7566_v18 = vld [vmem:[%s13126_s3 + $0x3b8] sm:$0xff] }
 0x3da   : > { %v12228_v48 = vsel %vm1126_vm2, %v4167_v63, %v4169_v4  ;;  %v9690_v63 = vpack.c.bf16 %v7562_v49, %v7561_v5  ;;  %v7563_v4 = vld [vmem:[%s13126_s3 + $0x3a0] sm:$0xff]  ;;  %v7568_v5 = vld [vmem:[%s13126_s3 + $0x3c8] sm:$0xff] }
 0x3db   : > { %v9694_v42 = vpack.c.bf16 %v7564_v38, %v7563_v4  ;;  %v7570_v4 = vld [vmem:[%s13126_s3 + $0x3d8] sm:$0xff] }
 0x3dc   : > { %9106 = vmatmul.mubr.f32.gmra.mrb[12].mxu1 %v12163_v56 }
 0x3dd   : > { %9108 = vmatprep.mubr.f32.mxu1 %v12168_v28 }
 0x3e0   : > { %9109 = vmatmul.mubr.f32.gmra.mrb[14].mxu1 %v12176_v7 }
 0x3e1   : > { %9111 = vmatprep.mubr.f32.mxu1 %v12181_v19 }
 0x3e4   : > { %9112 = vmatmul.mubr.f32.gmra.mrb[16].mxu1 %v12189_v52 }
 0x3e5   : > { %9114 = vmatprep.mubr.f32.mxu1 %v12194_v62 }
 0x3e8   : > { %9115 = vmatmul.mubr.f32.gmra.mrb[18].mxu1 %v12202_v20 }
 0x3e9   : > { %9117 = vmatprep.mubr.f32.mxu1 %v12207_v39 }
 0x3ec   : > { %9118 = vmatmul.mubr.f32.gmra.mrb[20].mxu1 %v12215_v32 }
 0x3ed   : > { %9120 = vmatprep.mubr.f32.mxu1 %v12220_v54 }
 0x3f0   : > { %9121 = vmatmul.mubr.f32.gmra.mrb[22].mxu1 %v12228_v48 }
 0x3f1   : > { %9123 = vmatprep.mubr.f32.mxu1 %v12233_v33 }
 0x3f4   : > { %9124 = vmatmul.mubr.f32.gmra.mrb[24].mxu1 %v12237_v1 }
 0x3f5   : > { %9158 = vmatprep.mubr.f32.mxu1 %v12000_v8  ;;  %v7565_v8 = vld [vmem:[%s13126_s3 + $0x3b0] sm:$0xff] }
 0x3f8   : > { %9159 = vmatmul.mubr.f32.vlgmr.msra.gmra.mrb[26].mxu1 %v12008_v27  ;;  %v9698_v27 = vpack.c.bf16 %v7566_v18, %v7565_v8  ;;  %v7572_v8 = vld [vmem:[%s13126_s3 + $0x3e8] sm:$0xff] }
 0x3f9   : > { %9689 = vmatpush3.bf16.msra.mxu1 %v12129_v3  ;;  %9161 = vmatprep.mubr.f32.mxu1 %v12019_v13  ;;  %v7567_v3 = vld [vmem:[%s13126_s3 + $0x3c0] sm:$0xff] }
 0x3fa   : > { %9691 = vmatprep.subr.bf16.mxu1 %v9690_v63  ;;  %v9702_v49 = vpack.c.bf16 %v7568_v5, %v7567_v3  ;;  %v7574_v3 = vld [vmem:[%s13126_s3 + $0x3f8] sm:$0xff] }
 0x3fc   : > { %9162 = vmatmul.mubr.f32.gmra.mrb[28].mxu1 %v12027_v10 }
 0x3fd   : > { %9164 = vmatprep.mubr.f32.mxu1 %v12038_v16  ;;  %9693 = vmatpush3.bf16.msra.mxu1 %v9690_v63  ;;  %v7569_v63 = vld [vmem:[%s13126_s3 + $0x3d0] sm:$0xff] }
 0x3fe   : > { %9695 = vmatprep.subr.bf16.mxu1 %v9694_v42  ;;  %v9706_v38 = vpack.c.bf16 %v7570_v4, %v7569_v63  ;;  %v7576_v63 = vld [vmem:[%s13126_s3 + $0x108] sm:$0xff] }
 0x400   : > { %9165 = vmatmul.mubr.f32.gmra.mrb[30].mxu1 %v12046_v60 }
 0x401   : > { %9167 = vmatprep.mubr.f32.mxu1 %v12057_v6  ;;  %9697 = vmatpush3.bf16.msra.mxu1 %v9694_v42  ;;  %v7571_v42 = vld [vmem:[%s13126_s3 + $0x3e0] sm:$0xff] }
 0x402   : > { %9699 = vmatprep.subr.bf16.mxu1 %v9698_v27  ;;  %v9710_v18 = vpack.c.bf16 %v7572_v8, %v7571_v42  ;;  %v4486_v42 = vrot.slane %v11802_v9, 1  ;;  %v12319_v8 = vld [vmem:[#allocation2 + $0x190] sm:$0x3]  ;;  %v7578_v9 = vld [vmem:[%s13126_s3 + $0x118] sm:$0xff] }
 0x404   : > { %9168 = vmatmul.mubr.f32.gmra.mrb[0].mxu1 %v12065_v11 }
 0x405   : > { %9170 = vmatprep.mubr.f32.mxu1 %v12076_v47  ;;  %9701 = vmatpush3.bf16.msra.mxu1 %v9698_v27  ;;  %v7573_v27 = vld [vmem:[%s13126_s3 + $0x3f0] sm:$0xff] }
 0x406   : > { %9703 = vmatprep.subr.bf16.mxu1 %v9702_v49  ;;  %v9714_v5 = vpack.c.bf16 %v7574_v3, %v7573_v27 }
 0x408   : > { %9171 = vmatmul.mubr.f32.gmra.mrb[2].mxu1 %v12086_v25 }
 0x409   : > { %9173 = vmatprep.mubr.f32.mxu1 %v12099_v61  ;;  %9705 = vmatpush3.bf16.msra.mxu1 %v9702_v49  ;;  %v7575_v49 = vld [vmem:[%s13126_s3 + $0x100] sm:$0xff] }
 0x40a   : > { %9707 = vmatprep.subr.bf16.mxu1 %v9706_v38  ;;  %v9718_v4 = vpack.c.bf16 %v7576_v63, %v7575_v49  ;;  %v7579_v49 = vld [vmem:[%s13126_s3 + $0x120] sm:$0xff]  ;;  %v7580_v63 = vld [vmem:[%s13126_s3 + $0x128] sm:$0xff] }
 0x40c   : > { %9174 = vmatmul.mubr.f32.gmra.mrb[4].mxu1 %v12109_v55 }
 0x40d   : > { %9176 = vmatprep.mubr.f32.mxu1 %v12122_v50  ;;  %9709 = vmatpush3.bf16.msra.mxu1 %v9706_v38  ;;  %v4485_v38 = vrot.slane %v11800_v15, 1  ;;  %v7577_v15 = vld [vmem:[%s13126_s3 + $0x110] sm:$0xff] }
 0x40e   : > { %9711 = vmatprep.subr.bf16.mxu1 %v9710_v18 }
 0x40f   : > { %v12325_v27 = vsel %vm1126_vm2, %v4485_v38, %v4486_v42  ;;  %v9726_v38 = vpack.c.bf16 %v7580_v63, %v7579_v49  ;;  %v10356_v49 = vld [vmem:[#allocation2 + $0x30] sm:$0xff] }
 0x410   : > { %9177 = vmatmul.mubr.f32.gmra.mrb[6].mxu1 %v12134_v41  ;;  %v5060_v63 = vrot.slane %v10356_v49, 2 }
 0x411   : > { %9179 = vmatprep.mubr.f32.mxu1 %v12141_v14  ;;  %9713 = vmatpush3.bf16.msra.mxu1 %v9710_v18  ;;  %v4488_v18 = vrot.slane %v12319_v8, 1 }
 0x412   : > { %9715 = vmatprep.subr.bf16.mxu1 %v9714_v5 }
 0x413   : > { %v12329_v3 = vsel %vm1126_vm2, %v4486_v42, %v4488_v18  ;;  %v7582_v42 = vld [vmem:[%s13126_s3 + $0x138] sm:$0xff] }
 0x414   : > { %9180 = vmatmul.mubr.f32.gmra.mrb[8].mxu1 %v12150_v31  ;;  %v7586_v18 = vld [vmem:[%s13126_s3 + $0x158] sm:$0xff] }
 0x415   : > { %9182 = vmatprep.mubr.f32.mxu1 %v12155_v37  ;;  %9717 = vmatpush3.bf16.msra.mxu1 %v9714_v5  ;;  %v9722_v5 = vpack.c.bf16 %v7578_v9, %v7577_v15  ;;  %v7588_v15 = vld [vmem:[%s13126_s3 + $0x168] sm:$0xff]  ;;  %v7590_v9 = vld [vmem:[%s13126_s3 + $0x178] sm:$0xff] }
 0x416   : > { %9719 = vmatprep.subr.bf16.mxu1 %v9718_v4 }
 0x418   : > { %9183 = vmatmul.mubr.f32.gmra.mrb[10].mxu1 %v12163_v56 }
 0x419   : > { %9185 = vmatprep.mubr.f32.mxu1 %v12168_v28 }
 0x41c   : > { %9186 = vmatmul.mubr.f32.gmra.mrb[12].mxu1 %v12176_v7 }
 0x41d   : > { %9188 = vmatprep.mubr.f32.mxu1 %v12181_v19 }
 0x420   : > { %9189 = vmatmul.mubr.f32.gmra.mrb[14].mxu1 %v12189_v52 }
 0x421   : > { %9191 = vmatprep.mubr.f32.mxu1 %v12194_v62 }
 0x424   : > { %9192 = vmatmul.mubr.f32.gmra.mrb[16].mxu1 %v12202_v20 }
 0x425   : > { %9194 = vmatprep.mubr.f32.mxu1 %v12207_v39 }
 0x428   : > { %9195 = vmatmul.mubr.f32.gmra.mrb[18].mxu1 %v12215_v32 }
 0x429   : > { %9197 = vmatprep.mubr.f32.mxu1 %v12220_v54 }
 0x42c   : > { %9198 = vmatmul.mubr.f32.gmra.mrb[20].mxu1 %v12228_v48 }
 0x42d   : > { %9200 = vmatprep.mubr.f32.mxu1 %v12233_v33 }
 0x430   : > { %9201 = vmatmul.mubr.f32.gmra.mrb[22].mxu1 %v12237_v1 }
 0x431   : > { %9203 = vmatprep.mubr.f32.mxu1 %v12325_v27 }
 0x434   : > { %9204 = vmatmul.mubr.f32.gmra.mrb[24].mxu1 %v12329_v3 }
 0x435   : > { %9238 = vmatprep.mubr.f32.mxu1 %v12019_v13  ;;  %v7581_v13 = vld [vmem:[%s13126_s3 + $0x130] sm:$0xff] }
 0x438   : > { %9239 = vmatmul.mubr.f32.vlgmr.msra.gmra.mrb[26].mxu1 %v12027_v10  ;;  %v9730_v10 = vpack.c.bf16 %v7582_v42, %v7581_v13 }
 0x439   : > { %9721 = vmatpush3.bf16.msra.mxu1 %v9718_v4  ;;  %9241 = vmatprep.mubr.f32.mxu1 %v12038_v16  ;;  %v7583_v16 = vld [vmem:[%s13126_s3 + $0x140] sm:$0xff]  ;;  %v7584_v4 = vld [vmem:[%s13126_s3 + $0x148] sm:$0xff] }
 0x43a   : > { %9723 = vmatprep.subr.bf16.mxu1 %v9722_v5 }
 0x43c   : > { %9242 = vmatmul.mubr.f32.gmra.mrb[28].mxu1 %v12046_v60  ;;  %v9734_v60 = vpack.c.bf16 %v7584_v4, %v7583_v16  ;;  %v7597_v16 = vld [vmem:[%s13126_s3 + $0x2b0] sm:$0xff]  ;;  %v7598_v4 = vld [vmem:[%s13126_s3 + $0x2b8] sm:$0xff] }
 0x43d   : > { %9244 = vmatprep.mubr.f32.mxu1 %v12057_v6  ;;  %9725 = vmatpush3.bf16.msra.mxu1 %v9722_v5  ;;  %v7585_v6 = vld [vmem:[%s13126_s3 + $0x150] sm:$0xff]  ;;  %v7592_v5 = vld [vmem:[%s13126_s3 + $0x288] sm:$0xff] }
 0x43e   : > { %9727 = vmatprep.subr.bf16.mxu1 %v9726_v38 }
 0x440   : > { %9245 = vmatmul.mubr.f32.gmra.mrb[30].mxu1 %v12065_v11  ;;  %v9738_v11 = vpack.c.bf16 %v7586_v18, %v7585_v6  ;;  %v10358_v6 = vld [vmem:[#allocation2 + $0x48] sm:$0xff] }
 0x441   : > { %9247 = vmatprep.mubr.f32.mxu1 %v12076_v47  ;;  %9729 = vmatpush3.bf16.msra.mxu1 %v9726_v38  ;;  %v7587_v47 = vld [vmem:[%s13126_s3 + $0x160] sm:$0xff]  ;;  %v10357_v38 = vld [vmem:[#allocation2 + $0x38] sm:$0xff]  ;;  %v5065_v18 = vrot.slane %v10358_v6, 2 }
 0x442   : > { %9731 = vmatprep.subr.bf16.mxu1 %v9730_v10  ;;  %v5061_v13 = vrot.slane %v10357_v38, 2  ;;  %v7605_v38 = vld [vmem:[%s13126_s3 + $0x2f0] sm:$0xff] }
 0x444   : > { %9248 = vmatmul.mubr.f32.gmra.mrb[0].mxu1 %v12086_v25  ;;  %v9742_v25 = vpack.c.bf16 %v7588_v15, %v7587_v47 }
 0x445   : > { %9250 = vmatprep.mubr.f32.mxu1 %v12099_v61  ;;  %9733 = vmatpush3.bf16.msra.mxu1 %v9730_v10  ;;  %v7589_v61 = vld [vmem:[%s13126_s3 + $0x170] sm:$0xff]  ;;  %v5063_v10 = vrot.slane %v12004_v2, 2  ;;  %v9762_v2 = vpack.c.bf16 %v7598_v4, %v7597_v16 }
 0x446   : > { %9735 = vmatprep.subr.bf16.mxu1 %v9734_v60  ;;  %v10367_v4 = vld [vmem:[#allocation2 + $0xb0] sm:$0xff] }
 0x447   : > { %v12459_v15 = vsel %vm2077_vm3, %v5061_v13, %v5063_v10  ;;  %v10366_v10 = vld [vmem:[#allocation2 + $0xa8] sm:$0xff]  ;;  %v5086_v6 = vrot.slane %v10367_v4, 2 }
 0x448   : > { %9251 = vmatmul.mubr.f32.gmra.mrb[2].mxu1 %v12109_v55  ;;  %v9746_v55 = vpack.c.bf16 %v7590_v9, %v7589_v61  ;;  %v7599_v61 = vld [vmem:[%s13126_s3 + $0x2c0] sm:$0xff]  ;;  %v7600_v9 = vld [vmem:[%s13126_s3 + $0x2c8] sm:$0xff]  ;;  %v5085_v16 = vrot.slane %v10366_v10, 2 }
 0x449   : > { %9253 = vmatprep.mubr.f32.mxu1 %v12122_v50  ;;  %9737 = vmatpush3.bf16.msra.mxu1 %v9734_v60  ;;  %v7591_v50 = vld [vmem:[%s13126_s3 + $0x280] sm:$0xff]  ;;  %v12455_v60 = vsel %vm2077_vm3, %v5060_v63, %v5061_v13  ;;  %v5083_v63 = vrot.slane %v12080_v23, 2  ;;  %v7606_v13 = vld [vmem:[%s13126_s3 + $0x2f8] sm:$0xff] }
 0x44a   : > { %9739 = vmatprep.subr.bf16.mxu1 %v9738_v11  ;;  %v9778_v23 = vpack.c.bf16 %v7606_v13, %v7605_v38  ;;  %v5108_v38 = vrot.slane %v12172_v44, 2  ;;  %v10376_v13 = vld [vmem:[#allocation2 + $0x120] sm:$0xff] }
 0x44b   : > { %v5110_v10 = vrot.slane %v10376_v13, 2 }
 0x44c   : > { %9254 = vmatmul.mubr.f32.gmra.mrb[4].mxu1 %v12134_v41  ;;  %v9750_v41 = vpack.c.bf16 %v7592_v5, %v7591_v50  ;;  %v10360_v50 = vld [vmem:[#allocation2 + $0x60] sm:$0xff] }
 0x44d   : > { %9256 = vmatprep.mubr.f32.mxu1 %v12141_v14  ;;  %9741 = vmatpush3.bf16.msra.mxu1 %v9738_v11  ;;  %v4769_v14 = vrot.slane %v11967_v26, 1  ;;  %v10359_v11 = vld [vmem:[#allocation2 + $0x50] sm:$0xff]  ;;  %v5070_v5 = vrot.slane %v10360_v50, 2  ;;  %v10369_v50 = vld [vmem:[#allocation2 + $0xc8] sm:$0xff] }
 0x44e   : > { %9743 = vmatprep.subr.bf16.mxu1 %v9742_v25  ;;  %v5066_v47 = vrot.slane %v10359_v11, 2  ;;  %v5088_v11 = vrot.slane %v12103_v43, 2 }
 0x450   : > { %9257 = vmatmul.mubr.f32.gmra.mrb[6].mxu1 %v12150_v31  ;;  %v12408_v31 = vld [vmem:[#allocation2 + $0x1a8] sm:$0x3] }
 0x451   : > { %9259 = vmatprep.mubr.f32.mxu1 %v12155_v37  ;;  %9745 = vmatpush3.bf16.msra.mxu1 %v9742_v25  ;;  %v4772_v37 = vrot.slane %v12408_v31, 1  ;;  %v5068_v25 = vrot.slane %v12023_v17, 2  ;;  %v9766_v17 = vpack.c.bf16 %v7600_v9, %v7599_v61  ;;  %v10368_v61 = vld [vmem:[#allocation2 + $0xc0] sm:$0xff] }
 0x452   : > { %9747 = vmatprep.subr.bf16.mxu1 %v9746_v55  ;;  %v5090_v9 = vrot.slane %v10368_v61, 2 }
 0x453   : > { %v4773_v26 = vsel %vm1126_vm2, %v11970_v29, %v4772_v37  ;;  %v12474_v37 = vsel %vm2077_vm3, %v5066_v47, %v5068_v25  ;;  %v12530_v25 = vsel %vm2077_vm3, %v5085_v16, %v5086_v6  ;;  %v10377_v16 = vld [vmem:[#allocation2 + $0x128] sm:$0xff] }
 0x454   : > { %9260 = vmatmul.mubr.f32.gmra.mrb[8].mxu1 %v12163_v56  ;;  %v5050_v56 = vrot.slane %v11804_v21, 2  ;;  %v7593_v21 = vld [vmem:[%s13126_s3 + $0x290] sm:$0xff]  ;;  %v5111_v4 = vrot.slane %v10377_v16, 2  ;;  %v7616_v16 = vld [vmem:[%s13126_s3 + $0x448] sm:$0xff] }
 0x455   : > { %9262 = vmatprep.mubr.f32.mxu1 %v12168_v28  ;;  %9749 = vmatpush3.bf16.msra.mxu1 %v9746_v55  ;;  %v10353_v28 = vld [vmem:[#allocation2 + $0x8] sm:$0xff]  ;;  %v12470_v55 = vsel %vm2077_vm3, %v5065_v18, %v5066_v47  ;;  %v7607_v47 = vld [vmem:[%s13126_s3 + $0x400] sm:$0xff] }
 0x456   : > { %9751 = vmatprep.subr.bf16.mxu1 %v9750_v41  ;;  %v12578_v44 = vsel %vm2077_vm3, %v5110_v10, %v5111_v4  ;;  %v7614_v10 = vld [vmem:[%s13126_s3 + $0x438] sm:$0xff] }
 0x458   : > { %9263 = vmatmul.mubr.f32.gmra.mrb[10].mxu1 %v12176_v7  ;;  %v12414_v7 = vrot.slane %v10353_v28, 2  ;;  %v7601_v28 = vld [vmem:[%s13126_s3 + $0x2d0] sm:$0xff] }
 0x459   : > { %9265 = vmatprep.mubr.f32.mxu1 %v12181_v19  ;;  %v4771_v19 = vsel %vm1126_vm2, %v4769_v14, %v11970_v29 }
 0x45c   : > { %9266 = vmatmul.mubr.f32.gmra.mrb[12].mxu1 %v12189_v52  ;;  %v5053_v52 = vrot.slane %v11972_v30, 2 }
 0x45d   : > { %9268 = vmatprep.mubr.f32.mxu1 %v12194_v62  ;;  %v5052_v62 = vsel %vm2077_vm3, %v5050_v56, %v12414_v7  ;;  %v5073_v56 = vrot.slane %v12042_v24, 2 }
 0x45e   : > { %v5054_v29 = vsel %vm2077_vm3, %v12414_v7, %v5053_v52  ;;  %v10362_v52 = vld [vmem:[#allocation2 + $0x78] sm:$0xff] }
 0x460   : > { %9269 = vmatmul.mubr.f32.gmra.mrb[14].mxu1 %v12202_v20  ;;  %v7594_v20 = vld [vmem:[%s13126_s3 + $0x298] sm:$0xff] }
 0x461   : > { %9271 = vmatprep.mubr.f32.mxu1 %v12207_v39  ;;  %v10354_v39 = vld [vmem:[#allocation2 + $0x18] sm:$0xff]  ;;  %v9754_v30 = vpack.c.bf16 %v7594_v20, %v7593_v21  ;;  %v10363_v21 = vld [vmem:[#allocation2 + $0x80] sm:$0xff] }
 0x462   : > { %v5076_v20 = vrot.slane %v10363_v21, 2  ;;  %v5098_v21 = vrot.slane %v12145_v40, 2 }
 0x464   : > { %9272 = vmatmul.mubr.f32.gmra.mrb[16].mxu1 %v12215_v32  ;;  %v5055_v32 = vrot.slane %v10354_v39, 2 }
 0x465   : > { %9274 = vmatprep.mubr.f32.mxu1 %v12220_v54  ;;  %v10355_v54 = vld [vmem:[#allocation2 + $0x20] sm:$0xff] }
 0x468   : > { %9275 = vmatmul.mubr.f32.gmra.mrb[18].mxu1 %v12228_v48  ;;  %v5056_v48 = vrot.slane %v10355_v54, 2  ;;  %v7603_v54 = vld [vmem:[%s13126_s3 + $0x2e0] sm:$0xff] }
 0x469   : > { %9277 = vmatprep.mubr.f32.mxu1 %v12233_v33  ;;  %v5058_v33 = vrot.slane %v11988_v35, 2 }
 0x46b   : > { %v12444_v42 = vsel %vm2077_vm3, %v5056_v48, %v5058_v33 }
 0x46c   : > { %9278 = vmatmul.mubr.f32.gmra.mrb[20].mxu1 %v12237_v1  ;;  %v7595_v1 = vld [vmem:[%s13126_s3 + $0x2a0] sm:$0xff] }
 0x46d   : > { %9280 = vmatprep.mubr.f32.mxu1 %v12325_v27  ;;  %v7596_v27 = vld [vmem:[%s13126_s3 + $0x2a8] sm:$0xff] }
 0x46e   : > { %v9758_v35 = vpack.c.bf16 %v7596_v27, %v7595_v1  ;;  %v10365_v1 = vld [vmem:[#allocation2 + $0x98] sm:$0xff] }
 0x46f   : > { %v5081_v27 = vrot.slane %v10365_v1, 2 }
 0x470   : > { %9281 = vmatmul.mubr.f32.gmra.mrb[22].mxu1 %v12329_v3  ;;  %v12440_v3 = vsel %vm2077_vm3, %v5055_v32, %v5056_v48  ;;  %v5078_v32 = vrot.slane %v12061_v36, 2  ;;  %v7604_v48 = vld [vmem:[%s13126_s3 + $0x2e8] sm:$0xff] }
 0x471   : > { %9283 = vmatprep.mubr.f32.mxu1 %v4771_v19  ;;  %v7602_v19 = vld [vmem:[%s13126_s3 + $0x2d8] sm:$0xff]  ;;  %v9774_v36 = vpack.c.bf16 %v7604_v48, %v7603_v54  ;;  %v12519_v18 = vsel %vm2077_vm3, %v5081_v27, %v5083_v63 }
 0x472   : > { %v9770_v24 = vpack.c.bf16 %v7602_v19, %v7601_v28  ;;  %v12504_v49 = vsel %vm2077_vm3, %v5076_v20, %v5078_v32  ;;  %v10371_v19 = vld [vmem:[#allocation2 + $0xe0] sm:$0xff]  ;;  %v10373_v32 = vld [vmem:[#allocation2 + $0xf8] sm:$0xff] }
 0x473   : > { %v5101_v54 = vrot.slane %v10373_v32, 2 }
 0x474   : > { %9284 = vmatmul.mubr.f32.gmra.mrb[24].mxu1 %v4773_v26 }
 0x475   : > { %9318 = vmatprep.mubr.f32.mxu1 %v5052_v62  ;;  %v5075_v62 = vrot.slane %v10362_v52, 2  ;;  %v5096_v52 = vrot.slane %v10371_v19, 2 }
 0x477   : > { %v12555_v48 = vsel %vm2077_vm3, %v5096_v52, %v5098_v21  ;;  %v10382_v21 = vld [vmem:[#allocation2 + $0x168] sm:$0xff] }
 0x478   : > { %9319 = vmatmul.mubr.f32.vlgmr.msra.gmra.mrb[26].mxu1 %v5054_v29  ;;  %v12500_v29 = vsel %vm2077_vm3, %v5075_v62, %v5076_v20  ;;  %v10372_v20 = vld [vmem:[#allocation2 + $0xf0] sm:$0xff] }
 0x479   : > { %9753 = vmatpush3.bf16.msra.mxu1 %v9750_v41  ;;  %9321 = vmatprep.mubr.f32.mxu1 %v12440_v3  ;;  %v10361_v41 = vld [vmem:[#allocation2 + $0x68] sm:$0xff] }
 0x47a   : > { %9755 = vmatprep.subr.bf16.mxu1 %v9754_v30  ;;  %v5071_v14 = vrot.slane %v10361_v41, 2  ;;  %v12536_v41 = vsel %vm2077_vm3, %v5086_v6, %v5088_v11  ;;  %v10378_v11 = vld [vmem:[#allocation2 + $0x138] sm:$0xff] }
 0x47c   : > { %9322 = vmatmul.mubr.f32.gmra.mrb[28].mxu1 %v12444_v42  ;;  %v12485_v26 = vsel %vm2077_vm3, %v5070_v5, %v5071_v14  ;;  %v12489_v39 = vsel %vm2077_vm3, %v5071_v14, %v5073_v56  ;;  %v5091_v5 = vrot.slane %v10369_v50, 2  ;;  %v5093_v14 = vrot.slane %v12126_v53, 2  ;;  %v10370_v56 = vld [vmem:[#allocation2 + $0xd8] sm:$0xff] }
 0x47d   : > { %9324 = vmatprep.mubr.f32.mxu1 %v12455_v60  ;;  %9757 = vmatpush3.bf16.msra.mxu1 %v9754_v30  ;;  %v10364_v30 = vld [vmem:[#allocation2 + $0x90] sm:$0xff]  ;;  %v5095_v28 = vrot.slane %v10370_v56, 2  ;;  %v5118_v50 = vrot.slane %v12198_v45, 2  ;;  %v10381_v56 = vld [vmem:[#allocation2 + $0x158] sm:$0xff] }
 0x47e   : > { %9759 = vmatprep.subr.bf16.mxu1 %v9758_v35  ;;  %v5080_v33 = vrot.slane %v10364_v30, 2  ;;  %v12546_v62 = vsel %vm2077_vm3, %v5091_v5, %v5093_v14  ;;  %v5103_v30 = vrot.slane %v12159_v12, 2 }
 0x47f   : > { %v12551_v53 = vsel %vm2077_vm3, %v5095_v28, %v5096_v52  ;;  %v5121_v28 = vrot.slane %v10381_v56, 2  ;;  %v5123_v52 = vrot.slane %v12211_v57, 2 }
 0x480   : > { %9325 = vmatmul.mubr.f32.gmra.mrb[30].mxu1 %v12459_v15  ;;  %v12564_v63 = vsel %vm2077_vm3, %v5101_v54, %v5103_v30  ;;  %v5128_v30 = vrot.slane %v12224_v22, 2 }
 0x481   : > { %9327 = vmatprep.mubr.f32.mxu1 %v12470_v55  ;;  %9761 = vmatpush3.bf16.msra.mxu1 %v9758_v35  ;;  %v12515_v35 = vsel %vm2077_vm3, %v5080_v33, %v5081_v27  ;;  %v10374_v33 = vld [vmem:[#allocation2 + $0x108] sm:$0xff]  ;;  %v10375_v27 = vld [vmem:[#allocation2 + $0x110] sm:$0xff] }
 0x482   : > { %9763 = vmatprep.subr.bf16.mxu1 %v9762_v2  ;;  %v5105_v1 = vrot.slane %v10374_v33, 2 }
 0x484   : > { %9328 = vmatmul.mubr.f32.gmra.mrb[0].mxu1 %v12474_v37 }
 0x485   : > { %9330 = vmatprep.mubr.f32.mxu1 %v12485_v26  ;;  %9765 = vmatpush3.bf16.msra.mxu1 %v9762_v2  ;;  %v7608_v2 = vld [vmem:[%s13126_s3 + $0x408] sm:$0xff] }
 0x486   : > { %9767 = vmatprep.subr.bf16.mxu1 %v9766_v17  ;;  %v12533_v43 = vpack.c.bf16 %v7608_v2, %v7607_v47  ;;  %v5115_v47 = vrot.slane %v10378_v11, 2  ;;  %v10379_v2 = vld [vmem:[#allocation2 + $0x140] sm:$0xff]  ;;  %v7618_v11 = vld [vmem:[%s13126_s3 + $0x458] sm:$0xff] }
 0x487   : > { %v5116_v61 = vrot.slane %v10379_v2, 2  ;;  %v7619_v2 = vld [vmem:[%s13126_s3 + $0x460] sm:$0xff] }
 0x488   : > { %9331 = vmatmul.mubr.f32.gmra.mrb[2].mxu1 %v12489_v39 }
 0x489   : > { %9333 = vmatprep.mubr.f32.mxu1 %v12500_v29  ;;  %9769 = vmatpush3.bf16.msra.mxu1 %v9766_v17  ;;  %v12541_v17 = vsel %vm2077_vm3, %v5090_v9, %v5091_v5  ;;  %v10380_v5 = vld [vmem:[#allocation2 + $0x150] sm:$0xff]  ;;  %v12591_v19 = vsel %vm2077_vm3, %v5116_v61, %v5118_v50 }
 0x48a   : > { %9771 = vmatprep.subr.bf16.mxu1 %v9770_v24  ;;  %v5120_v14 = vrot.slane %v10380_v5, 2  ;;  %v7621_v5 = vld [vmem:[%s13126_s3 + $0x470] sm:$0xff] }
 0x48c   : > { %9334 = vmatmul.mubr.f32.gmra.mrb[4].mxu1 %v12504_v49  ;;  %v12596_v45 = vsel %vm2077_vm3, %v5120_v14, %v5121_v28  ;;  %v7622_v14 = vld [vmem:[%s13126_s3 + $0x478] sm:$0xff] }
 0x48d   : > { %9336 = vmatprep.mubr.f32.mxu1 %v12515_v35  ;;  %9773 = vmatpush3.bf16.msra.mxu1 %v9770_v24  ;;  %v5100_v24 = vrot.slane %v10372_v20, 2  ;;  %v5125_v20 = vrot.slane %v10382_v21, 2  ;;  %v9810_v56 = vpack.c.bf16 %v7622_v14, %v7621_v5  ;;  %v10385_v21 = vld [vmem:[#allocation2 + $0x188] sm:$0xff] }
 0x48e   : > { %9775 = vmatprep.subr.bf16.mxu1 %v9774_v36 }
 0x48f   : > { %v12560_v40 = vsel %vm2077_vm3, %v5100_v24, %v5101_v54  ;;  %v10383_v24 = vld [vmem:[#allocation2 + $0x170] sm:$0xff]  ;;  %v12600_v54 = vsel %vm2077_vm3, %v5121_v28, %v5123_v52  ;;  %v10384_v28 = vld [vmem:[#allocation2 + $0x180] sm:$0xff] }
 0x490   : > { %9337 = vmatmul.mubr.f32.gmra.mrb[6].mxu1 %v12519_v18  ;;  %v5126_v32 = vrot.slane %v10383_v24, 2  ;;  %v5436_v52 = vrot.slane %v10384_v28, 2  ;;  %v5439_v24 = vrot.slane %v12319_v8, 2  ;;  %v10386_v8 = vld [vmem:[#allocation2 + $0x198] sm:$0xff] }
 0x491   : > { %9339 = vmatprep.mubr.f32.mxu1 %v12530_v25  ;;  %9777 = vmatpush3.bf16.msra.mxu1 %v9774_v36  ;;  %v5106_v36 = vrot.slane %v10375_v27, 2  ;;  %v7610_v27 = vld [vmem:[%s13126_s3 + $0x418] sm:$0xff] }
 0x492   : > { %9779 = vmatprep.subr.bf16.mxu1 %v9778_v23  ;;  %v12605_v57 = vsel %vm2077_vm3, %v5125_v20, %v5126_v32  ;;  %v12609_v33 = vsel %vm2077_vm3, %v5126_v32, %v5128_v30  ;;  %v5437_v20 = vrot.slane %v10385_v21, 2 }
 0x493   : > { %v12569_v12 = vsel %vm2077_vm3, %v5105_v1, %v5106_v36  ;;  %v12573_v6 = vsel %vm2077_vm3, %v5106_v36, %v5108_v38  ;;  %v7609_v1 = vld [vmem:[%s13126_s3 + $0x410] sm:$0xff]  ;;  %v7611_v36 = vld [vmem:[%s13126_s3 + $0x420] sm:$0xff]  ;;  %v7612_v38 = vld [vmem:[%s13126_s3 + $0x428] sm:$0xff] }
 0x494   : > { %9340 = vmatmul.mubr.f32.gmra.mrb[8].mxu1 %v12536_v41  ;;  %v9786_v22 = vpack.c.bf16 %v7610_v27, %v7609_v1  ;;  %v9790_v13 = vpack.c.bf16 %v7612_v38, %v7611_v36  ;;  %v5438_v32 = vsel %vm2077_vm3, %v5436_v52, %v5437_v20  ;;  %v5440_v30 = vsel %vm2077_vm3, %v5437_v20, %v5439_v24 }
 0x495   : > { %9342 = vmatprep.mubr.f32.mxu1 %v12541_v17  ;;  %9781 = vmatpush3.bf16.msra.mxu1 %v9778_v23  ;;  %v5113_v23 = vrot.slane %v12185_v34, 2  ;;  %v12587_v34 = vsel %vm2077_vm3, %v5115_v47, %v5116_v61  ;;  %v7620_v61 = vld [vmem:[%s13126_s3 + $0x468] sm:$0xff] }
 0x496   : > { %9783 = vmatprep.subr.bf16.mxu1 %v12533_v43  ;;  %v9806_v50 = vpack.c.bf16 %v7620_v61, %v7619_v2 }
 0x497   : > { %v12582_v9 = vsel %vm2077_vm3, %v5111_v4, %v5113_v23  ;;  %v7617_v23 = vld [vmem:[%s13126_s3 + $0x450] sm:$0xff] }
 0x498   : > { %9343 = vmatmul.mubr.f32.gmra.mrb[10].mxu1 %v12546_v62  ;;  %v9802_v47 = vpack.c.bf16 %v7618_v11, %v7617_v23 }
 0x499   : > { %9345 = vmatprep.mubr.f32.mxu1 %v12551_v53 }
 0x49c   : > { %9346 = vmatmul.mubr.f32.gmra.mrb[12].mxu1 %v12555_v48 }
 0x49d   : > { %9348 = vmatprep.mubr.f32.mxu1 %v12560_v40 }
 0x4a0   : > { %9349 = vmatmul.mubr.f32.gmra.mrb[14].mxu1 %v12564_v63 }
 0x4a1   : > { %9351 = vmatprep.mubr.f32.mxu1 %v12569_v12 }
 0x4a4   : > { %9352 = vmatmul.mubr.f32.gmra.mrb[16].mxu1 %v12573_v6 }
 0x4a5   : > { %9354 = vmatprep.mubr.f32.mxu1 %v12578_v44 }
 0x4a8   : > { %9355 = vmatmul.mubr.f32.gmra.mrb[18].mxu1 %v12582_v9 }
 0x4a9   : > { %9357 = vmatprep.mubr.f32.mxu1 %v12587_v34 }
 0x4ac   : > { %9358 = vmatmul.mubr.f32.gmra.mrb[20].mxu1 %v12591_v19 }
 0x4ad   : > { %9360 = vmatprep.mubr.f32.mxu1 %v12596_v45 }
 0x4b0   : > { %9361 = vmatmul.mubr.f32.gmra.mrb[22].mxu1 %v12600_v54 }
 0x4b1   : > { %9363 = vmatprep.mubr.f32.mxu1 %v12605_v57 }
 0x4b4   : > { %9364 = vmatmul.mubr.f32.gmra.mrb[24].mxu1 %v12609_v33 }
 0x4b5   : > { %9398 = vmatprep.mubr.f32.mxu1 %v12440_v3  ;;  %v7613_v3 = vld [vmem:[%s13126_s3 + $0x430] sm:$0xff] }
 0x4b8   : > { %9399 = vmatmul.mubr.f32.vlgmr.msra.gmra.mrb[26].mxu1 %v12444_v42  ;;  %v9794_v42 = vpack.c.bf16 %v7614_v10, %v7613_v3 }
 0x4b9   : > { %9785 = vmatpush3.bf16.msra.mxu1 %v12533_v43  ;;  %9401 = vmatprep.mubr.f32.mxu1 %v12455_v60  ;;  %v7615_v43 = vld [vmem:[%s13126_s3 + $0x440] sm:$0xff] }
 0x4ba   : > { %9787 = vmatprep.subr.bf16.mxu1 %v9786_v22  ;;  %v9798_v4 = vpack.c.bf16 %v7616_v16, %v7615_v43 }
 0x4bc   : > { %9402 = vmatmul.mubr.f32.gmra.mrb[28].mxu1 %v12459_v15 }
 0x4bd   : > { %9404 = vmatprep.mubr.f32.mxu1 %v12470_v55  ;;  %9789 = vmatpush3.bf16.msra.mxu1 %v9786_v22 }
 0x4be   : > { %9791 = vmatprep.subr.bf16.mxu1 %v9790_v13 }
 0x4c0   : > { %9405 = vmatmul.mubr.f32.gmra.mrb[30].mxu1 %v12474_v37 }
 0x4c1   : > { %9407 = vmatprep.mubr.f32.mxu1 %v12485_v26  ;;  %9793 = vmatpush3.bf16.msra.mxu1 %v9790_v13 }
 0x4c2   : > { %9795 = vmatprep.subr.bf16.mxu1 %v9794_v42 }
 0x4c4   : > { %9408 = vmatmul.mubr.f32.gmra.mrb[0].mxu1 %v12489_v39 }
 0x4c5   : > { %9410 = vmatprep.mubr.f32.mxu1 %v12500_v29  ;;  %9797 = vmatpush3.bf16.msra.mxu1 %v9794_v42 }
 0x4c6   : > { %9799 = vmatprep.subr.bf16.mxu1 %v9798_v4 }
 0x4c8   : > { %9411 = vmatmul.mubr.f32.gmra.mrb[2].mxu1 %v12504_v49 }
 0x4c9   : > { %9413 = vmatprep.mubr.f32.mxu1 %v12515_v35  ;;  %9801 = vmatpush3.bf16.msra.mxu1 %v9798_v4 }
 0x4ca   : > { %9803 = vmatprep.subr.bf16.mxu1 %v9802_v47 }
 0x4cc   : > { %9414 = vmatmul.mubr.f32.gmra.mrb[4].mxu1 %v12519_v18 }
 0x4cd   : > { %9416 = vmatprep.mubr.f32.mxu1 %v12530_v25  ;;  %9805 = vmatpush3.bf16.msra.mxu1 %v9802_v47 }
 0x4ce   : > { %9807 = vmatprep.subr.bf16.mxu1 %v9806_v50 }
 0x4d0   : > { %9417 = vmatmul.mubr.f32.gmra.mrb[6].mxu1 %v12536_v41 }
 0x4d1   : > { %9419 = vmatprep.mubr.f32.mxu1 %v12541_v17  ;;  %9809 = vmatpush3.bf16.msra.mxu1 %v9806_v50 }
 0x4d2   : > { %9811 = vmatprep.subr.bf16.mxu1 %v9810_v56 }
 0x4d4   : > { %9420 = vmatmul.mubr.f32.gmra.mrb[8].mxu1 %v12546_v62 }
 0x4d5   : > { %9422 = vmatprep.mubr.f32.mxu1 %v12551_v53  ;;  %9813 = vmatpush3.bf16.msra.mxu1 %v9810_v56 }
 0x4d8   : > { %9423 = vmatmul.mubr.f32.gmra.mrb[10].mxu1 %v12555_v48 }
 0x4d9   : > { %9425 = vmatprep.mubr.f32.mxu1 %v12560_v40 }
 0x4dc   : > { %9426 = vmatmul.mubr.f32.gmra.mrb[12].mxu1 %v12564_v63 }
 0x4dd   : > { %9428 = vmatprep.mubr.f32.mxu1 %v12569_v12 }
 0x4e0   : > { %9429 = vmatmul.mubr.f32.gmra.mrb[14].mxu1 %v12573_v6 }
 0x4e1   : > { %9431 = vmatprep.mubr.f32.mxu1 %v12578_v44 }
 0x4e4   : > { %9432 = vmatmul.mubr.f32.gmra.mrb[16].mxu1 %v12582_v9 }
 0x4e5   : > { %9434 = vmatprep.mubr.f32.mxu1 %v12587_v34 }
 0x4e8   : > { %9435 = vmatmul.mubr.f32.gmra.mrb[18].mxu1 %v12591_v19 }
 0x4e9   : > { %9437 = vmatprep.mubr.f32.mxu1 %v12596_v45 }
 0x4ec   : > { %9438 = vmatmul.mubr.f32.gmra.mrb[20].mxu1 %v12600_v54 }
 0x4ed   : > { %9440 = vmatprep.mubr.f32.mxu1 %v12605_v57 }
 0x4f0   : > { %9441 = vmatmul.mubr.f32.gmra.mrb[22].mxu1 %v12609_v33 }
 0x4f1   : > { %9443 = vmatprep.mubr.f32.mxu1 %v5438_v32 }
 0x4f4   : > { %9444 = vmatmul.mubr.f32.gmra.mrb[24].mxu1 %v5440_v30 }
 0x4f5   : > { %9478 = vmatprep.mubr.f32.mxu1 %v12455_v60  ;;  %v5717_v60 = vrot.slane %v10386_v8, 2 }
 0x4f8   : > { %9479 = vmatmul.mubr.f32.vlgmr.msra.gmra.mrb[26].mxu1 %v12459_v15  ;;  %v5720_v15 = vrot.slane %v12408_v31, 2 }
 0x4f9   : > { %9481 = vmatprep.mubr.f32.mxu1 %v12470_v55  ;;  %v5719_v55 = vsel %vm2077_vm3, %v5717_v60, %v12414_v7 }
 0x4fc   : > { %9482 = vmatmul.mubr.f32.gmra.mrb[28].mxu1 %v12474_v37  ;;  %v5721_v37 = vsel %vm2077_vm3, %v12414_v7, %v5720_v15 }
 0x4fd   : > { %9484 = vmatprep.mubr.f32.mxu1 %v12485_v26 }
 0x500   : > { %9485 = vmatmul.mubr.f32.gmra.mrb[30].mxu1 %v12489_v39  ;;  %v12724_v39 = vld [vmem:[%s13127_s4] ss:$0 sm:$0xff] }
 0x501   : > { %9487 = vmatprep.mubr.f32.mxu1 %v12500_v29 }
 0x504   : > { %9488 = vmatmul.mubr.f32.gmra.mrb[0].mxu1 %v12504_v49 }
 0x505   : > { %9490 = vmatprep.mubr.f32.mxu1 %v12515_v35 }
 0x508   : > { %9491 = vmatmul.mubr.f32.gmra.mrb[2].mxu1 %v12519_v18  ;;  %v10397_v18 = vmov 1983009808  }
 0x509   : > { %9493 = vmatprep.mubr.f32.mxu1 %v12530_v25  ;;  %v6200_v25 = vunpack.c.l.s4 %v10397_v18 }
 0x50c   : > { %9494 = vmatmul.mubr.f32.gmra.mrb[4].mxu1 %v12536_v41  ;;  %v6202_v41 = vlaneseq }
 0x50d   : > { %9496 = vmatprep.mubr.f32.mxu1 %v12541_v17 }
 0x510   : > { %9497 = vmatmul.mubr.f32.gmra.mrb[6].mxu1 %v12546_v62 }
 0x511   : > { %9499 = vmatprep.mubr.f32.mxu1 %v12551_v53 }
 0x514   : > { %9500 = vmatmul.mubr.f32.gmra.mrb[8].mxu1 %v12555_v48 }
 0x515   : > { %9502 = vmatprep.mubr.f32.mxu1 %v12560_v40 }
 0x518   : > { %9503 = vmatmul.mubr.f32.gmra.mrb[10].mxu1 %v12564_v63 }
 0x519   : > { %9505 = vmatprep.mubr.f32.mxu1 %v12569_v12  ;;  %v6203_v12 = vshrl.u32 %v6202_v41, 7 }
 0x51c   : > { %9506 = vmatmul.mubr.f32.gmra.mrb[12].mxu1 %v12573_v6 }
 0x51d   : > { %9508 = vmatprep.mubr.f32.mxu1 %v12578_v44 }
 0x520   : > { %9509 = vmatmul.mubr.f32.gmra.mrb[14].mxu1 %v12582_v9 }
 0x521   : > { %9511 = vmatprep.mubr.f32.mxu1 %v12587_v34 }
 0x524   : > { %9512 = vmatmul.mubr.f32.gmra.mrb[16].mxu1 %v12591_v19 }
 0x525   : > { %9514 = vmatprep.mubr.f32.mxu1 %v12596_v45 }
 0x528   : > { %9515 = vmatmul.mubr.f32.gmra.mrb[18].mxu1 %v12600_v54 }
 0x529   : > { %9517 = vmatprep.mubr.f32.mxu1 %v12605_v57  ;;  %v13202_v57 = vld [vmem:[#allocation3_spill] sm:$0xff] }
 0x52c   : > { %9518 = vmatmul.mubr.f32.gmra.mrb[20].mxu1 %v12609_v33 }
 0x52d   : > { %9520 = vmatprep.mubr.f32.mxu1 %v5438_v32 }
 0x530   : > { %9521 = vmatmul.mubr.f32.gmra.mrb[22].mxu1 %v5440_v30 }
 0x531   : > { %9523 = vmatprep.mubr.f32.mxu1 %v5719_v55 }
 0x534   : > { %9524 = vmatmul.mubr.f32.gmra.mrb[24].mxu1 %v5721_v37 }
 0x5cb   : > { %v9480_v26 = vpop.f32.mrb[26].mxu1 }
 0x5cc   : > { %v9830_v29 = vadd.f32 %v9480_v26, %v12083_v51  ;;  %v5807_v49 = vpop.f32.mrb[27].mxu1 }
 0x5cd   : > { %v9831_v31 = vadd.f32 %v5807_v49, %v12095_v0  ;;  %v6201_v0 = vunpack.c.0.s8 %v6200_v25 }
 0x5ce   : > { %v6006_v35 = vadd.f32 %v9830_v29, %v12724_v39 }
 0x5cf   : > { %v6005_v17 = vadd.f32 %v9831_v31, %v12724_v39  ;;  %v9483_v7 = vpop.f32.mrb[28].mxu1  ;;  %v12737_v27 = vsub.s32 %v6201_v0, %v6203_v12 }
 0x5d0   : > { %vm6038_vm2 = vcmp.gt.f32.partialorder %v6006_v35, 0.0  ;;  %v6070_v62 = vmul.f32 0.01, %v6006_v35  ;;  %v9832_v53 = vadd.f32 %v9483_v7, %v12106_v58  ;;  %v5817_v48 = vpop.f32.mrb[29].mxu1 }
 0x5d1   : > { %vm6037_vm3 = vcmp.gt.f32.partialorder %v6005_v17, 0.0  ;;  %v6069_v40 = vmul.f32 0.01, %v6005_v17  ;;  %v9833_v51 = vadd.f32 %v5817_v48, %v12118_v59 }
 0x5d2   : > { %v6008_v63 = vadd.f32 %v9832_v53, %v12724_v39  ;;  %v6102_v6 = vsel %vm6038_vm2, %v6006_v35, %v6070_v62 }
 0x5d3   : > { %v6007_v44 = vadd.f32 %v9833_v51, %v12724_v39  ;;  %v9486_v9 = vpop.f32.mrb[30].mxu1  ;;  %v6101_v34 = vsel %vm6037_vm3, %v6005_v17, %v6069_v40  ;;  %v6137_v59 = vsel %vm6133_vm8, %v6102_v6, -inf }
 0x5d4   : > { %vm6040_vm9 = vcmp.gt.f32.partialorder %v6008_v63, 0.0  ;;  %v6072_v19 = vmul.f32 0.01, %v6008_v63  ;;  %v9834_v45 = vadd.f32 %v9486_v9, %v12131_v46  ;;  %v5827_v58 = vpop.f32.mrb[31].mxu1  ;;  %v6134_v36 = vsel %vm6133_vm8, %v6101_v34, -inf }
 0x5d5   : > { %vm6039_vm10 = vcmp.gt.f32.partialorder %v6007_v44, 0.0  ;;  %v6071_v54 = vmul.f32 0.01, %v6007_v44  ;;  %v9835_v33 = vadd.f32 %v5827_v58, %v13202_v57 }
 0x5d6   : > { %v6104_v1 = vsel %vm6040_vm9, %v6008_v63, %v6072_v19  ;;  %v6010_v22 = vadd.f32 %v9834_v45, %v12724_v39 }
 0x5d7   : > { %v6138_v38 = vsel %vm6133_vm8, %v6104_v1, -inf  ;;  %v6103_v13 = vsel %vm6039_vm10, %v6007_v44, %v6071_v54  ;;  %v12743_v3 = vadd.f32 %v9835_v33, %v12724_v39  ;;  %v9489_v46 = vpop.f32.mrb[0].mxu1 }
 0x5d8   : > { %v6139_v10 = vmax.f32 %v6137_v59, %v6138_v38  ;;  %v6135_v42 = vsel %vm6133_vm8, %v6103_v13, -inf  ;;  %vm6042_vm11 = vcmp.gt.f32.partialorder %v6010_v22, 0.0  ;;  %v6074_v43 = vmul.f32 0.01, %v6010_v22  ;;  %v12746_v16 = vpop.f32.mrb[1].mxu1 }
 0x5d9   : > { %v6136_v4 = vmax.f32 %v6134_v36, %v6135_v42  ;;  %v12749_v23 = vadd.f32 %v9489_v46, %v12724_v39  ;;  %v6073_v5 = vmul.f32 0.01, %v12743_v3  ;;  %vm6041_vm13 = vcmp.gt.f32.partialorder %v12743_v3, 0.0 }
 0x5da   : > { %v6215_v11 = vcombine.high %v6139_v10, %v6139_v10  ;;  %v6222_v47 = vrot.slane %v6139_v10, %v12737_v27  ;;  %v12753_v50 = vsel %vm6042_vm11, %v6010_v22, %v6074_v43 }
 0x5db   : > { %v6198_v2 = vcombine.high %v6136_v4, %v6136_v4  ;;  %v6205_v61 = vrot.slane %v6136_v4, %v12737_v27  ;;  %v12756_v14 = vpop.f32.mrb[2].mxu1  ;;  %v12762_v21 = vmul.f32 0.01, %v12749_v23  ;;  %vm6044_vm14 = vcmp.gt.f32.partialorder %v12749_v23, 0.0 }
 0x5dc   : > { %v6229_v56 = vrot.slane %v6215_v11, %v12737_v27  ;;  %v6230_v28 = vcombine.high %v6222_v47, %v6222_v47  ;;  %v6563_v52 = vsel %vm6534_vm12, %v6222_v47, -inf  ;;  %v12764_v20 = vpop.f32.mrb[3].mxu1  ;;  %v6105_v4 = vsel %vm6041_vm13, %v12743_v3, %v6073_v5 }
 0x5dd   : > { %v6564_v24 = vrot.slane %v6563_v52, 4  ;;  %v6212_v32 = vrot.slane %v6198_v2, %v12737_v27  ;;  %v6213_v30 = vcombine.high %v6205_v61, %v6205_v61  ;;  %v6535_v8 = vsel %vm6534_vm12, %v6205_v61, -inf }
 0x5de   : > { %v6231_v60 = vcombine.high %v6229_v56, %v6229_v56  ;;  %v6570_v15 = vsel %vm6534_vm12, %v6230_v28, -inf  ;;  %v6577_v55 = vsel %vm6534_vm12, %v6229_v56, -inf  ;;  %v6536_v37 = vrot.slane %v6535_v8, 4 }
 0x5df   : > { %v6565_v26 = vmax.f32 %v6563_v52, %v6564_v24  ;;  %v6571_v29 = vrot.slane %v6570_v15, 4  ;;  %v6578_v49 = vrot.slane %v6577_v55, 4  ;;  %v6214_v31 = vcombine.high %v6212_v32, %v6212_v32  ;;  %v12771_v35 = vpop.f32.mrb[4].mxu1 }
 0x5e0   : > { %v6584_v18 = vsel %vm6534_vm12, %v6231_v60, -inf  ;;  %v6537_v25 = vmax.f32 %v6535_v8, %v6536_v37  ;;  %v6542_v41 = vsel %vm6534_vm12, %v6213_v30, -inf  ;;  %v6549_v17 = vsel %vm6534_vm12, %v6212_v32, -inf  ;;  %v12776_v7 = vpop.f32.mrb[5].mxu1 }
 0x5e1   : > { %v6566_v62 = vrot.slane %v6565_v26, 2  ;;  %v6572_v53 = vmax.f32 %v6570_v15, %v6571_v29  ;;  %v6579_v48 = vmax.f32 %v6577_v55, %v6578_v49  ;;  %v6585_v40 = vrot.slane %v6584_v18, 4 }
 0x5e2   : > { %v6538_v51 = vrot.slane %v6537_v25, 2  ;;  %v6543_v63 = vrot.slane %v6542_v41, 4  ;;  %v6550_v0 = vrot.slane %v6549_v17, 4  ;;  %v6556_v12 = vsel %vm6534_vm12, %v6214_v31, -inf }
 0x5e3   : > { %v6567_v6 = vmax.f32 %v6565_v26, %v6566_v62  ;;  %v6573_v44 = vrot.slane %v6572_v53, 2  ;;  %v6580_v9 = vrot.slane %v6579_v48, 2  ;;  %v6586_v34 = vmax.f32 %v6584_v18, %v6585_v40  ;;  %v12779_v19 = vpop.f32.mrb[6].mxu1 }
 0x5e4   : > { %v6539_v45 = vmax.f32 %v6537_v25, %v6538_v51  ;;  %v6544_v58 = vmax.f32 %v6542_v41, %v6543_v63  ;;  %v6551_v54 = vmax.f32 %v6549_v17, %v6550_v0  ;;  %v6557_v57 = vrot.slane %v6556_v12, 4  ;;  %v12781_v33 = vpop.f32.mrb[7].mxu1 }
 0x5e5   : > { %v6568_v59 = vrot.slane %v6567_v6, 1  ;;  %v6574_v1 = vmax.f32 %v6572_v53, %v6573_v44  ;;  %v6581_v22 = vmax.f32 %v6579_v48, %v6580_v9  ;;  %v6587_v36 = vrot.slane %v6586_v34, 2 }
 0x5e6   : > { %v6540_v38 = vrot.slane %v6539_v45, 1  ;;  %v6545_v13 = vrot.slane %v6544_v58, 2  ;;  %v6552_v46 = vrot.slane %v6551_v54, 2  ;;  %v6558_v10 = vmax.f32 %v6556_v12, %v6557_v57 }
 0x5e7   : > { %v6575_v42 = vrot.slane %v6574_v1, 1  ;;  %v6588_v43 = vmax.f32 %v6586_v34, %v6587_v36  ;;  %v6011_v11 = vadd.f32 %v12724_v39, %v12746_v16  ;;  %v12788_v47 = vpop.f32.mrb[8].mxu1  ;;  %v6569_v2 = vmax.f32 %v6567_v6, %v6568_v59 }
 0x5e8   : > { %v6546_v61 = vmax.f32 %v6544_v58, %v6545_v13  ;;  %v6553_v56 = vmax.f32 %v6551_v54, %v6552_v46  ;;  %v6559_v28 = vrot.slane %v6558_v10, 2  ;;  %v12790_v52 = vpop.f32.mrb[9].mxu1  ;;  %v6582_v24 = vrot.slane %v6581_v22, 1 }
 0x5e9   : > { %v6589_v32 = vrot.slane %v6588_v43, 1  ;;  %v6541_v30 = vmax.f32 %v6539_v45, %v6540_v38  ;;  %v6108_v3 = vsel %vm6044_vm14, %v12749_v23, %v12762_v21  ;;  %v6576_v5 = vmax.f32 %v6574_v1, %v6575_v42 }
 0x5ea   : > { %v6547_v16 = vrot.slane %v6546_v61, 1  ;;  %v6554_v8 = vrot.slane %v6553_v56, 1  ;;  %v6560_v60 = vmax.f32 %v6558_v10, %v6559_v28  ;;  %v6143_v15 = vsel %vm6133_vm8, %v12753_v50, -inf }
 0x5eb   : > { %v6144_v55 = vsel %vm6133_vm8, %v6108_v3, -inf  ;;  %vm6043_vm2 = vcmp.gt.f32.partialorder %v6011_v11, 0.0  ;;  %v6075_v37 = vmul.f32 0.01, %v6011_v11  ;;  %v12799_v26 = vpop.f32.mrb[10].mxu1  ;;  %v6583_v23 = vmax.f32 %v6581_v22, %v6582_v24 }
 0x5ec   : > { %v6548_v29 = vmax.f32 %v6546_v61, %v6547_v16  ;;  %v6555_v49 = vmax.f32 %v6553_v56, %v6554_v8  ;;  %v6561_v31 = vrot.slane %v6560_v60, 1  ;;  %v6145_v18 = vmax.f32 %v6143_v15, %v6144_v55  ;;  %v12801_v25 = vpop.f32.mrb[11].mxu1 }
 0x5ed   : > { %v6590_v21 = vmax.f32 %v6588_v43, %v6589_v32  ;;  %v6107_v41 = vsel %vm6043_vm2, %v6011_v11, %v6075_v37  ;;  %v6014_v17 = vadd.f32 %v12756_v14, %v12724_v39  ;;  %v6140_v51 = vsel %vm6133_vm8, %v6105_v4, -inf }
 0x5ee   : > { %v6562_v50 = vmax.f32 %v6560_v60, %v6561_v31  ;;  %v7048_v62 = vsel %vm7047_vm15, %v6548_v29, %v6541_v30  ;;  %v6249_v53 = vcombine.high %v6145_v18, %v6145_v18  ;;  %v6256_v48 = vrot.slane %v6145_v18, %v12737_v27 }
 0x5ef   : > { %v7050_v40 = vsel %vm7049_vm0, %v6555_v49, %v7048_v62  ;;  %v6141_v63 = vsel %vm6133_vm8, %v6107_v41, -inf  ;;  %vm6046_vm3 = vcmp.gt.f32.partialorder %v6014_v17, 0.0  ;;  %v12811_v0 = vpop.f32.mrb[12].mxu1  ;;  %v6078_v54 = vmul.f32 0.01, %v6014_v17 }
 0x5f0   : > { %v7052_v12 = vsel %vm7051_vm1, %v6562_v50, %v7050_v40  ;;  %v6263_v14 = vrot.slane %v6249_v53, %v12737_v27  ;;  %v6264_v6 = vcombine.high %v6256_v48, %v6256_v48  ;;  %v6619_v44 = vsel %vm6534_vm12, %v6256_v48, -inf  ;;  %v12816_v9 = vpop.f32.mrb[13].mxu1 }
 0x5f1   : > { %v7054_v34 = vsel %vm7053_vm4, %v6569_v2, %v7052_v12  ;;  %v6620_v45 = vrot.slane %v6619_v44, 4  ;;  %v6142_v58 = vmax.f32 %v6140_v51, %v6141_v63 }
 0x5f2   : > { %v7056_v57 = vsel %vm7055_vm5, %v6576_v5, %v7054_v34  ;;  %v6265_v59 = vcombine.high %v6263_v14, %v6263_v14  ;;  %v6626_v1 = vsel %vm6534_vm12, %v6264_v6, -inf  ;;  %v6633_v22 = vsel %vm6534_vm12, %v6263_v14, -inf }
 0x5f3   : > { %v7058_v36 = vsel %vm7057_vm6, %v6583_v23, %v7056_v57  ;;  %v6621_v38 = vmax.f32 %v6619_v44, %v6620_v45  ;;  %v6627_v13 = vrot.slane %v6626_v1, 4  ;;  %v6634_v46 = vrot.slane %v6633_v22, 4  ;;  %v12828_v10 = vpop.f32.mrb[14].mxu1 }
 0x5f4   : > { %v7060_v42 = vsel %vm7059_vm7, %v6590_v21, %v7058_v36  ;;  %v6640_v43 = vsel %vm6534_vm12, %v6265_v59, -inf  ;;  %v6232_v4 = vcombine.high %v6142_v58, %v6142_v58  ;;  %v6239_v11 = vrot.slane %v6142_v58, %v12737_v27  ;;  %v12833_v2 = vpop.f32.mrb[15].mxu1 }
 0x5f5   : > { %7118 = vst.msk [vmem:[%s12822_s12] sm:$0xff] %vm6133_vm8, %v7060_v42  ;;  %v6622_v61 = vrot.slane %v6621_v38, 2  ;;  %v6628_v56 = vmax.f32 %v6626_v1, %v6627_v13  ;;  %v6635_v28 = vmax.f32 %v6633_v22, %v6634_v46  ;;  %v6641_v24 = vrot.slane %v6640_v43, 4 }
 0x5f6   : > { %v6246_v32 = vrot.slane %v6232_v4, %v12737_v27  ;;  %v6247_v30 = vcombine.high %v6239_v11, %v6239_v11  ;;  %v6591_v3 = vsel %vm6534_vm12, %v6239_v11, -inf  ;;  %v6110_v5 = vsel %vm6046_vm3, %v6014_v17, %v6078_v54 }
 0x5f7   : > { %v6623_v16 = vmax.f32 %v6621_v38, %v6622_v61  ;;  %v6629_v8 = vrot.slane %v6628_v56, 2  ;;  %v6636_v60 = vrot.slane %v6635_v28, 2  ;;  %v6642_v15 = vmax.f32 %v6640_v43, %v6641_v24  ;;  %v12840_v55 = vpop.f32.mrb[16].mxu1 }
 0x5f8   : > { %v6248_v37 = vcombine.high %v6246_v32, %v6246_v32  ;;  %v6592_v29 = vrot.slane %v6591_v3, 4  ;;  %v6598_v49 = vsel %vm6534_vm12, %v6247_v30, -inf  ;;  %v6605_v31 = vsel %vm6534_vm12, %v6246_v32, -inf  ;;  %v12844_v18 = vpop.f32.mrb[17].mxu1 }
 0x5f9   : > { %v6624_v23 = vrot.slane %v6623_v16, 1  ;;  %v6630_v21 = vmax.f32 %v6628_v56, %v6629_v8  ;;  %v6643_v41 = vrot.slane %v6642_v15, 2  ;;  %v6013_v17 = vadd.f32 %v12724_v39, %v12764_v20 }
 0x5fa   : > { %v6593_v50 = vmax.f32 %v6591_v3, %v6592_v29  ;;  %v6599_v62 = vrot.slane %v6598_v49, 4  ;;  %v6606_v53 = vrot.slane %v6605_v31, 4  ;;  %v6612_v48 = vsel %vm6534_vm12, %v6248_v37, -inf }
 0x5fb   : > { %v6637_v40 = vmax.f32 %v6635_v28, %v6636_v60  ;;  %v6149_v51 = vsel %vm6133_vm8, %v6110_v5, -inf  ;;  %v12850_v63 = vpop.f32.mrb[18].mxu1  ;;  %v6613_v44 = vrot.slane %v6612_v48, 4  ;;  %v6625_v45 = vmax.f32 %v6623_v16, %v6624_v23 }
 0x5fc   : > { %v6594_v12 = vrot.slane %v6593_v50, 2  ;;  %v6600_v14 = vmax.f32 %v6598_v49, %v6599_v62  ;;  %v6607_v6 = vmax.f32 %v6605_v31, %v6606_v53  ;;  %v12852_v34 = vpop.f32.mrb[19].mxu1  ;;  %v6631_v58 = vrot.slane %v6630_v21, 1 }
 0x5fd   : > { %v6644_v54 = vmax.f32 %v6642_v15, %v6643_v41  ;;  %vm6045_vm9 = vcmp.gt.f32.partialorder %v6013_v17, 0.0  ;;  %v6614_v1 = vmax.f32 %v6612_v48, %v6613_v44  ;;  %v6638_v22 = vrot.slane %v6637_v40, 1 }
 0x5fe   : > { %v6595_v20 = vmax.f32 %v6593_v50, %v6594_v12  ;;  %v6601_v57 = vrot.slane %v6600_v14, 2  ;;  %v6608_v59 = vrot.slane %v6607_v6, 2  ;;  %v6077_v36 = vmul.f32 0.01, %v6013_v17 }
 0x5ff   : > { %v6016_v38 = vadd.f32 %v12771_v35, %v12724_v39  ;;  %v6015_v13 = vadd.f32 %v12724_v39, %v12776_v7  ;;  %v12858_v46 = vpop.f32.mrb[20].mxu1  ;;  %v6615_v11 = vrot.slane %v6614_v1, 2  ;;  %v6645_v56 = vrot.slane %v6644_v54, 1 }
 0x600   : > { %v6596_v42 = vrot.slane %v6595_v20, 1  ;;  %v6602_v43 = vmax.f32 %v6600_v14, %v6601_v57  ;;  %v6609_v4 = vmax.f32 %v6607_v6, %v6608_v59  ;;  %v12860_v61 = vpop.f32.mrb[21].mxu1  ;;  %v6109_v28 = vsel %vm6045_vm9, %v6013_v17, %v6077_v36 }
 0x601   : > { %vm6048_vm10 = vcmp.gt.f32.partialorder %v6016_v38, 0.0  ;;  %v6080_v24 = vmul.f32 0.01, %v6016_v38  ;;  %v6616_v3 = vmax.f32 %v6614_v1, %v6615_v11  ;;  %vm6047_vm11 = vcmp.gt.f32.partialorder %v6015_v13, 0.0 }
 0x602   : > { %v6603_v32 = vrot.slane %v6602_v43, 1  ;;  %v6610_v30 = vrot.slane %v6609_v4, 1  ;;  %v6597_v35 = vmax.f32 %v6595_v20, %v6596_v42  ;;  %v6079_v7 = vmul.f32 0.01, %v6015_v13 }
 0x603   : > { %v6112_v5 = vsel %vm6048_vm10, %v6016_v38, %v6080_v24  ;;  %v12865_v16 = vadd.f32 %v12779_v19, %v12724_v39  ;;  %v12867_v8 = vpop.f32.mrb[22].mxu1  ;;  %v6617_v37 = vrot.slane %v6616_v3, 1  ;;  %v6632_v31 = vmax.f32 %v6630_v21, %v6631_v58 }
 0x604   : > { %v6604_v60 = vmax.f32 %v6602_v43, %v6603_v32  ;;  %v6611_v15 = vmax.f32 %v6609_v4, %v6610_v30  ;;  %v6150_v29 = vsel %vm6133_vm8, %v6112_v5, -inf  ;;  %v12870_v49 = vpop.f32.mrb[23].mxu1  ;;  %v6639_v23 = vmax.f32 %v6637_v40, %v6638_v22 }
 0x605   : > { %v6151_v41 = vmax.f32 %v6149_v51, %v6150_v29  ;;  %v6111_v17 = vsel %vm6047_vm11, %v6015_v13, %v6079_v7  ;;  %v6618_v50 = vmax.f32 %v6616_v3, %v6617_v37  ;;  %v6146_v53 = vsel %vm6133_vm8, %v6109_v28, -inf }
 0x606   : > { %v7061_v62 = vsel %vm7047_vm15, %v6604_v60, %v6597_v35  ;;  %v6147_v19 = vsel %vm6133_vm8, %v6111_v17, -inf  ;;  %v6646_v20 = vmax.f32 %v6644_v54, %v6645_v56  ;;  %v6082_v40 = vmul.f32 0.01, %v12865_v16 }
 0x607   : > { %v7062_v48 = vsel %vm7049_vm0, %v6611_v15, %v7061_v62  ;;  %v6283_v12 = vcombine.high %v6151_v41, %v6151_v41  ;;  %v6290_v14 = vrot.slane %v6151_v41, %v12737_v27  ;;  %v6148_v6 = vmax.f32 %v6146_v53, %v6147_v19  ;;  %v12877_v44 = vpop.f32.mrb[24].mxu1 }
 0x608   : > { %v7063_v21 = vsel %vm7051_vm1, %v6618_v50, %v7062_v48  ;;  %v12883_v51 = vadd.f32 %v12724_v39, %v12781_v33  ;;  %v12885_v58 = vpop.f32.mrb[25].mxu1  ;;  %vm6050_vm13 = vcmp.gt.f32.partialorder %v12865_v16, 0.0 }
 0x609   : > { %v7064_v57 = vsel %vm7053_vm4, %v6625_v45, %v7063_v21  ;;  %v6297_v59 = vrot.slane %v6283_v12, %v12737_v27  ;;  %v6298_v1 = vcombine.high %v6290_v14, %v6290_v14  ;;  %v6675_v22 = vsel %vm6534_vm12, %v6290_v14, -inf }
 0x60a   : > { %v7065_v54 = vsel %vm7055_vm5, %v6632_v31, %v7064_v57  ;;  %v6676_v36 = vrot.slane %v6675_v22, 4  ;;  %v6266_v38 = vcombine.high %v6148_v6, %v6148_v6  ;;  %v6273_v13 = vrot.slane %v6148_v6, %v12737_v27 }
 0x60b   : > { %v7066_v42 = vsel %vm7057_vm6, %v6639_v23, %v7065_v54  ;;  %v6299_v33 = vcombine.high %v6297_v59, %v6297_v59  ;;  %v6682_v43 = vsel %vm6534_vm12, %v6298_v1, -inf  ;;  %v6689_v4 = vsel %vm6534_vm12, %v6297_v59, -inf }
 0x60c   : > { %v7067_v45 = vsel %vm7059_vm7, %v6646_v20, %v7066_v42  ;;  %v6677_v11 = vmax.f32 %v6675_v22, %v6676_v36  ;;  %v6683_v56 = vrot.slane %v6682_v43, 4  ;;  %v6690_v28 = vrot.slane %v6689_v4, 4 }
 0x60d   : > { %7119 = vst.msk [vmem:[%s12822_s12 + $0x8] sm:$0xff] %vm6133_vm8, %v7067_v45  ;;  %v6696_v24 = vsel %vm6534_vm12, %v6299_v33, -inf  ;;  %v6280_v32 = vrot.slane %v6266_v38, %v12737_v27  ;;  %v6281_v30 = vcombine.high %v6273_v13, %v6273_v13  ;;  %v6647_v3 = vsel %vm6534_vm12, %v6273_v13, -inf }
 0x60e   : > { %v6678_v35 = vrot.slane %v6677_v11, 2  ;;  %v6684_v5 = vmax.f32 %v6682_v43, %v6683_v56  ;;  %v6691_v7 = vmax.f32 %v6689_v4, %v6690_v28  ;;  %v6697_v60 = vrot.slane %v6696_v24, 4 }
 0x60f   : > { %v6282_v15 = vcombine.high %v6280_v32, %v6280_v32  ;;  %v6648_v37 = vrot.slane %v6647_v3, 4  ;;  %v6654_v29 = vsel %vm6534_vm12, %v6281_v30, -inf  ;;  %v6661_v31 = vsel %vm6534_vm12, %v6280_v32, -inf }
 0x610   : > { %v6679_v23 = vmax.f32 %v6677_v11, %v6678_v35  ;;  %v6685_v41 = vrot.slane %v6684_v5, 2  ;;  %v6692_v17 = vrot.slane %v6691_v7, 2  ;;  %v6698_v50 = vmax.f32 %v6696_v24, %v6697_v60 }
 0x611   : > { %v6649_v62 = vmax.f32 %v6647_v3, %v6648_v37  ;;  %v6655_v53 = vrot.slane %v6654_v29, 4  ;;  %v6662_v19 = vrot.slane %v6661_v31, 4  ;;  %v6668_v48 = vsel %vm6534_vm12, %v6282_v15, -inf }
 0x612   : > { %v6680_v12 = vrot.slane %v6679_v23, 1  ;;  %v6686_v14 = vmax.f32 %v6684_v5, %v6685_v41  ;;  %v6693_v6 = vmax.f32 %v6691_v7, %v6692_v17  ;;  %v6699_v20 = vrot.slane %v6698_v50, 2 }
 0x613   : > { %v6650_v21 = vrot.slane %v6649_v62, 2  ;;  %v6656_v57 = vmax.f32 %v6654_v29, %v6655_v53  ;;  %v6663_v59 = vmax.f32 %v6661_v31, %v6662_v19  ;;  %v6669_v1 = vrot.slane %v6668_v48, 4 }
 0x614   : > { %v6687_v22 = vrot.slane %v6686_v14, 1  ;;  %v6700_v54 = vmax.f32 %v6698_v50, %v6699_v20  ;;  %v6081_v36 = vmul.f32 0.01, %v12883_v51  ;;  %v6681_v43 = vmax.f32 %v6679_v23, %v6680_v12 }
 0x615   : > { %v6651_v38 = vmax.f32 %v6649_v62, %v6650_v21  ;;  %v6657_v13 = vrot.slane %v6656_v57, 2  ;;  %v6664_v42 = vrot.slane %v6663_v59, 2  ;;  %v6670_v33 = vmax.f32 %v6668_v48, %v6669_v1 }
 0x616   : > { %v6694_v4 = vrot.slane %v6693_v6, 1  ;;  %v6114_v45 = vsel %vm6050_vm13, %v12865_v16, %v6082_v40  ;;  %vm6049_vm14 = vcmp.gt.f32.partialorder %v12883_v51, 0.0  ;;  %v6688_v32 = vmax.f32 %v6686_v14, %v6687_v22 }
 0x617   : > { %v6652_v11 = vrot.slane %v6651_v38, 1  ;;  %v6658_v56 = vmax.f32 %v6656_v57, %v6657_v13  ;;  %v6665_v28 = vmax.f32 %v6663_v59, %v6664_v42  ;;  %v6671_v24 = vrot.slane %v6670_v33, 2 }
 0x618   : > { %v6701_v30 = vrot.slane %v6700_v54, 1  ;;  %v6020_v3 = vadd.f32 %v12788_v47, %v12724_v39  ;;  %v6019_v35 = vadd.f32 %v12724_v39, %v12790_v52  ;;  %v6113_v15 = vsel %vm6049_vm14, %v12883_v51, %v6081_v36 }
 0x619   : > { %v6659_v5 = vrot.slane %v6658_v56, 1  ;;  %v6666_v7 = vrot.slane %v6665_v28, 1  ;;  %v6672_v60 = vmax.f32 %v6670_v33, %v6671_v24  ;;  %v6653_v16 = vmax.f32 %v6651_v38, %v6652_v11 }
 0x61a   : > { %vm6052_vm2 = vcmp.gt.f32.partialorder %v6020_v3, 0.0  ;;  %v6084_v40 = vmul.f32 0.01, %v6020_v3  ;;  %vm6051_vm3 = vcmp.gt.f32.partialorder %v6019_v35, 0.0  ;;  %v6083_v23 = vmul.f32 0.01, %v6019_v35 }
 0x61b   : > { %v6660_v37 = vmax.f32 %v6658_v56, %v6659_v5  ;;  %v6667_v29 = vmax.f32 %v6665_v28, %v6666_v7  ;;  %v6673_v31 = vrot.slane %v6672_v60, 1  ;;  %v6695_v41 = vmax.f32 %v6693_v6, %v6694_v4 }
 0x61c   : > { %v6155_v17 = vsel %vm6133_vm8, %v6114_v45, -inf  ;;  %v6116_v47 = vsel %vm6052_vm2, %v6020_v3, %v6084_v40  ;;  %v12918_v52 = vadd.f32 %v12799_v26, %v12724_v39  ;;  %v6115_v53 = vsel %vm6051_vm3, %v6019_v35, %v6083_v23 }
 0x61d   : > { %v6674_v50 = vmax.f32 %v6672_v60, %v6673_v31  ;;  %v7068_v62 = vsel %vm7047_vm15, %v6660_v37, %v6653_v16  ;;  %v6156_v51 = vsel %vm6133_vm8, %v6116_v47, -inf  ;;  %v6152_v48 = vsel %vm6133_vm8, %v6113_v15, -inf }
 0x61e   : > { %v7069_v19 = vsel %vm7049_vm0, %v6667_v29, %v7068_v62  ;;  %v6157_v12 = vmax.f32 %v6155_v17, %v6156_v51  ;;  %v6153_v14 = vsel %vm6133_vm8, %v6115_v53, -inf  ;;  %v6702_v6 = vmax.f32 %v6700_v54, %v6701_v30 }
 0x61f   : > { %v7070_v20 = vsel %vm7051_vm1, %v6674_v50, %v7069_v19  ;;  %v6154_v21 = vmax.f32 %v6152_v48, %v6153_v14  ;;  %v12928_v26 = vadd.f32 %v12724_v39, %v12801_v25  ;;  %v12934_v22 = vadd.f32 %v12811_v0, %v12724_v39 }
 0x620   : > { %v7071_v57 = vsel %vm7053_vm4, %v6681_v43, %v7070_v20  ;;  %v6317_v59 = vcombine.high %v6157_v12, %v6157_v12  ;;  %v6324_v1 = vrot.slane %v6157_v12, %v12737_v27  ;;  %v6086_v13 = vmul.f32 0.01, %v12918_v52 }
 0x621   : > { %v7072_v36 = vsel %vm7055_vm5, %v6688_v32, %v7071_v57  ;;  %v6300_v54 = vcombine.high %v6154_v21, %v6154_v21  ;;  %v6307_v38 = vrot.slane %v6154_v21, %v12737_v27  ;;  %vm6054_vm9 = vcmp.gt.f32.partialorder %v12918_v52, 0.0 }
 0x622   : > { %v7073_v25 = vsel %vm7057_vm6, %v6695_v41, %v7072_v36  ;;  %v6331_v42 = vrot.slane %v6317_v59, %v12737_v27  ;;  %v6332_v33 = vcombine.high %v6324_v1, %v6324_v1  ;;  %v6731_v43 = vsel %vm6534_vm12, %v6324_v1, -inf }
 0x623   : > { %v7074_v4 = vsel %vm7059_vm7, %v6702_v6, %v7073_v25  ;;  %v6732_v0 = vrot.slane %v6731_v43, 4  ;;  %v6314_v45 = vrot.slane %v6300_v54, %v12737_v27  ;;  %v6315_v11 = vcombine.high %v6307_v38, %v6307_v38 }
 0x624   : > { %7120 = vst.msk [vmem:[%s12822_s12 + $0x10] sm:$0xff] %vm6133_vm8, %v7074_v4  ;;  %v6333_v56 = vcombine.high %v6331_v42, %v6331_v42  ;;  %v6738_v28 = vsel %vm6534_vm12, %v6332_v33, -inf  ;;  %v6745_v24 = vsel %vm6534_vm12, %v6331_v42, -inf  ;;  %v6703_v32 = vsel %vm6534_vm12, %v6307_v38, -inf }
 0x625   : > { %v6733_v30 = vmax.f32 %v6731_v43, %v6732_v0  ;;  %v6739_v3 = vrot.slane %v6738_v28, 4  ;;  %v6746_v35 = vrot.slane %v6745_v24, 4  ;;  %v6316_v5 = vcombine.high %v6314_v45, %v6314_v45 }
 0x626   : > { %v6752_v7 = vsel %vm6534_vm12, %v6333_v56, -inf  ;;  %v6704_v60 = vrot.slane %v6703_v32, 4  ;;  %v6710_v15 = vsel %vm6534_vm12, %v6315_v11, -inf  ;;  %v6717_v16 = vsel %vm6534_vm12, %v6314_v45, -inf }
 0x627   : > { %v6734_v40 = vrot.slane %v6733_v30, 2  ;;  %v6740_v37 = vmax.f32 %v6738_v28, %v6739_v3  ;;  %v6747_v29 = vmax.f32 %v6745_v24, %v6746_v35  ;;  %v6753_v31 = vrot.slane %v6752_v7, 4 }
 0x628   : > { %v6705_v23 = vmax.f32 %v6703_v32, %v6704_v60  ;;  %v6711_v41 = vrot.slane %v6710_v15, 4  ;;  %v6718_v17 = vrot.slane %v6717_v16, 4  ;;  %v6724_v47 = vsel %vm6534_vm12, %v6316_v5, -inf }
 0x629   : > { %vm6053_vm10 = vcmp.gt.f32.partialorder %v12928_v26, 0.0  ;;  %v6735_v50 = vmax.f32 %v6733_v30, %v6734_v40  ;;  %v6741_v62 = vrot.slane %v6740_v37, 2  ;;  %v6748_v51 = vrot.slane %v6747_v29, 2 }
 0x62a   : > { %v6754_v53 = vmax.f32 %v6752_v7, %v6753_v31  ;;  %v6706_v19 = vrot.slane %v6705_v23, 2  ;;  %v6712_v48 = vmax.f32 %v6710_v15, %v6711_v41  ;;  %v6719_v12 = vmax.f32 %v6717_v16, %v6718_v17 }
 0x62b   : > { %v6725_v14 = vrot.slane %v6724_v47, 4  ;;  %v6736_v6 = vrot.slane %v6735_v50, 1  ;;  %v6742_v20 = vmax.f32 %v6740_v37, %v6741_v62  ;;  %v6749_v21 = vmax.f32 %v6747_v29, %v6748_v51 }
 0x62c   : > { %v6755_v57 = vrot.slane %v6754_v53, 2  ;;  %v6707_v59 = vmax.f32 %v6705_v23, %v6706_v19  ;;  %v6713_v1 = vrot.slane %v6712_v48, 2  ;;  %v6720_v36 = vrot.slane %v6719_v12, 2 }
 0x62d   : > { %v6726_v54 = vmax.f32 %v6724_v47, %v6725_v14  ;;  %v6743_v38 = vrot.slane %v6742_v20, 1  ;;  %v6750_v25 = vrot.slane %v6749_v21, 1  ;;  %v6118_v33 = vsel %vm6054_vm9, %v12918_v52, %v6086_v13 }
 0x62e   : > { %v6756_v42 = vmax.f32 %v6754_v53, %v6755_v57  ;;  %v6708_v43 = vrot.slane %v6707_v59, 1  ;;  %v6714_v4 = vmax.f32 %v6712_v48, %v6713_v1  ;;  %v6721_v0 = vmax.f32 %v6719_v12, %v6720_v36 }
 0x62f   : > { %v6727_v45 = vrot.slane %v6726_v54, 2  ;;  %v6737_v11 = vmax.f32 %v6735_v50, %v6736_v6  ;;  %v6744_v56 = vmax.f32 %v6742_v20, %v6743_v38  ;;  %v6085_v24 = vmul.f32 0.01, %v12928_v26 }
 0x630   : > { %v6757_v28 = vrot.slane %v6756_v42, 1  ;;  %v6751_v32 = vmax.f32 %v6749_v21, %v6750_v25  ;;  %v6715_v30 = vrot.slane %v6714_v4, 1  ;;  %v6722_v3 = vrot.slane %v6721_v0, 1 }
 0x631   : > { %v6728_v35 = vmax.f32 %v6726_v54, %v6727_v45  ;;  %v6709_v5 = vmax.f32 %v6707_v59, %v6708_v43  ;;  %v6161_v7 = vsel %vm6133_vm8, %v6118_v33, -inf  ;;  %vm6056_vm11 = vcmp.gt.f32.partialorder %v12934_v22, 0.0 }
 0x632   : > { %v6088_v52 = vmul.f32 0.01, %v12934_v22  ;;  %v6758_v13 = vmax.f32 %v6756_v42, %v6757_v28  ;;  %v6716_v60 = vmax.f32 %v6714_v4, %v6715_v30  ;;  %v6723_v15 = vmax.f32 %v6721_v0, %v6722_v3 }
 0x633   : > { %v6729_v16 = vrot.slane %v6728_v35, 1  ;;  %v6117_v40 = vsel %vm6053_vm10, %v12928_v26, %v6085_v24  ;;  %v6023_v29 = vadd.f32 %v12724_v39, %v12816_v9  ;;  %v6026_v31 = vadd.f32 %v12828_v10, %v12724_v39 }
 0x634   : > { %v6120_v37 = vsel %vm6056_vm11, %v12934_v22, %v6088_v52  ;;  %v7075_v41 = vsel %vm7047_vm15, %v6716_v60, %v6709_v5  ;;  %v6025_v47 = vadd.f32 %v12724_v39, %v12833_v2  ;;  %v6158_v9 = vsel %vm6133_vm8, %v6117_v40, -inf }
 0x635   : > { %v6730_v23 = vmax.f32 %v6728_v35, %v6729_v16  ;;  %v6162_v17 = vsel %vm6133_vm8, %v6120_v37, -inf  ;;  %v7076_v50 = vsel %vm7049_vm0, %v6723_v15, %v7075_v41  ;;  %vm6055_vm13 = vcmp.gt.f32.partialorder %v6023_v29, 0.0 }
 0x636   : > { %v6163_v62 = vmax.f32 %v6161_v7, %v6162_v17  ;;  %v6087_v26 = vmul.f32 0.01, %v6023_v29  ;;  %v6090_v51 = vmul.f32 0.01, %v6026_v31  ;;  %v12979_v10 = vadd.f32 %v12840_v55, %v12724_v39 }
 0x637   : > { %v7077_v22 = vsel %vm7051_vm1, %v6730_v23, %v7076_v50  ;;  %vm6058_vm14 = vcmp.gt.f32.partialorder %v6026_v31, 0.0  ;;  %v6089_v6 = vmul.f32 0.01, %v6025_v47  ;;  %vm6057_vm2 = vcmp.gt.f32.partialorder %v6025_v47, 0.0 }
 0x638   : > { %v7078_v53 = vsel %vm7053_vm4, %v6737_v11, %v7077_v22  ;;  %v6351_v19 = vcombine.high %v6163_v62, %v6163_v62  ;;  %v6358_v2 = vrot.slane %v6163_v62, %v12737_v27  ;;  %v6119_v48 = vsel %vm6055_vm13, %v6023_v29, %v6087_v26 }
 0x639   : > { %v7079_v12 = vsel %vm7055_vm5, %v6744_v56, %v7078_v53  ;;  %v6159_v14 = vsel %vm6133_vm8, %v6119_v48, -inf  ;;  %v6122_v25 = vsel %vm6058_vm14, %v6026_v31, %v6090_v51  ;;  %v6121_v11 = vsel %vm6057_vm2, %v6025_v47, %v6089_v6 }
 0x63a   : > { %v7080_v20 = vsel %vm7057_vm6, %v6751_v32, %v7079_v12  ;;  %v6365_v21 = vrot.slane %v6351_v19, %v12737_v27  ;;  %v6366_v57 = vcombine.high %v6358_v2, %v6358_v2  ;;  %v6787_v39 = vsel %vm6534_vm12, %v6358_v2, -inf }
 0x63b   : > { %v7081_v55 = vsel %vm7059_vm7, %v6758_v13, %v7080_v20  ;;  %v6788_v59 = vrot.slane %v6787_v39, 4  ;;  %v6160_v1 = vmax.f32 %v6158_v9, %v6159_v14  ;;  %vm6060_vm3 = vcmp.gt.f32.partialorder %v12979_v10, 0.0 }
 0x63c   : > { %7121 = vst.msk [vmem:[%s12822_s12 + $0x18] sm:$0xff] %vm6133_vm8, %v7081_v55  ;;  %v6367_v36 = vcombine.high %v6365_v21, %v6365_v21  ;;  %v6794_v54 = vsel %vm6534_vm12, %v6366_v57, -inf  ;;  %v6801_v38 = vsel %vm6534_vm12, %v6365_v21, -inf  ;;  %v6092_v5 = vmul.f32 0.01, %v12979_v10 }
 0x63d   : > { %v6789_v42 = vmax.f32 %v6787_v39, %v6788_v59  ;;  %v6795_v33 = vrot.slane %v6794_v54, 4  ;;  %v6802_v43 = vrot.slane %v6801_v38, 4  ;;  %v6334_v4 = vcombine.high %v6160_v1, %v6160_v1 }
 0x63e   : > { %v6808_v0 = vsel %vm6534_vm12, %v6367_v36, -inf  ;;  %v6341_v45 = vrot.slane %v6160_v1, %v12737_v27  ;;  %v6167_v9 = vsel %vm6133_vm8, %v6122_v25, -inf  ;;  %v6164_v14 = vsel %vm6133_vm8, %v6121_v11, -inf  ;;  %v13011_v36 = vld [vmem:[%s13127_s4] ss:$0 sm:$0xff] }
 0x63f   : > { %v6790_v56 = vrot.slane %v6789_v42, 2  ;;  %v6796_v28 = vmax.f32 %v6794_v54, %v6795_v33  ;;  %v6803_v24 = vmax.f32 %v6801_v38, %v6802_v43  ;;  %v6809_v32 = vrot.slane %v6808_v0, 4 }
 0x640   : > { %v6348_v30 = vrot.slane %v6334_v4, %v12737_v27  ;;  %v6349_v3 = vcombine.high %v6341_v45, %v6341_v45  ;;  %v6759_v35 = vsel %vm6534_vm12, %v6341_v45, -inf  ;;  %v6124_v6 = vsel %vm6060_vm3, %v12979_v10, %v6092_v5 }
 0x641   : > { %v6791_v7 = vmax.f32 %v6789_v42, %v6790_v56  ;;  %v6797_v52 = vrot.slane %v6796_v28, 2  ;;  %v6804_v13 = vrot.slane %v6803_v24, 2  ;;  %v6810_v60 = vmax.f32 %v6808_v0, %v6809_v32 }
 0x642   : > { %v6350_v15 = vcombine.high %v6348_v30, %v6348_v30  ;;  %v6760_v16 = vrot.slane %v6759_v35, 4  ;;  %v6766_v40 = vsel %vm6534_vm12, %v6349_v3, -inf  ;;  %v6773_v37 = vsel %vm6534_vm12, %v6348_v30, -inf }
 0x643   : > { %v6792_v29 = vrot.slane %v6791_v7, 1  ;;  %v6798_v31 = vmax.f32 %v6796_v28, %v6797_v52  ;;  %v6805_v23 = vmax.f32 %v6803_v24, %v6804_v13  ;;  %v6811_v41 = vrot.slane %v6810_v60, 2 }
 0x644   : > { %v6761_v17 = vmax.f32 %v6759_v35, %v6760_v16  ;;  %v6767_v47 = vrot.slane %v6766_v40, 4  ;;  %v6774_v50 = vrot.slane %v6773_v37, 4  ;;  %v6780_v62 = vsel %vm6534_vm12, %v6350_v15, -inf }
 0x645   : > { %v6799_v26 = vrot.slane %v6798_v31, 1  ;;  %v6806_v22 = vrot.slane %v6805_v23, 1  ;;  %v6781_v2 = vrot.slane %v6780_v62, 4  ;;  %v6793_v48 = vmax.f32 %v6791_v7, %v6792_v29 }
 0x646   : > { %v6762_v51 = vrot.slane %v6761_v17, 2  ;;  %v6768_v53 = vmax.f32 %v6766_v40, %v6767_v47  ;;  %v6775_v19 = vmax.f32 %v6773_v37, %v6774_v50  ;;  %v6812_v12 = vmax.f32 %v6810_v60, %v6811_v41 }
 0x647   : > { %v6782_v39 = vmax.f32 %v6780_v62, %v6781_v2  ;;  %v6800_v55 = vmax.f32 %v6798_v31, %v6799_v26  ;;  %v6807_v59 = vmax.f32 %v6805_v23, %v6806_v22  ;;  %v6168_v1 = vsel %vm6133_vm8, %v6124_v6, -inf }
 0x648   : > { %v6763_v20 = vmax.f32 %v6761_v17, %v6762_v51  ;;  %v6769_v21 = vrot.slane %v6768_v53, 2  ;;  %v6776_v57 = vrot.slane %v6775_v19, 2  ;;  %v6027_v54 = vadd.f32 %v13011_v36, %v12844_v18 }
 0x649   : > { %v6783_v10 = vrot.slane %v6782_v39, 2  ;;  %v6813_v33 = vrot.slane %v6812_v12, 1  ;;  %v6169_v43 = vmax.f32 %v6167_v9, %v6168_v1  ;;  %v13017_v56 = vadd.f32 %v13011_v36, %v12850_v63 }
 0x64a   : > { %v6764_v38 = vrot.slane %v6763_v20, 1  ;;  %v6770_v25 = vmax.f32 %v6768_v53, %v6769_v21  ;;  %v6777_v42 = vmax.f32 %v6775_v19, %v6776_v57  ;;  %vm6059_vm9 = vcmp.gt.f32.partialorder %v6027_v54, 0.0 }
 0x64b   : > { %v6091_v4 = vmul.f32 0.01, %v6027_v54  ;;  %v6784_v11 = vmax.f32 %v6782_v39, %v6783_v10  ;;  %v6385_v24 = vcombine.high %v6169_v43, %v6169_v43  ;;  %v6392_v32 = vrot.slane %v6169_v43, %v12737_v27 }
 0x64c   : > { %v6771_v0 = vrot.slane %v6770_v25, 1  ;;  %v6778_v45 = vrot.slane %v6777_v42, 1  ;;  %v6765_v28 = vmax.f32 %v6763_v20, %v6764_v38  ;;  %v6814_v15 = vmax.f32 %v6812_v12, %v6813_v33 }
 0x64d   : > { %v6123_v18 = vsel %vm6059_vm9, %v6027_v54, %v6091_v4  ;;  %v6785_v35 = vrot.slane %v6784_v11, 1  ;;  %v6399_v7 = vrot.slane %v6385_v24, %v12737_v27  ;;  %v6400_v52 = vcombine.high %v6392_v32, %v6392_v32 }
 0x64e   : > { %v6772_v30 = vmax.f32 %v6770_v25, %v6771_v0  ;;  %v6779_v3 = vmax.f32 %v6777_v42, %v6778_v45  ;;  %v6165_v5 = vsel %vm6133_vm8, %v6123_v18, -inf  ;;  %v6843_v13 = vsel %vm6534_vm12, %v6392_v32, -inf }
 0x64f   : > { %v6166_v60 = vmax.f32 %v6164_v14, %v6165_v5  ;;  %v6786_v16 = vmax.f32 %v6784_v11, %v6785_v35  ;;  %v6844_v40 = vrot.slane %v6843_v13, 4  ;;  %v6401_v29 = vcombine.high %v6399_v7, %v6399_v7 }
 0x650   : > { %v7082_v63 = vsel %vm7047_vm15, %v6772_v30, %v6765_v28  ;;  %v6850_v31 = vsel %vm6534_vm12, %v6400_v52, -inf  ;;  %v6857_v23 = vsel %vm6534_vm12, %v6399_v7, -inf  ;;  %vm6062_vm10 = vcmp.gt.f32.partialorder %v13017_v56, 0.0 }
 0x651   : > { %v7083_v37 = vsel %vm7049_vm0, %v6779_v3, %v7082_v63  ;;  %v6845_v17 = vmax.f32 %v6843_v13, %v6844_v40  ;;  %v6851_v47 = vrot.slane %v6850_v31, 4  ;;  %v6858_v50 = vrot.slane %v6857_v23, 4 }
 0x652   : > { %v7084_v41 = vsel %vm7051_vm1, %v6786_v16, %v7083_v37  ;;  %v6864_v26 = vsel %vm6534_vm12, %v6401_v29, -inf  ;;  %v6368_v22 = vcombine.high %v6166_v60, %v6166_v60  ;;  %v6375_v9 = vrot.slane %v6166_v60, %v12737_v27 }
 0x653   : > { %v7085_v62 = vsel %vm7053_vm4, %v6793_v48, %v7084_v41  ;;  %v6846_v53 = vrot.slane %v6845_v17, 2  ;;  %v6852_v19 = vmax.f32 %v6850_v31, %v6851_v47  ;;  %v6859_v2 = vmax.f32 %v6857_v23, %v6858_v50 }
 0x654   : > { %v7086_v51 = vsel %vm7055_vm5, %v6800_v55, %v7085_v62  ;;  %v6865_v14 = vrot.slane %v6864_v26, 4  ;;  %v6382_v6 = vrot.slane %v6368_v22, %v12737_v27  ;;  %v6383_v20 = vcombine.high %v6375_v9, %v6375_v9 }
 0x655   : > { %v7087_v12 = vsel %vm7057_vm6, %v6807_v59, %v7086_v51  ;;  %v6847_v48 = vmax.f32 %v6845_v17, %v6846_v53  ;;  %v6853_v57 = vrot.slane %v6852_v19, 2  ;;  %v6860_v39 = vrot.slane %v6859_v2, 2 }
 0x656   : > { %v7088_v21 = vsel %vm7059_vm7, %v6814_v15, %v7087_v12  ;;  %v6866_v1 = vmax.f32 %v6864_v26, %v6865_v14  ;;  %v6384_v54 = vcombine.high %v6382_v6, %v6382_v6  ;;  %v6815_v55 = vsel %vm6534_vm12, %v6375_v9, -inf }
 0x657   : > { %7122 = vst.msk [vmem:[%s12822_s12 + $0x20] sm:$0xff] %vm6133_vm8, %v7088_v21  ;;  %v6822_v38 = vsel %vm6534_vm12, %v6383_v20, -inf  ;;  %v6848_v25 = vrot.slane %v6847_v48, 1  ;;  %v6854_v42 = vmax.f32 %v6852_v19, %v6853_v57  ;;  %v6816_v59 = vrot.slane %v6815_v55, 4 }
 0x658   : > { %v6094_v10 = vmul.f32 0.01, %v13017_v56  ;;  %v6867_v33 = vrot.slane %v6866_v1, 2  ;;  %v6823_v43 = vrot.slane %v6822_v38, 4  ;;  %v6829_v4 = vsel %vm6534_vm12, %v6382_v6, -inf }
 0x659   : > { %v6836_v0 = vsel %vm6534_vm12, %v6384_v54, -inf  ;;  %v6817_v45 = vmax.f32 %v6815_v55, %v6816_v59  ;;  %v6861_v11 = vmax.f32 %v6859_v2, %v6860_v39  ;;  %v6830_v24 = vrot.slane %v6829_v4, 4 }
 0x65a   : > { %v6824_v28 = vmax.f32 %v6822_v38, %v6823_v43  ;;  %v6837_v32 = vrot.slane %v6836_v0, 4  ;;  %v6849_v18 = vmax.f32 %v6847_v48, %v6848_v25  ;;  %v6855_v30 = vrot.slane %v6854_v42, 1 }
 0x65b   : > { %v6818_v3 = vrot.slane %v6817_v45, 2  ;;  %v6126_v35 = vsel %vm6062_vm10, %v13017_v56, %v6094_v10  ;;  %v6868_v5 = vmax.f32 %v6866_v1, %v6867_v33  ;;  %v6831_v52 = vmax.f32 %v6829_v4, %v6830_v24 }
 0x65c   : > { %v6825_v7 = vrot.slane %v6824_v28, 2  ;;  %v6838_v13 = vmax.f32 %v6836_v0, %v6837_v32  ;;  %v6029_v15 = vadd.f32 %v13011_v36, %v12852_v34  ;;  %v6032_v16 = vadd.f32 %v13011_v36, %v12858_v46 }
 0x65d   : > { %v6819_v60 = vmax.f32 %v6817_v45, %v6818_v3  ;;  %v6031_v63 = vadd.f32 %v13011_v36, %v12860_v61  ;;  %v6862_v40 = vrot.slane %v6861_v11, 1  ;;  %v6832_v29 = vrot.slane %v6831_v52, 2 }
 0x65e   : > { %v6826_v37 = vmax.f32 %v6824_v28, %v6825_v7  ;;  %v6839_v31 = vrot.slane %v6838_v13, 2  ;;  %vm6061_vm11 = vcmp.gt.f32.partialorder %v6029_v15, 0.0  ;;  %v6093_v56 = vmul.f32 0.01, %v6029_v15 }
 0x65f   : > { %v6820_v23 = vrot.slane %v6819_v60, 1  ;;  %vm6064_vm13 = vcmp.gt.f32.partialorder %v6032_v16, 0.0  ;;  %v6833_v17 = vmax.f32 %v6831_v52, %v6832_v29  ;;  %v6096_v50 = vmul.f32 0.01, %v6032_v16 }
 0x660   : > { %v6827_v41 = vrot.slane %v6826_v37, 1  ;;  %v6840_v47 = vmax.f32 %v6838_v13, %v6839_v31  ;;  %v6869_v62 = vrot.slane %v6868_v5, 1  ;;  %vm6063_vm14 = vcmp.gt.f32.partialorder %v6031_v63, 0.0 }
 0x661   : > { %v6821_v34 = vmax.f32 %v6819_v60, %v6820_v23  ;;  %v6095_v26 = vmul.f32 0.01, %v6031_v63  ;;  %v6834_v22 = vrot.slane %v6833_v17, 1  ;;  %v6125_v61 = vsel %vm6061_vm11, %v6029_v15, %v6093_v56 }
 0x662   : > { %v6828_v46 = vmax.f32 %v6826_v37, %v6827_v41  ;;  %v6841_v9 = vrot.slane %v6840_v47, 1  ;;  %v6173_v51 = vsel %vm6133_vm8, %v6126_v35, -inf  ;;  %v6128_v53 = vsel %vm6064_vm13, %v6032_v16, %v6096_v50 }
 0x663   : > { %v6127_v19 = vsel %vm6063_vm14, %v6031_v63, %v6095_v26  ;;  %v6034_v2 = vadd.f32 %v13011_v36, %v12867_v8  ;;  %v6835_v12 = vmax.f32 %v6833_v17, %v6834_v22  ;;  %v6174_v20 = vsel %vm6133_vm8, %v6128_v53, -inf }
 0x664   : > { %v6842_v14 = vmax.f32 %v6840_v47, %v6841_v9  ;;  %v7089_v6 = vsel %vm7047_vm15, %v6828_v46, %v6821_v34  ;;  %v6856_v21 = vmax.f32 %v6854_v42, %v6855_v30  ;;  %v6170_v48 = vsel %vm6133_vm8, %v6125_v61, -inf }
 0x665   : > { %v6175_v57 = vmax.f32 %v6173_v51, %v6174_v20  ;;  %v6171_v39 = vsel %vm6133_vm8, %v6127_v19, -inf  ;;  %v6863_v1 = vmax.f32 %v6861_v11, %v6862_v40  ;;  %v6870_v54 = vmax.f32 %v6868_v5, %v6869_v62 }
 0x666   : > { %v7090_v55 = vsel %vm7049_vm0, %v6835_v12, %v7089_v6  ;;  %v6172_v38 = vmax.f32 %v6170_v48, %v6171_v39  ;;  %vm6066_vm2 = vcmp.gt.f32.partialorder %v6034_v2, 0.0  ;;  %v6098_v43 = vmul.f32 0.01, %v6034_v2 }
 0x667   : > { %v7091_v25 = vsel %vm7051_vm1, %v6842_v14, %v7090_v55  ;;  %v6419_v8 = vcombine.high %v6175_v57, %v6175_v57  ;;  %v6426_v59 = vrot.slane %v6175_v57, %v12737_v27  ;;  %v6033_v26 = vadd.f32 %v13011_v36, %v12870_v49 }
 0x668   : > { %v7092_v10 = vsel %vm7053_vm4, %v6849_v18, %v7091_v25  ;;  %v6402_v42 = vcombine.high %v6172_v38, %v6172_v38  ;;  %v6409_v33 = vrot.slane %v6172_v38, %v12737_v27  ;;  %v6130_v12 = vsel %vm6066_vm2, %v6034_v2, %v6098_v43 }
 0x669   : > { %v7093_v4 = vsel %vm7055_vm5, %v6856_v21, %v7092_v10  ;;  %v6433_v0 = vrot.slane %v6419_v8, %v12737_v27  ;;  %v6434_v45 = vcombine.high %v6426_v59, %v6426_v59  ;;  %v6899_v11 = vsel %vm6534_vm12, %v6426_v59, -inf }
 0x66a   : > { %v7094_v28 = vsel %vm7057_vm6, %v6863_v1, %v7093_v4  ;;  %v6900_v24 = vrot.slane %v6899_v11, 4  ;;  %v6416_v32 = vrot.slane %v6402_v42, %v12737_v27  ;;  %v6417_v30 = vcombine.high %v6409_v33, %v6409_v33 }
 0x66b   : > { %v7095_v18 = vsel %vm7059_vm7, %v6870_v54, %v7094_v28  ;;  %v6435_v3 = vcombine.high %v6433_v0, %v6433_v0  ;;  %v6906_v35 = vsel %vm6534_vm12, %v6434_v45, -inf  ;;  %v6913_v5 = vsel %vm6534_vm12, %v6433_v0, -inf }
 0x66c   : > { %7123 = vst.msk [vmem:[%s12822_s12 + $0x28] sm:$0xff] %vm6133_vm8, %v7095_v18  ;;  %v6901_v7 = vmax.f32 %v6899_v11, %v6900_v24  ;;  %v6907_v52 = vrot.slane %v6906_v35, 4  ;;  %v6914_v13 = vrot.slane %v6913_v5, 4  ;;  %v6418_v60 = vcombine.high %v6416_v32, %v6416_v32 }
 0x66d   : > { %v6920_v15 = vsel %vm6534_vm12, %v6435_v3, -inf  ;;  %v6871_v16 = vsel %vm6534_vm12, %v6409_v33, -inf  ;;  %v6878_v63 = vsel %vm6534_vm12, %v6417_v30, -inf  ;;  %v6885_v40 = vsel %vm6534_vm12, %v6416_v32, -inf }
 0x66e   : > { %v6902_v37 = vrot.slane %v6901_v7, 2  ;;  %v6908_v29 = vmax.f32 %v6906_v35, %v6907_v52  ;;  %v6915_v31 = vmax.f32 %v6913_v5, %v6914_v13  ;;  %v6921_v23 = vrot.slane %v6920_v15, 4 }
 0x66f   : > { %v6872_v56 = vrot.slane %v6871_v16, 4  ;;  %v6879_v41 = vrot.slane %v6878_v63, 4  ;;  %v6886_v17 = vrot.slane %v6885_v40, 4  ;;  %v6892_v47 = vsel %vm6534_vm12, %v6418_v60, -inf }
 0x670   : > { %v6909_v50 = vrot.slane %v6908_v29, 2  ;;  %v6916_v62 = vrot.slane %v6915_v31, 2  ;;  %v6922_v34 = vmax.f32 %v6920_v15, %v6921_v23  ;;  %v6893_v61 = vrot.slane %v6892_v47, 4 }
 0x671   : > { %v6873_v46 = vmax.f32 %v6871_v16, %v6872_v56  ;;  %v6880_v22 = vmax.f32 %v6878_v63, %v6879_v41  ;;  %v6887_v9 = vmax.f32 %v6885_v40, %v6886_v17  ;;  %v6903_v51 = vmax.f32 %v6901_v7, %v6902_v37 }
 0x672   : > { %v6910_v53 = vmax.f32 %v6908_v29, %v6909_v50  ;;  %v6923_v19 = vrot.slane %v6922_v34, 2  ;;  %v6894_v21 = vmax.f32 %v6892_v47, %v6893_v61  ;;  %v6917_v48 = vmax.f32 %v6915_v31, %v6916_v62 }
 0x673   : > { %v6874_v14 = vrot.slane %v6873_v46, 2  ;;  %v6881_v6 = vrot.slane %v6880_v22, 2  ;;  %v6888_v20 = vrot.slane %v6887_v9, 2  ;;  %vm6065_vm3 = vcmp.gt.f32.partialorder %v6033_v26, 0.0 }
 0x674   : > { %v6097_v57 = vmul.f32 0.01, %v6033_v26  ;;  %v6895_v49 = vrot.slane %v6894_v21, 2  ;;  %v6904_v55 = vrot.slane %v6903_v51, 1  ;;  %v6911_v38 = vrot.slane %v6910_v53, 1 }
 0x675   : > { %v6875_v39 = vmax.f32 %v6873_v46, %v6874_v14  ;;  %v6882_v1 = vmax.f32 %v6880_v22, %v6881_v6  ;;  %v6889_v54 = vmax.f32 %v6887_v9, %v6888_v20  ;;  %v6924_v25 = vmax.f32 %v6922_v34, %v6923_v19 }
 0x676   : > { %v6179_v8 = vsel %vm6133_vm8, %v6130_v12, -inf  ;;  %v6896_v2 = vmax.f32 %v6894_v21, %v6895_v49  ;;  %v6918_v33 = vrot.slane %v6917_v48, 1  ;;  %v6129_v43 = vsel %vm6065_vm3, %v6033_v26, %v6097_v57 }
 0x677   : > { %v6876_v59 = vrot.slane %v6875_v39, 1  ;;  %v6883_v10 = vrot.slane %v6882_v1, 1  ;;  %v6890_v42 = vrot.slane %v6889_v54, 1  ;;  %v6036_v4 = vadd.f32 %v13011_v36, %v12877_v44 }
 0x678   : > { %v6035_v0 = vadd.f32 %v13011_v36, %v12885_v58  ;;  %v6897_v24 = vrot.slane %v6896_v2, 1  ;;  %v6905_v18 = vmax.f32 %v6903_v51, %v6904_v55  ;;  %v6925_v3 = vrot.slane %v6924_v25, 1 }
 0x679   : > { %v6877_v45 = vmax.f32 %v6875_v39, %v6876_v59  ;;  %v6884_v11 = vmax.f32 %v6882_v1, %v6883_v10  ;;  %v6891_v28 = vmax.f32 %v6889_v54, %v6890_v42  ;;  %vm6068_vm9 = vcmp.gt.f32.partialorder %v6036_v4, 0.0 }
 0x67a   : > { %v6100_v32 = vmul.f32 0.01, %v6036_v4  ;;  %vm6067_vm10 = vcmp.gt.f32.partialorder %v6035_v0, 0.0  ;;  %v6099_v30 = vmul.f32 0.01, %v6035_v0  ;;  %v6898_v35 = vmax.f32 %v6896_v2, %v6897_v24 }
 0x67b   : > { %v7096_v5 = vsel %vm7047_vm15, %v6884_v11, %v6877_v45  ;;  %v6912_v7 = vmax.f32 %v6910_v53, %v6911_v38  ;;  %v6176_v36 = vsel %vm6133_vm8, %v6129_v43, -inf  ;;  %v6919_v16 = vmax.f32 %v6917_v48, %v6918_v33 }
 0x67c   : > { %v7097_v52 = vsel %vm7049_vm0, %v6891_v28, %v7096_v5  ;;  %v6132_v44 = vsel %vm6068_vm9, %v6036_v4, %v6100_v32  ;;  %v6131_v13 = vsel %vm6067_vm10, %v6035_v0, %v6099_v30  ;;  %v6926_v29 = vmax.f32 %v6924_v25, %v6925_v3 }
 0x67d   : > { %v7098_v58 = vsel %vm7051_vm1, %v6898_v35, %v7097_v52  ;;  %v6180_v60 = vsel %vm6133_vm8, %v6132_v44, -inf  ;;  %v6177_v15 = vsel %vm6133_vm8, %v6131_v13, -inf }
 0x67e   : > { %v7099_v63 = vsel %vm7053_vm4, %v6905_v18, %v7098_v58  ;;  %v6181_v40 = vmax.f32 %v6179_v8, %v6180_v60  ;;  %v6178_v37 = vmax.f32 %v6176_v36, %v6177_v15 }
 0x67f   : > { %v7100_v31 = vsel %vm7055_vm5, %v6912_v7, %v7099_v63 }
 0x680   : > { %v7101_v23 = vsel %vm7057_vm6, %v6919_v16, %v7100_v31  ;;  %v6453_v56 = vcombine.high %v6181_v40, %v6181_v40  ;;  %v6460_v41 = vrot.slane %v6181_v40, %v12737_v27  ;;  %v6436_v17 = vcombine.high %v6178_v37, %v6178_v37 }
 0x681   : > { %v7102_v47 = vsel %vm7059_vm7, %v6926_v29, %v7101_v23  ;;  %v6443_v50 = vrot.slane %v6178_v37, %v12737_v27 }
 0x682   : > { %7124 = vst.msk [vmem:[%s12822_s12 + $0x30] sm:$0xff] %vm6133_vm8, %v7102_v47  ;;  %v6467_v62 = vrot.slane %v6453_v56, %v12737_v27  ;;  %v6468_v34 = vcombine.high %v6460_v41, %v6460_v41  ;;  %v6955_v26 = vsel %vm6534_vm12, %v6460_v41, -inf  ;;  %v6450_v46 = vrot.slane %v6436_v17, %v12737_v27 }
 0x683   : > { %v6956_v22 = vrot.slane %v6955_v26, 4  ;;  %v6451_v9 = vcombine.high %v6443_v50, %v6443_v50  ;;  %v6927_v61 = vsel %vm6534_vm12, %v6443_v50, -inf }
 0x684   : > { %v6469_v51 = vcombine.high %v6467_v62, %v6467_v62  ;;  %v6962_v53 = vsel %vm6534_vm12, %v6468_v34, -inf  ;;  %v6969_v19 = vsel %vm6534_vm12, %v6467_v62, -inf  ;;  %v6452_v12 = vcombine.high %v6450_v46, %v6450_v46 }
 0x685   : > { %v6957_v14 = vmax.f32 %v6955_v26, %v6956_v22  ;;  %v6963_v6 = vrot.slane %v6962_v53, 4  ;;  %v6970_v20 = vrot.slane %v6969_v19, 4  ;;  %v6928_v21 = vrot.slane %v6927_v61, 4 }
 0x686   : > { %v6976_v48 = vsel %vm6534_vm12, %v6469_v51, -inf  ;;  %v6934_v57 = vsel %vm6534_vm12, %v6451_v9, -inf  ;;  %v6941_v27 = vsel %vm6534_vm12, %v6450_v46, -inf  ;;  %v6948_v39 = vsel %vm6534_vm12, %v6452_v12, -inf }
 0x687   : > { %v6964_v1 = vmax.f32 %v6962_v53, %v6963_v6  ;;  %v6971_v54 = vmax.f32 %v6969_v19, %v6970_v20  ;;  %v6977_v49 = vrot.slane %v6976_v48, 4  ;;  %v6929_v55 = vmax.f32 %v6927_v61, %v6928_v21 }
 0x688   : > { %v6935_v38 = vrot.slane %v6934_v57, 4  ;;  %v6942_v25 = vrot.slane %v6941_v27, 4  ;;  %v6949_v8 = vrot.slane %v6948_v39, 4  ;;  %v6958_v59 = vrot.slane %v6957_v14, 2 }
 0x689   : > { %v6965_v10 = vrot.slane %v6964_v1, 2  ;;  %v6978_v42 = vmax.f32 %v6976_v48, %v6977_v49  ;;  %v6930_v2 = vrot.slane %v6929_v55, 2  ;;  %v6972_v0 = vrot.slane %v6971_v54, 2 }
 0x68a   : > { %v6936_v33 = vmax.f32 %v6934_v57, %v6935_v38  ;;  %v6943_v43 = vmax.f32 %v6941_v27, %v6942_v25  ;;  %v6950_v4 = vmax.f32 %v6948_v39, %v6949_v8  ;;  %v6959_v30 = vmax.f32 %v6957_v14, %v6958_v59 }
 0x68b   : > { %v6979_v45 = vrot.slane %v6978_v42, 2  ;;  %v6931_v11 = vmax.f32 %v6929_v55, %v6930_v2  ;;  %v6966_v18 = vmax.f32 %v6964_v1, %v6965_v10  ;;  %v6973_v52 = vmax.f32 %v6971_v54, %v6972_v0 }
 0x68c   : > { %v6937_v28 = vrot.slane %v6936_v33, 2  ;;  %v6944_v24 = vrot.slane %v6943_v43, 2  ;;  %v6951_v32 = vrot.slane %v6950_v4, 2  ;;  %v6960_v60 = vrot.slane %v6959_v30, 1 }
 0x68d   : > { %v6932_v3 = vrot.slane %v6931_v11, 1  ;;  %v6980_v44 = vmax.f32 %v6978_v42, %v6979_v45  ;;  %v6967_v15 = vrot.slane %v6966_v18, 1  ;;  %v6974_v29 = vrot.slane %v6973_v52, 1 }
 0x68e   : > { %v6938_v35 = vmax.f32 %v6936_v33, %v6937_v28  ;;  %v6945_v5 = vmax.f32 %v6943_v43, %v6944_v24  ;;  %v6952_v7 = vmax.f32 %v6950_v4, %v6951_v32  ;;  %v6961_v56 = vmax.f32 %v6959_v30, %v6960_v60 }
 0x68f   : > { %v6933_v16 = vmax.f32 %v6931_v11, %v6932_v3  ;;  %v6981_v31 = vrot.slane %v6980_v44, 1  ;;  %v6968_v17 = vmax.f32 %v6966_v18, %v6967_v15  ;;  %v6975_v50 = vmax.f32 %v6973_v52, %v6974_v29 }
 0x690   : > { %v6939_v13 = vrot.slane %v6938_v35, 1  ;;  %v6946_v58 = vrot.slane %v6945_v5, 1  ;;  %v6953_v36 = vrot.slane %v6952_v7, 1 }
 0x691   : > { %v6982_v34 = vmax.f32 %v6980_v44, %v6981_v31 }
 0x692   : > { %v6940_v63 = vmax.f32 %v6938_v35, %v6939_v13  ;;  %v6947_v40 = vmax.f32 %v6945_v5, %v6946_v58  ;;  %v6954_v37 = vmax.f32 %v6952_v7, %v6953_v36 }
 0x694   : > { %v7103_v23 = vsel %vm7047_vm15, %v6940_v63, %v6933_v16 }
 0x695   : > { %v7104_v41 = vsel %vm7049_vm0, %v6947_v40, %v7103_v23 }
 0x696   : > { %v7105_v47 = vsel %vm7051_vm1, %v6954_v37, %v7104_v41 }
 0x697   : > { %v7106_v62 = vsel %vm7053_vm4, %v6961_v56, %v7105_v47 }
 0x698   : > { %v7107_v26 = vsel %vm7055_vm5, %v6968_v17, %v7106_v62 }
 0x699   : > { %v7108_v46 = vsel %vm7057_vm6, %v6975_v50, %v7107_v26 }
 0x69a   : > { %v7109_v22 = vsel %vm7059_vm7, %v6982_v34, %v7108_v46 }
 0x69b   : > { %7125 = vst.msk [vmem:[%s12822_s12 + $0x38] sm:$0xff] %vm6133_vm8, %v7109_v22 }
 0x69c PF: > { %s15_s18 = sadd.s32 1, %s10394_s18  }
 0x69d   : > { %p12_p4 = scmp.ge.s32.totalorder %s15_s18, 4  }
 0x69f   :  { %14 = sbr.rel (!%p12_p4) target bundleno = 1 (0x1), region = 88 }

</bundles_post_ra>
